<compile_context>
chip_gen: v7x
topology: tpu7x:2x2x1
jax: 0.10.0
libtpu: 0.0.40
codegen_flags: <defaults>
</compile_context>

<pallas_src>
import functools

import jax
import jax.numpy as jnp
from jax import lax
from jax.experimental import pallas as pl
from jax.experimental.pallas import tpu as pltpu


_VMEM_LIMIT = 32 * 1024 * 1024  # blocks here are tiny; safe on v5e/v6e/v7x


# ---------------------------------------------------------------------------
# Pallas kernels
# ---------------------------------------------------------------------------
def _res_block_kernel(*refs, H, W, cin, cmid, cout, has_proj, fuse_zup):
    """Fully fused '2x3' DecoderResBlock on one batch element, lane-dense layout.

    Input/outputs are (C, H*W) with H*W on lanes.  Optionally fuses the z_up 1x1
    conv + bias + residual add (first block of the decoder level):

        x   = s_dec [+ Wz @ z + bz]
        out = skip(x) + conv3x3(relu(conv3x3(relu(x)) + b1)) + b2
    """
    it = iter(refs)
    x_ref = next(it)
    if fuse_zup:
        z_ref, zw_ref, zb_ref = next(it), next(it), next(it)
    w1_ref, b1_ref, w2_ref, b2_ref = next(it), next(it), next(it), next(it)
    if has_proj:
        pw_ref, pb_ref = next(it), next(it)
    o_ref = next(it)

    hw = H * W
    x = x_ref[0]                                              # (cin, HW) f32

    if fuse_zup:
        z = z_ref[0].astype(jnp.bfloat16)                     # (zc, HW) bf16 MXU feed
        x = (x + jnp.dot(zw_ref[...], z, preferred_element_type=jnp.float32)
             + zb_ref[...])                                   # f32 epilogue

    # Column index along the lane (flattened spatial) dim, shared by both convs.
    col = lax.broadcasted_iota(jnp.int32, (1, hw), 1) % W

    def conv3x3(a_f32, w_ref, c_out_a):
        # a_f32: (c_a, HW).  Flat-pad with W+1 zeros on each side so every tap is
        # a static lane-offset slice; rows out of the image hit the zero pad, and
        # horizontal wrap across row boundaries is killed by the column mask.
        c_a = a_f32.shape[0]
        zpad = jnp.zeros((c_a, W + 1), jnp.float32)
        apad = jnp.concatenate([zpad, a_f32, zpad], axis=1)   # (c_a, HW + 2W + 2)
        acc = jnp.zeros((c_out_a, hw), jnp.float32)           # lane-dense accumulator
        tap = 0
        for oy in (-1, 0, 1):
            for ox in (-1, 0, 1):
                start = (W + 1) + oy * W + ox
                patch = apad[:, start:start + hw]             # (c_a, HW)
                if ox != 0:
                    valid = jnp.logical_and(col + ox >= 0, col + ox < W)
                    patch = jnp.where(valid, patch, jnp.zeros_like(patch))
                acc = acc + jnp.dot(w_ref[tap], patch.astype(jnp.bfloat16),
                                    preferred_element_type=jnp.float32)
                tap += 1
        return acc

    a1 = jnp.maximum(x, 0.0)                                  # relu, f32
    mid = jnp.maximum(conv3x3(a1, w1_ref, cmid) + b1_ref[...], 0.0)

    # Skip path: identity (cin == cout) or fused 1x1 projection of the raw input.
    if has_proj:
        skip = (jnp.dot(pw_ref[...], x.astype(jnp.bfloat16),
                        preferred_element_type=jnp.float32) + pb_ref[...])
    else:
        skip = x

    out = skip + conv3x3(mid, w2_ref, cout) + b2_ref[...]
    o_ref[0] = out                                            # full-lane store


def _logvar_kernel(lv_ref, o_ref, *, var_mode, beta):
    """get_logvar: optional log(softplus_beta(lv)) then clamp to [-5, 0]."""
    lv = lv_ref[...]
    if var_mode == "softplus":
        bx = beta * lv
        # Numerically stable softplus: (max(bx,0) + log(1 + exp(-|bx|))) / beta
        sp = (jnp.maximum(bx, 0.0) + jnp.log(1.0 + jnp.exp(-jnp.abs(bx)))) / beta
        lv = jnp.log(sp)
    o_ref[...] = jnp.clip(lv, -5.0, 0.0)


# ---------------------------------------------------------------------------
# pallas_call wrappers
# ---------------------------------------------------------------------------
def res_block(x_nchw, blk, z_nchw=None, zup_w=None, zup_b=None):
    """One fused DecoderResBlock; optionally fuses `s_dec + z_up(z)` (first block)."""
    n, cin, h, w = x_nchw.shape
    hw = h * w
    cmid = blk["w1"].shape[1]
    cout = blk["w2"].shape[1]
    has_proj = (cin != cout)
    fuse_zup = z_nchw is not None

    x_flat = x_nchw.reshape(n, cin, hw)                       # free reshape (NCHW)
    args = [x_flat]
    in_specs = [pl.BlockSpec((1, cin, hw), lambda b: (b, 0, 0))]
    if fuse_zup:
        zc = z_nchw.shape[1]
        args += [z_nchw.reshape(n, zc, hw), zup_w, zup_b]
        in_specs += [pl.BlockSpec((1, zc, hw), lambda b: (b, 0, 0)),
                     pl.BlockSpec((cin, zc), lambda b: (0, 0)),
                     pl.BlockSpec((cin, 1), lambda b: (0, 0))]
    args += [blk["w1"], blk["b1"], blk["w2"], blk["b2"]]
    in_specs += [pl.BlockSpec((9, cmid, cin), lambda b: (0, 0, 0)),
                 pl.BlockSpec((cmid, 1), lambda b: (0, 0)),
                 pl.BlockSpec((9, cout, cmid), lambda b: (0, 0, 0)),
                 pl.BlockSpec((cout, 1), lambda b: (0, 0))]
    if has_proj:
        args += [blk["proj_w"], blk["proj_b"]]
        in_specs += [pl.BlockSpec((cout, cin), lambda b: (0, 0)),
                     pl.BlockSpec((cout, 1), lambda b: (0, 0))]

    kern = functools.partial(_res_block_kernel, H=h, W=w, cin=cin, cmid=cmid,
                             cout=cout, has_proj=has_proj, fuse_zup=fuse_zup)
    out = pl.pallas_call(
        kern,
        out_shape=jax.ShapeDtypeStruct((n, cout, hw), jnp.float32),
        grid=(n,),
        in_specs=in_specs,
        out_specs=pl.BlockSpec((1, cout, hw), lambda b: (b, 0, 0)),
        compiler_params=pltpu.CompilerParams(
            dimension_semantics=("parallel",),
            vmem_limit_bytes=_VMEM_LIMIT),
    )(*args)
    return out.reshape(n, cout, h, w)


def get_logvar(lv_nchw, var_mode="softplus", softplus_beta=1.0):
    n, c, h, w = lv_nchw.shape
    hw = h * w
    rows = n * c
    flat = lv_nchw.reshape(rows, hw).astype(jnp.float32)      # lane-dense last dim

    # Largest block that comfortably fits VMEM (single grid step for small inputs).
    max_rows = max(8, (4 * 1024 * 1024) // max(hw * 4, 1))
    if rows <= max_rows:
        block_rows = rows
    else:
        block_rows = 8 if rows % 8 == 0 else rows
        while (block_rows * 2 <= max_rows) and (rows % (block_rows * 2) == 0):
            block_rows *= 2

    kern = functools.partial(_logvar_kernel, var_mode=var_mode,
                             beta=float(softplus_beta))
    out = pl.pallas_call(
        kern,
        out_shape=jax.ShapeDtypeStruct((rows, hw), jnp.float32),
        grid=(rows // block_rows,),
        in_specs=[pl.BlockSpec((block_rows, hw), lambda i: (i, 0))],
        out_specs=pl.BlockSpec((block_rows, hw), lambda i: (i, 0)),
        compiler_params=pltpu.CompilerParams(
            dimension_semantics=("parallel",),
            vmem_limit_bytes=_VMEM_LIMIT),
    )(flat)
    return out.reshape(n, c, h, w)


# ---------------------------------------------------------------------------
# Glue (layout only) + forward
# ---------------------------------------------------------------------------
def upsample_nearest_nchw(x, size):
    """nn.Upsample(size=size, mode='nearest') on NCHW; Identity if size is None."""
    if size is None:
        return x
    n, c, h, w = x.shape
    if size % h == 0 and size % w == 0:
        kh, kw = size // h, size // w       # single broadcast+reshape HBM pass
        x = jnp.broadcast_to(x[:, :, :, None, :, None], (n, c, h, kh, w, kw))
        return x.reshape(n, c, h * kh, w * kw)
    hi = (jnp.arange(size) * h) // size
    wi = (jnp.arange(size) * w) // size
    return x[:, :, hi][:, :, :, wi]


def decoder_block_forward(prep, s_dec_nchw, z_nchw, upsample_size=None):
    """
    s_dec_nchw: [MB, in_ch, sc, sc]   (PyTorch NCHW)
    z_nchw:     [MB, z_width, sc, sc] (latent sample; sampling is abstract upstream)
    returns s_out_nchw = upsample(resnet(s_dec + z_up(z)))
    """
    s = s_dec_nchw.astype(jnp.float32)
    z = z_nchw.astype(jnp.float32)
    blocks = prep["resnet"]
    if not blocks:
        zw = prep["z_up_w"].astype(jnp.float32)               # (cin, zc)
        s = s + jnp.einsum("cz,nzhw->nchw", zw, z) + prep["z_up_b"].reshape(1, -1, 1, 1)
    else:
        # z_up + residual add fused into the first res-block kernel.
        s = res_block(s, blocks[0], z_nchw=z,
                      zup_w=prep["z_up_w"], zup_b=prep["z_up_b"])
        for blk in blocks[1:]:
            s = res_block(s, blk)
    return upsample_nearest_nchw(s, upsample_size)


# ---------------------------------------------------------------------------
# Params: f32 init (checkpoint-like) + one-time prep (bf16, kernel-side layouts)
# ---------------------------------------------------------------------------
def init_params(key, in_channels, ch_mult, num_blocks_per_scale,
                out_channels, z_width):
    mid = int(in_channels * ch_mult)
    keys = jax.random.split(key, 2 + 6 * num_blocks_per_scale)
    ki = iter(keys)
    params = {
        "z_up_w": 0.1 * jax.random.normal(next(ki), (z_width, in_channels), jnp.float32),
        "z_up_b": 0.1 * jax.random.normal(next(ki), (in_channels,), jnp.float32),
        "resnet": [],
    }
    for b_num in range(num_blocks_per_scale):
        c_out = in_channels if b_num + 1 < num_blocks_per_scale else out_channels
        blk = {
            "w1": 0.1 * jax.random.normal(next(ki), (3, 3, in_channels, mid), jnp.float32),
            "b1": 0.1 * jax.random.normal(next(ki), (mid,), jnp.float32),
            "w2": 0.1 * jax.random.normal(next(ki), (3, 3, mid, c_out), jnp.float32),
            "b2": 0.1 * jax.random.normal(next(ki), (c_out,), jnp.float32),
            "proj_w": 0.1 * jax.random.normal(next(ki), (in_channels, c_out), jnp.float32),
            "proj_b": 0.1 * jax.random.normal(next(ki), (c_out,), jnp.float32),
        }
        params["resnet"].append(blk)
    return params


def prepare_params(raw):
    """One-time prep: transpose to (cout, cin)-per-tap layout, cast weights to bf16,
    keep biases f32 as (C, 1) columns (broadcast over the HW lane dim)."""
    prep = {
        "z_up_w": jnp.transpose(raw["z_up_w"]).astype(jnp.bfloat16),   # (cin, zc)
        "z_up_b": raw["z_up_b"].reshape(-1, 1).astype(jnp.float32),    # (cin, 1)
        "resnet": [],
    }
    for blk in raw["resnet"]:
        k1, k2 = blk["w1"], blk["w2"]                   # (3,3,cin,cmid), (3,3,cmid,cout)
        cmid, cout = k1.shape[-1], k2.shape[-1]
        prep["resnet"].append({
            "w1": jnp.transpose(k1, (0, 1, 3, 2)).reshape(9, cmid, k1.shape[2])
                     .astype(jnp.bfloat16),                            # (9, cmid, cin)
            "b1": blk["b1"].reshape(-1, 1).astype(jnp.float32),
            "w2": jnp.transpose(k2, (0, 1, 3, 2)).reshape(9, cout, k2.shape[2])
                     .astype(jnp.bfloat16),                            # (9, cout, cmid)
            "b2": blk["b2"].reshape(-1, 1).astype(jnp.float32),
            "proj_w": jnp.transpose(blk["proj_w"]).astype(jnp.bfloat16),  # (cout, cin)
            "proj_b": blk["proj_b"].reshape(-1, 1).astype(jnp.float32),
        })
    return prep


# ---------------------------------------------------------------------------
# Pure-JAX reference (f32) for a correctness check of the fused kernels
# ---------------------------------------------------------------------------
def _ref_forward(raw, s_dec_nchw, z_nchw, upsample_size):
    s = jnp.transpose(s_dec_nchw, (0, 2, 3, 1))
    z = jnp.transpose(z_nchw, (0, 2, 3, 1))
    s = s + jnp.einsum("nhwz,zc->nhwc", z, raw["z_up_w"]) + raw["z_up_b"]

    def conv(x, w, b):
        return lax.conv_general_dilated(
            x, w, (1, 1), "SAME",
            dimension_numbers=("NHWC", "HWIO", "NHWC")) + b

    for blk in raw["resnet"]:
        cin, cout = s.shape[-1], blk["w2"].shape[-1]
        mid = conv(jnp.maximum(s, 0.0), blk["w1"], blk["b1"])
        skip = s if cin == cout else (
            jnp.einsum("nhwc,cd->nhwd", s, blk["proj_w"]) + blk["proj_b"])
        s = skip + conv(jnp.maximum(mid, 0.0), blk["w2"], blk["b2"])
    n, h, w, c = s.shape
    k = upsample_size // h
    s = jnp.broadcast_to(s[:, :, None, :, None, :], (n, h, k, w, k, c))
    s = s.reshape(n, h * k, w * k, c)
    return jnp.transpose(s, (0, 3, 1, 2))


def _ref_logvar(lv, beta=1.0):
    sp = jnp.logaddexp(beta * lv, 0.0) / beta
    return jnp.clip(jnp.log(sp), -5.0, 0.0)


# ---------------------------------------------------------------------------
if __name__ == "__main__":
    MB, in_channels, z_width, p_width, scale = 2, 4, 4, 8, 16
    ch_mult, num_blocks, out_channels = 2.0, 2, 8   # out != in -> exercises 1x1 proj skip
    upsample_size = 32                               # nearest x2

    key = jax.random.PRNGKey(0)
    k_p, k_s, k_z, k_lv = jax.random.split(key, 4)
    raw = init_params(k_p, in_channels, ch_mult, num_blocks, out_channels, z_width)
    prep = prepare_params(raw)

    s_dec = jax.random.normal(k_s, (MB, in_channels, scale, scale), jnp.float32)
    z = jax.random.normal(k_z, (MB, z_width, scale, scale), jnp.float32)
    lv = jax.random.normal(k_lv, (MB, p_width, scale, scale), jnp.float32)

    fwd = jax.jit(decoder_block_forward, static_argnames=("upsample_size",))
    s_out = fwd(prep, s_dec, z, upsample_size=upsample_size)
    logvar = get_logvar(lv, var_mode="softplus", softplus_beta=1.0)
    jax.block_until_ready(s_out)
    jax.block_until_ready(logvar)

    # Shape / range checks
    assert s_out.shape == (MB, out_channels, upsample_size, upsample_size)
    assert logvar.shape == (MB, p_width, scale, scale)
    assert bool(jnp.all(logvar <= 0.0)) and bool(jnp.all(logvar >= -5.0))
    assert bool(jnp.all(jnp.isfinite(s_out)))

    # Numerical check vs pure-JAX f32 reference (kernels use bf16 MXU feeds,
    # f32 accumulation -> loose absolute tolerance; documented precision choice).
    s_ref = _ref_forward(raw, s_dec, z, upsample_size)
    max_err = float(jnp.max(jnp.abs(s_out - s_ref)))
    assert max_err < 0.25, f"forward mismatch vs reference: max_err={max_err}"

    lv_ref = _ref_logvar(lv, beta=1.0)
    lv_err = float(jnp.max(jnp.abs(logvar - lv_ref)))
    assert lv_err < 1e-4, f"logvar mismatch vs reference: max_err={lv_err}"

    print("KERNEL_OK")
</pallas_src>

<mosaic_0001>
module attributes {stable_mosaic.version = 11 : i64} {
  func.func @_res_block_kernel(%arg0: i32, %arg1: memref<1x4x256xf32, #tpu.memory_space<vmem>>, %arg2: memref<1x4x256xf32, #tpu.memory_space<vmem>>, %arg3: memref<4x4xbf16, #tpu.memory_space<vmem>>, %arg4: memref<4x1xf32, #tpu.memory_space<vmem>>, %arg5: memref<9x8x4xbf16, #tpu.memory_space<vmem>>, %arg6: memref<8x1xf32, #tpu.memory_space<vmem>>, %arg7: memref<9x4x8xbf16, #tpu.memory_space<vmem>>, %arg8: memref<4x1xf32, #tpu.memory_space<vmem>>, %arg9: memref<1x4x256xf32, #tpu.memory_space<vmem>>) attributes {dimension_semantics = [#tpu.dimension_semantics<parallel>], iteration_bounds = array<i64: 2>, scalar_prefetch = 0 : i64, scratch_operands = 0 : i64, tpu.core_type = #tpu.core_type<tc>, window_params = [{transform_indices = @transform_0, window_bounds = array<i64: 1, 4, 256>}, {transform_indices = @transform_1, window_bounds = array<i64: 1, 4, 256>}, {pipeline_mode = #tpu.pipeline_mode<synchronous>, transform_indices = @transform_2, window_bounds = array<i64: 4, 4>}, {pipeline_mode = #tpu.pipeline_mode<synchronous>, transform_indices = @transform_3, window_bounds = array<i64: 4, 1>}, {pipeline_mode = #tpu.pipeline_mode<synchronous>, transform_indices = @transform_4, window_bounds = array<i64: 9, 8, 4>}, {pipeline_mode = #tpu.pipeline_mode<synchronous>, transform_indices = @transform_5, window_bounds = array<i64: 8, 1>}, {pipeline_mode = #tpu.pipeline_mode<synchronous>, transform_indices = @transform_6, window_bounds = array<i64: 9, 4, 8>}, {pipeline_mode = #tpu.pipeline_mode<synchronous>, transform_indices = @transform_7, window_bounds = array<i64: 4, 1>}, {transform_indices = @transform_8, window_bounds = array<i64: 1, 4, 256>}]} {
    %c0 = arith.constant 0 : index
    %c0_0 = arith.constant 0 : index
    %c0_1 = arith.constant 0 : index
    %0 = vector.load %arg1[%c0, %c0_0, %c0_1] : memref<1x4x256xf32, #tpu.memory_space<vmem>>, vector<1x4x256xf32>
    %1 = vector.shape_cast %0 : vector<1x4x256xf32> to vector<4x256xf32>
    %c0_2 = arith.constant 0 : index
    %c0_3 = arith.constant 0 : index
    %c0_4 = arith.constant 0 : index
    %2 = vector.load %arg2[%c0_2, %c0_3, %c0_4] : memref<1x4x256xf32, #tpu.memory_space<vmem>>, vector<1x4x256xf32>
    %3 = vector.shape_cast %2 : vector<1x4x256xf32> to vector<4x256xf32>
    %4 = arith.truncf %3 : vector<4x256xf32> to vector<4x256xbf16>
    %c0_5 = arith.constant 0 : index
    %c0_6 = arith.constant 0 : index
    %5 = vector.load %arg3[%c0_5, %c0_6] : memref<4x4xbf16, #tpu.memory_space<vmem>>, vector<4x4xbf16>
    %cst = arith.constant dense<0.000000e+00> : vector<4x256xf32>
    %6 = tpu.matmul %5, %4, %cst {dimension_numbers = #tpu.dot_dimension_numbers<[1], [0], [0], [1], [0, 0, 1, 1], [], []>} : vector<4x4xbf16>, vector<4x256xbf16>, vector<4x256xf32> -> vector<4x256xf32>
    %7 = arith.addf %1, %6 : vector<4x256xf32>
    %c0_7 = arith.constant 0 : index
    %c0_8 = arith.constant 0 : index
    %8 = vector.load %arg4[%c0_7, %c0_8] : memref<4x1xf32, #tpu.memory_space<vmem>>, vector<4x1xf32>
    %9 = vector.broadcast %8 : vector<4x1xf32> to vector<4x256xf32>
    %10 = arith.addf %7, %9 : vector<4x256xf32>
    %11 = tpu.iota {dimensions = array<i32: 1>} : vector<1x256xi32>
    %c16_i32 = arith.constant 16 : i32
    %c0_i32 = arith.constant 0 : i32
    %12 = arith.cmpi eq, %c16_i32, %c0_i32 : i32
    %c1_i32 = arith.constant 1 : i32
    %13 = arith.select %12, %c1_i32, %c16_i32 : i32
    %14 = vector.broadcast %13 : i32 to vector<1x256xi32>
    %15 = arith.remsi %11, %14 : vector<1x256xi32>
    %c0_i32_9 = arith.constant 0 : i32
    %16 = vector.broadcast %c0_i32_9 : i32 to vector<1x256xi32>
    %17 = arith.cmpi ne, %15, %16 : vector<1x256xi32>
    %c0_i32_10 = arith.constant 0 : i32
    %18 = vector.broadcast %c0_i32_10 : i32 to vector<1x256xi32>
    %19 = arith.cmpi slt, %15, %18 : vector<1x256xi32>
    %c0_i32_11 = arith.constant 0 : i32
    %20 = arith.cmpi slt, %13, %c0_i32_11 : i32
    %21 = vector.broadcast %20 : i1 to vector<1x256xi1>
    %22 = vector.broadcast %21 : vector<1x256xi1> to vector<1x256xi1>
    %23 = arith.xori %19, %22 : vector<1x256xi1>
    %24 = arith.andi %23, %17 : vector<1x256xi1>
    %25 = vector.broadcast %13 : i32 to vector<1x256xi32>
    %26 = arith.addi %15, %25 : vector<1x256xi32>
    %27 = arith.select %24, %26, %15 : vector<1x256xi1>, vector<1x256xi32>
    %cst_12 = arith.constant 0.000000e+00 : f32
    %28 = vector.broadcast %cst_12 : f32 to vector<4x256xf32>
    %29 = arith.maximumf %10, %28 : vector<4x256xf32>
    %cst_13 = arith.constant 0.000000e+00 : f32
    %30 = vector.broadcast %cst_13 : f32 to vector<4x17xf32>
    %31 = tpu.concatenate %30, %29, %30 in 1 : vector<4x17xf32>, vector<4x256xf32>, vector<4x17xf32> -> vector<4x290xf32>
    %cst_14 = arith.constant 0.000000e+00 : f32
    %32 = vector.broadcast %cst_14 : f32 to vector<8x256xf32>
    %33 = vector.extract_strided_slice %31 {offsets = [0, 0], sizes = [4, 256], strides = [1, 1]} : vector<4x290xf32> to vector<4x256xf32>
    %c-1_i32 = arith.constant -1 : i32
    %34 = vector.broadcast %c-1_i32 : i32 to vector<1x256xi32>
    %35 = arith.addi %27, %34 : vector<1x256xi32>
    %c0_i32_15 = arith.constant 0 : i32
    %36 = vector.broadcast %c0_i32_15 : i32 to vector<1x256xi32>
    %37 = arith.cmpi sge, %35, %36 : vector<1x256xi32>
    %c-1_i32_16 = arith.constant -1 : i32
    %38 = vector.broadcast %c-1_i32_16 : i32 to vector<1x256xi32>
    %39 = arith.addi %27, %38 : vector<1x256xi32>
    %c16_i32_17 = arith.constant 16 : i32
    %40 = vector.broadcast %c16_i32_17 : i32 to vector<1x256xi32>
    %41 = arith.cmpi slt, %39, %40 : vector<1x256xi32>
    %42 = arith.andi %37, %41 : vector<1x256xi1>
    %cst_18 = arith.constant 0.000000e+00 : f32
    %43 = vector.broadcast %cst_18 : f32 to vector<4x256xf32>
    %44 = vector.shape_cast %42 : vector<1x256xi1> to vector<1x256xi1>
    %45 = vector.broadcast %44 : vector<1x256xi1> to vector<4x256xi1>
    %46 = arith.select %45, %33, %43 : vector<4x256xi1>, vector<4x256xf32>
    %c0_19 = arith.constant 0 : index
    %c0_20 = arith.constant 0 : index
    %c0_21 = arith.constant 0 : index
    %47 = vector.load %arg5[%c0_19, %c0_20, %c0_21] : memref<9x8x4xbf16, #tpu.memory_space<vmem>>, vector<1x8x4xbf16>
    %48 = vector.shape_cast %47 : vector<1x8x4xbf16> to vector<8x4xbf16>
    %49 = arith.truncf %46 : vector<4x256xf32> to vector<4x256xbf16>
    %cst_22 = arith.constant dense<0.000000e+00> : vector<8x256xf32>
    %50 = tpu.matmul %48, %49, %cst_22 {dimension_numbers = #tpu.dot_dimension_numbers<[1], [0], [0], [1], [0, 0, 1, 1], [], []>} : vector<8x4xbf16>, vector<4x256xbf16>, vector<8x256xf32> -> vector<8x256xf32>
    %51 = arith.addf %32, %50 : vector<8x256xf32>
    %52 = vector.extract_strided_slice %31 {offsets = [0, 1], sizes = [4, 256], strides = [1, 1]} : vector<4x290xf32> to vector<4x256xf32>
    %c1 = arith.constant 1 : index
    %c0_23 = arith.constant 0 : index
    %c0_24 = arith.constant 0 : index
    %53 = vector.load %arg5[%c1, %c0_23, %c0_24] : memref<9x8x4xbf16, #tpu.memory_space<vmem>>, vector<1x8x4xbf16>
    %54 = vector.shape_cast %53 : vector<1x8x4xbf16> to vector<8x4xbf16>
    %55 = arith.truncf %52 : vector<4x256xf32> to vector<4x256xbf16>
    %cst_25 = arith.constant dense<0.000000e+00> : vector<8x256xf32>
    %56 = tpu.matmul %54, %55, %cst_25 {dimension_numbers = #tpu.dot_dimension_numbers<[1], [0], [0], [1], [0, 0, 1, 1], [], []>} : vector<8x4xbf16>, vector<4x256xbf16>, vector<8x256xf32> -> vector<8x256xf32>
    %57 = arith.addf %51, %56 : vector<8x256xf32>
    %58 = vector.extract_strided_slice %31 {offsets = [0, 2], sizes = [4, 256], strides = [1, 1]} : vector<4x290xf32> to vector<4x256xf32>
    %c1_i32_26 = arith.constant 1 : i32
    %59 = vector.broadcast %c1_i32_26 : i32 to vector<1x256xi32>
    %60 = arith.addi %27, %59 : vector<1x256xi32>
    %c0_i32_27 = arith.constant 0 : i32
    %61 = vector.broadcast %c0_i32_27 : i32 to vector<1x256xi32>
    %62 = arith.cmpi sge, %60, %61 : vector<1x256xi32>
    %c1_i32_28 = arith.constant 1 : i32
    %63 = vector.broadcast %c1_i32_28 : i32 to vector<1x256xi32>
    %64 = arith.addi %27, %63 : vector<1x256xi32>
    %c16_i32_29 = arith.constant 16 : i32
    %65 = vector.broadcast %c16_i32_29 : i32 to vector<1x256xi32>
    %66 = arith.cmpi slt, %64, %65 : vector<1x256xi32>
    %67 = arith.andi %62, %66 : vector<1x256xi1>
    %cst_30 = arith.constant 0.000000e+00 : f32
    %68 = vector.broadcast %cst_30 : f32 to vector<4x256xf32>
    %69 = vector.shape_cast %67 : vector<1x256xi1> to vector<1x256xi1>
    %70 = vector.broadcast %69 : vector<1x256xi1> to vector<4x256xi1>
    %71 = arith.select %70, %58, %68 : vector<4x256xi1>, vector<4x256xf32>
    %c2 = arith.constant 2 : index
    %c0_31 = arith.constant 0 : index
    %c0_32 = arith.constant 0 : index
    %72 = vector.load %arg5[%c2, %c0_31, %c0_32] : memref<9x8x4xbf16, #tpu.memory_space<vmem>>, vector<1x8x4xbf16>
    %73 = vector.shape_cast %72 : vector<1x8x4xbf16> to vector<8x4xbf16>
    %74 = arith.truncf %71 : vector<4x256xf32> to vector<4x256xbf16>
    %cst_33 = arith.constant dense<0.000000e+00> : vector<8x256xf32>
    %75 = tpu.matmul %73, %74, %cst_33 {dimension_numbers = #tpu.dot_dimension_numbers<[1], [0], [0], [1], [0, 0, 1, 1], [], []>} : vector<8x4xbf16>, vector<4x256xbf16>, vector<8x256xf32> -> vector<8x256xf32>
    %76 = arith.addf %57, %75 : vector<8x256xf32>
    %77 = vector.extract_strided_slice %31 {offsets = [0, 16], sizes = [4, 256], strides = [1, 1]} : vector<4x290xf32> to vector<4x256xf32>
    %c-1_i32_34 = arith.constant -1 : i32
    %78 = vector.broadcast %c-1_i32_34 : i32 to vector<1x256xi32>
    %79 = arith.addi %27, %78 : vector<1x256xi32>
    %c0_i32_35 = arith.constant 0 : i32
    %80 = vector.broadcast %c0_i32_35 : i32 to vector<1x256xi32>
    %81 = arith.cmpi sge, %79, %80 : vector<1x256xi32>
    %c-1_i32_36 = arith.constant -1 : i32
    %82 = vector.broadcast %c-1_i32_36 : i32 to vector<1x256xi32>
    %83 = arith.addi %27, %82 : vector<1x256xi32>
    %c16_i32_37 = arith.constant 16 : i32
    %84 = vector.broadcast %c16_i32_37 : i32 to vector<1x256xi32>
    %85 = arith.cmpi slt, %83, %84 : vector<1x256xi32>
    %86 = arith.andi %81, %85 : vector<1x256xi1>
    %cst_38 = arith.constant 0.000000e+00 : f32
    %87 = vector.broadcast %cst_38 : f32 to vector<4x256xf32>
    %88 = vector.shape_cast %86 : vector<1x256xi1> to vector<1x256xi1>
    %89 = vector.broadcast %88 : vector<1x256xi1> to vector<4x256xi1>
    %90 = arith.select %89, %77, %87 : vector<4x256xi1>, vector<4x256xf32>
    %c3 = arith.constant 3 : index
    %c0_39 = arith.constant 0 : index
    %c0_40 = arith.constant 0 : index
    %91 = vector.load %arg5[%c3, %c0_39, %c0_40] : memref<9x8x4xbf16, #tpu.memory_space<vmem>>, vector<1x8x4xbf16>
    %92 = vector.shape_cast %91 : vector<1x8x4xbf16> to vector<8x4xbf16>
    %93 = arith.truncf %90 : vector<4x256xf32> to vector<4x256xbf16>
    %cst_41 = arith.constant dense<0.000000e+00> : vector<8x256xf32>
    %94 = tpu.matmul %92, %93, %cst_41 {dimension_numbers = #tpu.dot_dimension_numbers<[1], [0], [0], [1], [0, 0, 1, 1], [], []>} : vector<8x4xbf16>, vector<4x256xbf16>, vector<8x256xf32> -> vector<8x256xf32>
    %95 = arith.addf %76, %94 : vector<8x256xf32>
    %96 = vector.extract_strided_slice %31 {offsets = [0, 17], sizes = [4, 256], strides = [1, 1]} : vector<4x290xf32> to vector<4x256xf32>
    %c4 = arith.constant 4 : index
    %c0_42 = arith.constant 0 : index
    %c0_43 = arith.constant 0 : index
    %97 = vector.load %arg5[%c4, %c0_42, %c0_43] : memref<9x8x4xbf16, #tpu.memory_space<vmem>>, vector<1x8x4xbf16>
    %98 = vector.shape_cast %97 : vector<1x8x4xbf16> to vector<8x4xbf16>
    %99 = arith.truncf %96 : vector<4x256xf32> to vector<4x256xbf16>
    %cst_44 = arith.constant dense<0.000000e+00> : vector<8x256xf32>
    %100 = tpu.matmul %98, %99, %cst_44 {dimension_numbers = #tpu.dot_dimension_numbers<[1], [0], [0], [1], [0, 0, 1, 1], [], []>} : vector<8x4xbf16>, vector<4x256xbf16>, vector<8x256xf32> -> vector<8x256xf32>
    %101 = arith.addf %95, %100 : vector<8x256xf32>
    %102 = vector.extract_strided_slice %31 {offsets = [0, 18], sizes = [4, 256], strides = [1, 1]} : vector<4x290xf32> to vector<4x256xf32>
    %c1_i32_45 = arith.constant 1 : i32
    %103 = vector.broadcast %c1_i32_45 : i32 to vector<1x256xi32>
    %104 = arith.addi %27, %103 : vector<1x256xi32>
    %c0_i32_46 = arith.constant 0 : i32
    %105 = vector.broadcast %c0_i32_46 : i32 to vector<1x256xi32>
    %106 = arith.cmpi sge, %104, %105 : vector<1x256xi32>
    %c1_i32_47 = arith.constant 1 : i32
    %107 = vector.broadcast %c1_i32_47 : i32 to vector<1x256xi32>
    %108 = arith.addi %27, %107 : vector<1x256xi32>
    %c16_i32_48 = arith.constant 16 : i32
    %109 = vector.broadcast %c16_i32_48 : i32 to vector<1x256xi32>
    %110 = arith.cmpi slt, %108, %109 : vector<1x256xi32>
    %111 = arith.andi %106, %110 : vector<1x256xi1>
    %cst_49 = arith.constant 0.000000e+00 : f32
    %112 = vector.broadcast %cst_49 : f32 to vector<4x256xf32>
    %113 = vector.shape_cast %111 : vector<1x256xi1> to vector<1x256xi1>
    %114 = vector.broadcast %113 : vector<1x256xi1> to vector<4x256xi1>
    %115 = arith.select %114, %102, %112 : vector<4x256xi1>, vector<4x256xf32>
    %c5 = arith.constant 5 : index
    %c0_50 = arith.constant 0 : index
    %c0_51 = arith.constant 0 : index
    %116 = vector.load %arg5[%c5, %c0_50, %c0_51] : memref<9x8x4xbf16, #tpu.memory_space<vmem>>, vector<1x8x4xbf16>
    %117 = vector.shape_cast %116 : vector<1x8x4xbf16> to vector<8x4xbf16>
    %118 = arith.truncf %115 : vector<4x256xf32> to vector<4x256xbf16>
    %cst_52 = arith.constant dense<0.000000e+00> : vector<8x256xf32>
    %119 = tpu.matmul %117, %118, %cst_52 {dimension_numbers = #tpu.dot_dimension_numbers<[1], [0], [0], [1], [0, 0, 1, 1], [], []>} : vector<8x4xbf16>, vector<4x256xbf16>, vector<8x256xf32> -> vector<8x256xf32>
    %120 = arith.addf %101, %119 : vector<8x256xf32>
    %121 = vector.extract_strided_slice %31 {offsets = [0, 32], sizes = [4, 256], strides = [1, 1]} : vector<4x290xf32> to vector<4x256xf32>
    %c-1_i32_53 = arith.constant -1 : i32
    %122 = vector.broadcast %c-1_i32_53 : i32 to vector<1x256xi32>
    %123 = arith.addi %27, %122 : vector<1x256xi32>
    %c0_i32_54 = arith.constant 0 : i32
    %124 = vector.broadcast %c0_i32_54 : i32 to vector<1x256xi32>
    %125 = arith.cmpi sge, %123, %124 : vector<1x256xi32>
    %c-1_i32_55 = arith.constant -1 : i32
    %126 = vector.broadcast %c-1_i32_55 : i32 to vector<1x256xi32>
    %127 = arith.addi %27, %126 : vector<1x256xi32>
    %c16_i32_56 = arith.constant 16 : i32
    %128 = vector.broadcast %c16_i32_56 : i32 to vector<1x256xi32>
    %129 = arith.cmpi slt, %127, %128 : vector<1x256xi32>
    %130 = arith.andi %125, %129 : vector<1x256xi1>
    %cst_57 = arith.constant 0.000000e+00 : f32
    %131 = vector.broadcast %cst_57 : f32 to vector<4x256xf32>
    %132 = vector.shape_cast %130 : vector<1x256xi1> to vector<1x256xi1>
    %133 = vector.broadcast %132 : vector<1x256xi1> to vector<4x256xi1>
    %134 = arith.select %133, %121, %131 : vector<4x256xi1>, vector<4x256xf32>
    %c6 = arith.constant 6 : index
    %c0_58 = arith.constant 0 : index
    %c0_59 = arith.constant 0 : index
    %135 = vector.load %arg5[%c6, %c0_58, %c0_59] : memref<9x8x4xbf16, #tpu.memory_space<vmem>>, vector<1x8x4xbf16>
    %136 = vector.shape_cast %135 : vector<1x8x4xbf16> to vector<8x4xbf16>
    %137 = arith.truncf %134 : vector<4x256xf32> to vector<4x256xbf16>
    %cst_60 = arith.constant dense<0.000000e+00> : vector<8x256xf32>
    %138 = tpu.matmul %136, %137, %cst_60 {dimension_numbers = #tpu.dot_dimension_numbers<[1], [0], [0], [1], [0, 0, 1, 1], [], []>} : vector<8x4xbf16>, vector<4x256xbf16>, vector<8x256xf32> -> vector<8x256xf32>
    %139 = arith.addf %120, %138 : vector<8x256xf32>
    %140 = vector.extract_strided_slice %31 {offsets = [0, 33], sizes = [4, 256], strides = [1, 1]} : vector<4x290xf32> to vector<4x256xf32>
    %c7 = arith.constant 7 : index
    %c0_61 = arith.constant 0 : index
    %c0_62 = arith.constant 0 : index
    %141 = vector.load %arg5[%c7, %c0_61, %c0_62] : memref<9x8x4xbf16, #tpu.memory_space<vmem>>, vector<1x8x4xbf16>
    %142 = vector.shape_cast %141 : vector<1x8x4xbf16> to vector<8x4xbf16>
    %143 = arith.truncf %140 : vector<4x256xf32> to vector<4x256xbf16>
    %cst_63 = arith.constant dense<0.000000e+00> : vector<8x256xf32>
    %144 = tpu.matmul %142, %143, %cst_63 {dimension_numbers = #tpu.dot_dimension_numbers<[1], [0], [0], [1], [0, 0, 1, 1], [], []>} : vector<8x4xbf16>, vector<4x256xbf16>, vector<8x256xf32> -> vector<8x256xf32>
    %145 = arith.addf %139, %144 : vector<8x256xf32>
    %146 = vector.extract_strided_slice %31 {offsets = [0, 34], sizes = [4, 256], strides = [1, 1]} : vector<4x290xf32> to vector<4x256xf32>
    %c1_i32_64 = arith.constant 1 : i32
    %147 = vector.broadcast %c1_i32_64 : i32 to vector<1x256xi32>
    %148 = arith.addi %27, %147 : vector<1x256xi32>
    %c0_i32_65 = arith.constant 0 : i32
    %149 = vector.broadcast %c0_i32_65 : i32 to vector<1x256xi32>
    %150 = arith.cmpi sge, %148, %149 : vector<1x256xi32>
    %c1_i32_66 = arith.constant 1 : i32
    %151 = vector.broadcast %c1_i32_66 : i32 to vector<1x256xi32>
    %152 = arith.addi %27, %151 : vector<1x256xi32>
    %c16_i32_67 = arith.constant 16 : i32
    %153 = vector.broadcast %c16_i32_67 : i32 to vector<1x256xi32>
    %154 = arith.cmpi slt, %152, %153 : vector<1x256xi32>
    %155 = arith.andi %150, %154 : vector<1x256xi1>
    %cst_68 = arith.constant 0.000000e+00 : f32
    %156 = vector.broadcast %cst_68 : f32 to vector<4x256xf32>
    %157 = vector.shape_cast %155 : vector<1x256xi1> to vector<1x256xi1>
    %158 = vector.broadcast %157 : vector<1x256xi1> to vector<4x256xi1>
    %159 = arith.select %158, %146, %156 : vector<4x256xi1>, vector<4x256xf32>
    %c8 = arith.constant 8 : index
    %c0_69 = arith.constant 0 : index
    %c0_70 = arith.constant 0 : index
    %160 = vector.load %arg5[%c8, %c0_69, %c0_70] : memref<9x8x4xbf16, #tpu.memory_space<vmem>>, vector<1x8x4xbf16>
    %161 = vector.shape_cast %160 : vector<1x8x4xbf16> to vector<8x4xbf16>
    %162 = arith.truncf %159 : vector<4x256xf32> to vector<4x256xbf16>
    %cst_71 = arith.constant dense<0.000000e+00> : vector<8x256xf32>
    %163 = tpu.matmul %161, %162, %cst_71 {dimension_numbers = #tpu.dot_dimension_numbers<[1], [0], [0], [1], [0, 0, 1, 1], [], []>} : vector<8x4xbf16>, vector<4x256xbf16>, vector<8x256xf32> -> vector<8x256xf32>
    %164 = arith.addf %145, %163 : vector<8x256xf32>
    %c0_72 = arith.constant 0 : index
    %c0_73 = arith.constant 0 : index
    %165 = vector.load %arg6[%c0_72, %c0_73] : memref<8x1xf32, #tpu.memory_space<vmem>>, vector<8x1xf32>
    %166 = vector.broadcast %165 : vector<8x1xf32> to vector<8x256xf32>
    %167 = arith.addf %164, %166 : vector<8x256xf32>
    %cst_74 = arith.constant 0.000000e+00 : f32
    %168 = vector.broadcast %cst_74 : f32 to vector<8x256xf32>
    %169 = arith.maximumf %167, %168 : vector<8x256xf32>
    %cst_75 = arith.constant 0.000000e+00 : f32
    %170 = vector.broadcast %cst_75 : f32 to vector<8x17xf32>
    %171 = tpu.concatenate %170, %169, %170 in 1 : vector<8x17xf32>, vector<8x256xf32>, vector<8x17xf32> -> vector<8x290xf32>
    %cst_76 = arith.constant 0.000000e+00 : f32
    %172 = vector.broadcast %cst_76 : f32 to vector<4x256xf32>
    %173 = vector.extract_strided_slice %171 {offsets = [0, 0], sizes = [8, 256], strides = [1, 1]} : vector<8x290xf32> to vector<8x256xf32>
    %c-1_i32_77 = arith.constant -1 : i32
    %174 = vector.broadcast %c-1_i32_77 : i32 to vector<1x256xi32>
    %175 = arith.addi %27, %174 : vector<1x256xi32>
    %c0_i32_78 = arith.constant 0 : i32
    %176 = vector.broadcast %c0_i32_78 : i32 to vector<1x256xi32>
    %177 = arith.cmpi sge, %175, %176 : vector<1x256xi32>
    %c-1_i32_79 = arith.constant -1 : i32
    %178 = vector.broadcast %c-1_i32_79 : i32 to vector<1x256xi32>
    %179 = arith.addi %27, %178 : vector<1x256xi32>
    %c16_i32_80 = arith.constant 16 : i32
    %180 = vector.broadcast %c16_i32_80 : i32 to vector<1x256xi32>
    %181 = arith.cmpi slt, %179, %180 : vector<1x256xi32>
    %182 = arith.andi %177, %181 : vector<1x256xi1>
    %cst_81 = arith.constant 0.000000e+00 : f32
    %183 = vector.broadcast %cst_81 : f32 to vector<8x256xf32>
    %184 = vector.shape_cast %182 : vector<1x256xi1> to vector<1x256xi1>
    %185 = vector.broadcast %184 : vector<1x256xi1> to vector<8x256xi1>
    %186 = arith.select %185, %173, %183 : vector<8x256xi1>, vector<8x256xf32>
    %c0_82 = arith.constant 0 : index
    %c0_83 = arith.constant 0 : index
    %c0_84 = arith.constant 0 : index
    %187 = vector.load %arg7[%c0_82, %c0_83, %c0_84] : memref<9x4x8xbf16, #tpu.memory_space<vmem>>, vector<1x4x8xbf16>
    %188 = vector.shape_cast %187 : vector<1x4x8xbf16> to vector<4x8xbf16>
    %189 = arith.truncf %186 : vector<8x256xf32> to vector<8x256xbf16>
    %cst_85 = arith.constant dense<0.000000e+00> : vector<4x256xf32>
    %190 = tpu.matmul %188, %189, %cst_85 {dimension_numbers = #tpu.dot_dimension_numbers<[1], [0], [0], [1], [0, 0, 1, 1], [], []>} : vector<4x8xbf16>, vector<8x256xbf16>, vector<4x256xf32> -> vector<4x256xf32>
    %191 = arith.addf %172, %190 : vector<4x256xf32>
    %192 = vector.extract_strided_slice %171 {offsets = [0, 1], sizes = [8, 256], strides = [1, 1]} : vector<8x290xf32> to vector<8x256xf32>
    %c1_86 = arith.constant 1 : index
    %c0_87 = arith.constant 0 : index
    %c0_88 = arith.constant 0 : index
    %193 = vector.load %arg7[%c1_86, %c0_87, %c0_88] : memref<9x4x8xbf16, #tpu.memory_space<vmem>>, vector<1x4x8xbf16>
    %194 = vector.shape_cast %193 : vector<1x4x8xbf16> to vector<4x8xbf16>
    %195 = arith.truncf %192 : vector<8x256xf32> to vector<8x256xbf16>
    %cst_89 = arith.constant dense<0.000000e+00> : vector<4x256xf32>
    %196 = tpu.matmul %194, %195, %cst_89 {dimension_numbers = #tpu.dot_dimension_numbers<[1], [0], [0], [1], [0, 0, 1, 1], [], []>} : vector<4x8xbf16>, vector<8x256xbf16>, vector<4x256xf32> -> vector<4x256xf32>
    %197 = arith.addf %191, %196 : vector<4x256xf32>
    %198 = vector.extract_strided_slice %171 {offsets = [0, 2], sizes = [8, 256], strides = [1, 1]} : vector<8x290xf32> to vector<8x256xf32>
    %c1_i32_90 = arith.constant 1 : i32
    %199 = vector.broadcast %c1_i32_90 : i32 to vector<1x256xi32>
    %200 = arith.addi %27, %199 : vector<1x256xi32>
    %c0_i32_91 = arith.constant 0 : i32
    %201 = vector.broadcast %c0_i32_91 : i32 to vector<1x256xi32>
    %202 = arith.cmpi sge, %200, %201 : vector<1x256xi32>
    %c1_i32_92 = arith.constant 1 : i32
    %203 = vector.broadcast %c1_i32_92 : i32 to vector<1x256xi32>
    %204 = arith.addi %27, %203 : vector<1x256xi32>
    %c16_i32_93 = arith.constant 16 : i32
    %205 = vector.broadcast %c16_i32_93 : i32 to vector<1x256xi32>
    %206 = arith.cmpi slt, %204, %205 : vector<1x256xi32>
    %207 = arith.andi %202, %206 : vector<1x256xi1>
    %cst_94 = arith.constant 0.000000e+00 : f32
    %208 = vector.broadcast %cst_94 : f32 to vector<8x256xf32>
    %209 = vector.shape_cast %207 : vector<1x256xi1> to vector<1x256xi1>
    %210 = vector.broadcast %209 : vector<1x256xi1> to vector<8x256xi1>
    %211 = arith.select %210, %198, %208 : vector<8x256xi1>, vector<8x256xf32>
    %c2_95 = arith.constant 2 : index
    %c0_96 = arith.constant 0 : index
    %c0_97 = arith.constant 0 : index
    %212 = vector.load %arg7[%c2_95, %c0_96, %c0_97] : memref<9x4x8xbf16, #tpu.memory_space<vmem>>, vector<1x4x8xbf16>
    %213 = vector.shape_cast %212 : vector<1x4x8xbf16> to vector<4x8xbf16>
    %214 = arith.truncf %211 : vector<8x256xf32> to vector<8x256xbf16>
    %cst_98 = arith.constant dense<0.000000e+00> : vector<4x256xf32>
    %215 = tpu.matmul %213, %214, %cst_98 {dimension_numbers = #tpu.dot_dimension_numbers<[1], [0], [0], [1], [0, 0, 1, 1], [], []>} : vector<4x8xbf16>, vector<8x256xbf16>, vector<4x256xf32> -> vector<4x256xf32>
    %216 = arith.addf %197, %215 : vector<4x256xf32>
    %217 = vector.extract_strided_slice %171 {offsets = [0, 16], sizes = [8, 256], strides = [1, 1]} : vector<8x290xf32> to vector<8x256xf32>
    %c-1_i32_99 = arith.constant -1 : i32
    %218 = vector.broadcast %c-1_i32_99 : i32 to vector<1x256xi32>
    %219 = arith.addi %27, %218 : vector<1x256xi32>
    %c0_i32_100 = arith.constant 0 : i32
    %220 = vector.broadcast %c0_i32_100 : i32 to vector<1x256xi32>
    %221 = arith.cmpi sge, %219, %220 : vector<1x256xi32>
    %c-1_i32_101 = arith.constant -1 : i32
    %222 = vector.broadcast %c-1_i32_101 : i32 to vector<1x256xi32>
    %223 = arith.addi %27, %222 : vector<1x256xi32>
    %c16_i32_102 = arith.constant 16 : i32
    %224 = vector.broadcast %c16_i32_102 : i32 to vector<1x256xi32>
    %225 = arith.cmpi slt, %223, %224 : vector<1x256xi32>
    %226 = arith.andi %221, %225 : vector<1x256xi1>
    %cst_103 = arith.constant 0.000000e+00 : f32
    %227 = vector.broadcast %cst_103 : f32 to vector<8x256xf32>
    %228 = vector.shape_cast %226 : vector<1x256xi1> to vector<1x256xi1>
    %229 = vector.broadcast %228 : vector<1x256xi1> to vector<8x256xi1>
    %230 = arith.select %229, %217, %227 : vector<8x256xi1>, vector<8x256xf32>
    %c3_104 = arith.constant 3 : index
    %c0_105 = arith.constant 0 : index
    %c0_106 = arith.constant 0 : index
    %231 = vector.load %arg7[%c3_104, %c0_105, %c0_106] : memref<9x4x8xbf16, #tpu.memory_space<vmem>>, vector<1x4x8xbf16>
    %232 = vector.shape_cast %231 : vector<1x4x8xbf16> to vector<4x8xbf16>
    %233 = arith.truncf %230 : vector<8x256xf32> to vector<8x256xbf16>
    %cst_107 = arith.constant dense<0.000000e+00> : vector<4x256xf32>
    %234 = tpu.matmul %232, %233, %cst_107 {dimension_numbers = #tpu.dot_dimension_numbers<[1], [0], [0], [1], [0, 0, 1, 1], [], []>} : vector<4x8xbf16>, vector<8x256xbf16>, vector<4x256xf32> -> vector<4x256xf32>
    %235 = arith.addf %216, %234 : vector<4x256xf32>
    %236 = vector.extract_strided_slice %171 {offsets = [0, 17], sizes = [8, 256], strides = [1, 1]} : vector<8x290xf32> to vector<8x256xf32>
    %c4_108 = arith.constant 4 : index
    %c0_109 = arith.constant 0 : index
    %c0_110 = arith.constant 0 : index
    %237 = vector.load %arg7[%c4_108, %c0_109, %c0_110] : memref<9x4x8xbf16, #tpu.memory_space<vmem>>, vector<1x4x8xbf16>
    %238 = vector.shape_cast %237 : vector<1x4x8xbf16> to vector<4x8xbf16>
    %239 = arith.truncf %236 : vector<8x256xf32> to vector<8x256xbf16>
    %cst_111 = arith.constant dense<0.000000e+00> : vector<4x256xf32>
    %240 = tpu.matmul %238, %239, %cst_111 {dimension_numbers = #tpu.dot_dimension_numbers<[1], [0], [0], [1], [0, 0, 1, 1], [], []>} : vector<4x8xbf16>, vector<8x256xbf16>, vector<4x256xf32> -> vector<4x256xf32>
    %241 = arith.addf %235, %240 : vector<4x256xf32>
    %242 = vector.extract_strided_slice %171 {offsets = [0, 18], sizes = [8, 256], strides = [1, 1]} : vector<8x290xf32> to vector<8x256xf32>
    %c1_i32_112 = arith.constant 1 : i32
    %243 = vector.broadcast %c1_i32_112 : i32 to vector<1x256xi32>
    %244 = arith.addi %27, %243 : vector<1x256xi32>
    %c0_i32_113 = arith.constant 0 : i32
    %245 = vector.broadcast %c0_i32_113 : i32 to vector<1x256xi32>
    %246 = arith.cmpi sge, %244, %245 : vector<1x256xi32>
    %c1_i32_114 = arith.constant 1 : i32
    %247 = vector.broadcast %c1_i32_114 : i32 to vector<1x256xi32>
    %248 = arith.addi %27, %247 : vector<1x256xi32>
    %c16_i32_115 = arith.constant 16 : i32
    %249 = vector.broadcast %c16_i32_115 : i32 to vector<1x256xi32>
    %250 = arith.cmpi slt, %248, %249 : vector<1x256xi32>
    %251 = arith.andi %246, %250 : vector<1x256xi1>
    %cst_116 = arith.constant 0.000000e+00 : f32
    %252 = vector.broadcast %cst_116 : f32 to vector<8x256xf32>
    %253 = vector.shape_cast %251 : vector<1x256xi1> to vector<1x256xi1>
    %254 = vector.broadcast %253 : vector<1x256xi1> to vector<8x256xi1>
    %255 = arith.select %254, %242, %252 : vector<8x256xi1>, vector<8x256xf32>
    %c5_117 = arith.constant 5 : index
    %c0_118 = arith.constant 0 : index
    %c0_119 = arith.constant 0 : index
    %256 = vector.load %arg7[%c5_117, %c0_118, %c0_119] : memref<9x4x8xbf16, #tpu.memory_space<vmem>>, vector<1x4x8xbf16>
    %257 = vector.shape_cast %256 : vector<1x4x8xbf16> to vector<4x8xbf16>
    %258 = arith.truncf %255 : vector<8x256xf32> to vector<8x256xbf16>
    %cst_120 = arith.constant dense<0.000000e+00> : vector<4x256xf32>
    %259 = tpu.matmul %257, %258, %cst_120 {dimension_numbers = #tpu.dot_dimension_numbers<[1], [0], [0], [1], [0, 0, 1, 1], [], []>} : vector<4x8xbf16>, vector<8x256xbf16>, vector<4x256xf32> -> vector<4x256xf32>
    %260 = arith.addf %241, %259 : vector<4x256xf32>
    %261 = vector.extract_strided_slice %171 {offsets = [0, 32], sizes = [8, 256], strides = [1, 1]} : vector<8x290xf32> to vector<8x256xf32>
    %c-1_i32_121 = arith.constant -1 : i32
    %262 = vector.broadcast %c-1_i32_121 : i32 to vector<1x256xi32>
    %263 = arith.addi %27, %262 : vector<1x256xi32>
    %c0_i32_122 = arith.constant 0 : i32
    %264 = vector.broadcast %c0_i32_122 : i32 to vector<1x256xi32>
    %265 = arith.cmpi sge, %263, %264 : vector<1x256xi32>
    %c-1_i32_123 = arith.constant -1 : i32
    %266 = vector.broadcast %c-1_i32_123 : i32 to vector<1x256xi32>
    %267 = arith.addi %27, %266 : vector<1x256xi32>
    %c16_i32_124 = arith.constant 16 : i32
    %268 = vector.broadcast %c16_i32_124 : i32 to vector<1x256xi32>
    %269 = arith.cmpi slt, %267, %268 : vector<1x256xi32>
    %270 = arith.andi %265, %269 : vector<1x256xi1>
    %cst_125 = arith.constant 0.000000e+00 : f32
    %271 = vector.broadcast %cst_125 : f32 to vector<8x256xf32>
    %272 = vector.shape_cast %270 : vector<1x256xi1> to vector<1x256xi1>
    %273 = vector.broadcast %272 : vector<1x256xi1> to vector<8x256xi1>
    %274 = arith.select %273, %261, %271 : vector<8x256xi1>, vector<8x256xf32>
    %c6_126 = arith.constant 6 : index
    %c0_127 = arith.constant 0 : index
    %c0_128 = arith.constant 0 : index
    %275 = vector.load %arg7[%c6_126, %c0_127, %c0_128] : memref<9x4x8xbf16, #tpu.memory_space<vmem>>, vector<1x4x8xbf16>
    %276 = vector.shape_cast %275 : vector<1x4x8xbf16> to vector<4x8xbf16>
    %277 = arith.truncf %274 : vector<8x256xf32> to vector<8x256xbf16>
    %cst_129 = arith.constant dense<0.000000e+00> : vector<4x256xf32>
    %278 = tpu.matmul %276, %277, %cst_129 {dimension_numbers = #tpu.dot_dimension_numbers<[1], [0], [0], [1], [0, 0, 1, 1], [], []>} : vector<4x8xbf16>, vector<8x256xbf16>, vector<4x256xf32> -> vector<4x256xf32>
    %279 = arith.addf %260, %278 : vector<4x256xf32>
    %280 = vector.extract_strided_slice %171 {offsets = [0, 33], sizes = [8, 256], strides = [1, 1]} : vector<8x290xf32> to vector<8x256xf32>
    %c7_130 = arith.constant 7 : index
    %c0_131 = arith.constant 0 : index
    %c0_132 = arith.constant 0 : index
    %281 = vector.load %arg7[%c7_130, %c0_131, %c0_132] : memref<9x4x8xbf16, #tpu.memory_space<vmem>>, vector<1x4x8xbf16>
    %282 = vector.shape_cast %281 : vector<1x4x8xbf16> to vector<4x8xbf16>
    %283 = arith.truncf %280 : vector<8x256xf32> to vector<8x256xbf16>
    %cst_133 = arith.constant dense<0.000000e+00> : vector<4x256xf32>
    %284 = tpu.matmul %282, %283, %cst_133 {dimension_numbers = #tpu.dot_dimension_numbers<[1], [0], [0], [1], [0, 0, 1, 1], [], []>} : vector<4x8xbf16>, vector<8x256xbf16>, vector<4x256xf32> -> vector<4x256xf32>
    %285 = arith.addf %279, %284 : vector<4x256xf32>
    %286 = vector.extract_strided_slice %171 {offsets = [0, 34], sizes = [8, 256], strides = [1, 1]} : vector<8x290xf32> to vector<8x256xf32>
    %c1_i32_134 = arith.constant 1 : i32
    %287 = vector.broadcast %c1_i32_134 : i32 to vector<1x256xi32>
    %288 = arith.addi %27, %287 : vector<1x256xi32>
    %c0_i32_135 = arith.constant 0 : i32
    %289 = vector.broadcast %c0_i32_135 : i32 to vector<1x256xi32>
    %290 = arith.cmpi sge, %288, %289 : vector<1x256xi32>
    %c1_i32_136 = arith.constant 1 : i32
    %291 = vector.broadcast %c1_i32_136 : i32 to vector<1x256xi32>
    %292 = arith.addi %27, %291 : vector<1x256xi32>
    %c16_i32_137 = arith.constant 16 : i32
    %293 = vector.broadcast %c16_i32_137 : i32 to vector<1x256xi32>
    %294 = arith.cmpi slt, %292, %293 : vector<1x256xi32>
    %295 = arith.andi %290, %294 : vector<1x256xi1>
    %cst_138 = arith.constant 0.000000e+00 : f32
    %296 = vector.broadcast %cst_138 : f32 to vector<8x256xf32>
    %297 = vector.shape_cast %295 : vector<1x256xi1> to vector<1x256xi1>
    %298 = vector.broadcast %297 : vector<1x256xi1> to vector<8x256xi1>
    %299 = arith.select %298, %286, %296 : vector<8x256xi1>, vector<8x256xf32>
    %c8_139 = arith.constant 8 : index
    %c0_140 = arith.constant 0 : index
    %c0_141 = arith.constant 0 : index
    %300 = vector.load %arg7[%c8_139, %c0_140, %c0_141] : memref<9x4x8xbf16, #tpu.memory_space<vmem>>, vector<1x4x8xbf16>
    %301 = vector.shape_cast %300 : vector<1x4x8xbf16> to vector<4x8xbf16>
    %302 = arith.truncf %299 : vector<8x256xf32> to vector<8x256xbf16>
    %cst_142 = arith.constant dense<0.000000e+00> : vector<4x256xf32>
    %303 = tpu.matmul %301, %302, %cst_142 {dimension_numbers = #tpu.dot_dimension_numbers<[1], [0], [0], [1], [0, 0, 1, 1], [], []>} : vector<4x8xbf16>, vector<8x256xbf16>, vector<4x256xf32> -> vector<4x256xf32>
    %304 = arith.addf %285, %303 : vector<4x256xf32>
    %305 = arith.addf %10, %304 : vector<4x256xf32>
    %c0_143 = arith.constant 0 : index
    %c0_144 = arith.constant 0 : index
    %306 = vector.load %arg8[%c0_143, %c0_144] : memref<4x1xf32, #tpu.memory_space<vmem>>, vector<4x1xf32>
    %307 = vector.broadcast %306 : vector<4x1xf32> to vector<4x256xf32>
    %308 = arith.addf %305, %307 : vector<4x256xf32>
    %c0_145 = arith.constant 0 : index
    %c0_146 = arith.constant 0 : index
    %c0_147 = arith.constant 0 : index
    %309 = vector.load %arg9[%c0_145, %c0_146, %c0_147] : memref<1x4x256xf32, #tpu.memory_space<vmem>>, vector<1x4x256xf32>
    %310 = vector.shape_cast %309 : vector<1x4x256xf32> to vector<4x256xf32>
    %311 = vector.shape_cast %308 : vector<4x256xf32> to vector<1x4x256xf32>
    tpu.vector_store %arg9[%c0_145, %c0_146, %c0_147], %311 {strides = array<i32>} : memref<1x4x256xf32, #tpu.memory_space<vmem>>, vector<1x4x256xf32>,
    return
  }
  func.func @transform_0(%arg0: i32) -> (i32, i32, i32) {
    %c0_i32 = arith.constant 0 : i32
    %c0_i32_0 = arith.constant 0 : i32
    %c0_i32_1 = arith.constant 0 : i32
    return %arg0, %c0_i32, %c0_i32_0 : i32, i32, i32
  }
  func.func @transform_1(%arg0: i32) -> (i32, i32, i32) {
    %c0_i32 = arith.constant 0 : i32
    %c0_i32_0 = arith.constant 0 : i32
    %c0_i32_1 = arith.constant 0 : i32
    return %arg0, %c0_i32, %c0_i32_0 : i32, i32, i32
  }
  func.func @transform_2(%arg0: i32) -> (i32, i32) {
    %c0_i32 = arith.constant 0 : i32
    %c0_i32_0 = arith.constant 0 : i32
    %c0_i32_1 = arith.constant 0 : i32
    return %c0_i32, %c0_i32_0 : i32, i32
  }
  func.func @transform_3(%arg0: i32) -> (i32, i32) {
    %c0_i32 = arith.constant 0 : i32
    %c0_i32_0 = arith.constant 0 : i32
    %c0_i32_1 = arith.constant 0 : i32
    return %c0_i32, %c0_i32_0 : i32, i32
  }
  func.func @transform_4(%arg0: i32) -> (i32, i32, i32) {
    %c0_i32 = arith.constant 0 : i32
    %c0_i32_0 = arith.constant 0 : i32
    %c0_i32_1 = arith.constant 0 : i32
    %c0_i32_2 = arith.constant 0 : i32
    return %c0_i32, %c0_i32_0, %c0_i32_1 : i32, i32, i32
  }
  func.func @transform_5(%arg0: i32) -> (i32, i32) {
    %c0_i32 = arith.constant 0 : i32
    %c0_i32_0 = arith.constant 0 : i32
    %c0_i32_1 = arith.constant 0 : i32
    return %c0_i32, %c0_i32_0 : i32, i32
  }
  func.func @transform_6(%arg0: i32) -> (i32, i32, i32) {
    %c0_i32 = arith.constant 0 : i32
    %c0_i32_0 = arith.constant 0 : i32
    %c0_i32_1 = arith.constant 0 : i32
    %c0_i32_2 = arith.constant 0 : i32
    return %c0_i32, %c0_i32_0, %c0_i32_1 : i32, i32, i32
  }
  func.func @transform_7(%arg0: i32) -> (i32, i32) {
    %c0_i32 = arith.constant 0 : i32
    %c0_i32_0 = arith.constant 0 : i32
    %c0_i32_1 = arith.constant 0 : i32
    return %c0_i32, %c0_i32_0 : i32, i32
  }
  func.func @transform_8(%arg0: i32) -> (i32, i32, i32) {
    %c0_i32 = arith.constant 0 : i32
    %c0_i32_0 = arith.constant 0 : i32
    %c0_i32_1 = arith.constant 0 : i32
    return %arg0, %c0_i32, %c0_i32_0 : i32, i32, i32
  }
}

module attributes {stable_mosaic.version = 11 : i64} {
  func.func @_res_block_kernel(%arg0: i32, %arg1: memref<1x4x256xf32, #tpu.memory_space<vmem>>, %arg2: memref<9x8x4xbf16, #tpu.memory_space<vmem>>, %arg3: memref<8x1xf32, #tpu.memory_space<vmem>>, %arg4: memref<9x8x8xbf16, #tpu.memory_space<vmem>>, %arg5: memref<8x1xf32, #tpu.memory_space<vmem>>, %arg6: memref<8x4xbf16, #tpu.memory_space<vmem>>, %arg7: memref<8x1xf32, #tpu.memory_space<vmem>>, %arg8: memref<1x8x256xf32, #tpu.memory_space<vmem>>) attributes {dimension_semantics = [#tpu.dimension_semantics<parallel>], iteration_bounds = array<i64: 2>, scalar_prefetch = 0 : i64, scratch_operands = 0 : i64, tpu.core_type = #tpu.core_type<tc>, window_params = [{transform_indices = @transform_0, window_bounds = array<i64: 1, 4, 256>}, {pipeline_mode = #tpu.pipeline_mode<synchronous>, transform_indices = @transform_1, window_bounds = array<i64: 9, 8, 4>}, {pipeline_mode = #tpu.pipeline_mode<synchronous>, transform_indices = @transform_2, window_bounds = array<i64: 8, 1>}, {pipeline_mode = #tpu.pipeline_mode<synchronous>, transform_indices = @transform_3, window_bounds = array<i64: 9, 8, 8>}, {pipeline_mode = #tpu.pipeline_mode<synchronous>, transform_indices = @transform_4, window_bounds = array<i64: 8, 1>}, {pipeline_mode = #tpu.pipeline_mode<synchronous>, transform_indices = @transform_5, window_bounds = array<i64: 8, 4>}, {pipeline_mode = #tpu.pipeline_mode<synchronous>, transform_indices = @transform_6, window_bounds = array<i64: 8, 1>}, {transform_indices = @transform_7, window_bounds = array<i64: 1, 8, 256>}]} {
    %c0 = arith.constant 0 : index
    %c0_0 = arith.constant 0 : index
    %c0_1 = arith.constant 0 : index
    %0 = vector.load %arg1[%c0, %c0_0, %c0_1] : memref<1x4x256xf32, #tpu.memory_space<vmem>>, vector<1x4x256xf32>
    %1 = vector.shape_cast %0 : vector<1x4x256xf32> to vector<4x256xf32>
    %2 = tpu.iota {dimensions = array<i32: 1>} : vector<1x256xi32>
    %c16_i32 = arith.constant 16 : i32
    %c0_i32 = arith.constant 0 : i32
    %3 = arith.cmpi eq, %c16_i32, %c0_i32 : i32
    %c1_i32 = arith.constant 1 : i32
    %4 = arith.select %3, %c1_i32, %c16_i32 : i32
    %5 = vector.broadcast %4 : i32 to vector<1x256xi32>
    %6 = arith.remsi %2, %5 : vector<1x256xi32>
    %c0_i32_2 = arith.constant 0 : i32
    %7 = vector.broadcast %c0_i32_2 : i32 to vector<1x256xi32>
    %8 = arith.cmpi ne, %6, %7 : vector<1x256xi32>
    %c0_i32_3 = arith.constant 0 : i32
    %9 = vector.broadcast %c0_i32_3 : i32 to vector<1x256xi32>
    %10 = arith.cmpi slt, %6, %9 : vector<1x256xi32>
    %c0_i32_4 = arith.constant 0 : i32
    %11 = arith.cmpi slt, %4, %c0_i32_4 : i32
    %12 = vector.broadcast %11 : i1 to vector<1x256xi1>
    %13 = vector.broadcast %12 : vector<1x256xi1> to vector<1x256xi1>
    %14 = arith.xori %10, %13 : vector<1x256xi1>
    %15 = arith.andi %14, %8 : vector<1x256xi1>
    %16 = vector.broadcast %4 : i32 to vector<1x256xi32>
    %17 = arith.addi %6, %16 : vector<1x256xi32>
    %18 = arith.select %15, %17, %6 : vector<1x256xi1>, vector<1x256xi32>
    %cst = arith.constant 0.000000e+00 : f32
    %19 = vector.broadcast %cst : f32 to vector<4x256xf32>
    %20 = arith.maximumf %1, %19 : vector<4x256xf32>
    %cst_5 = arith.constant 0.000000e+00 : f32
    %21 = vector.broadcast %cst_5 : f32 to vector<4x17xf32>
    %22 = tpu.concatenate %21, %20, %21 in 1 : vector<4x17xf32>, vector<4x256xf32>, vector<4x17xf32> -> vector<4x290xf32>
    %cst_6 = arith.constant 0.000000e+00 : f32
    %23 = vector.broadcast %cst_6 : f32 to vector<8x256xf32>
    %24 = vector.extract_strided_slice %22 {offsets = [0, 0], sizes = [4, 256], strides = [1, 1]} : vector<4x290xf32> to vector<4x256xf32>
    %c-1_i32 = arith.constant -1 : i32
    %25 = vector.broadcast %c-1_i32 : i32 to vector<1x256xi32>
    %26 = arith.addi %18, %25 : vector<1x256xi32>
    %c0_i32_7 = arith.constant 0 : i32
    %27 = vector.broadcast %c0_i32_7 : i32 to vector<1x256xi32>
    %28 = arith.cmpi sge, %26, %27 : vector<1x256xi32>
    %c-1_i32_8 = arith.constant -1 : i32
    %29 = vector.broadcast %c-1_i32_8 : i32 to vector<1x256xi32>
    %30 = arith.addi %18, %29 : vector<1x256xi32>
    %c16_i32_9 = arith.constant 16 : i32
    %31 = vector.broadcast %c16_i32_9 : i32 to vector<1x256xi32>
    %32 = arith.cmpi slt, %30, %31 : vector<1x256xi32>
    %33 = arith.andi %28, %32 : vector<1x256xi1>
    %cst_10 = arith.constant 0.000000e+00 : f32
    %34 = vector.broadcast %cst_10 : f32 to vector<4x256xf32>
    %35 = vector.shape_cast %33 : vector<1x256xi1> to vector<1x256xi1>
    %36 = vector.broadcast %35 : vector<1x256xi1> to vector<4x256xi1>
    %37 = arith.select %36, %24, %34 : vector<4x256xi1>, vector<4x256xf32>
    %c0_11 = arith.constant 0 : index
    %c0_12 = arith.constant 0 : index
    %c0_13 = arith.constant 0 : index
    %38 = vector.load %arg2[%c0_11, %c0_12, %c0_13] : memref<9x8x4xbf16, #tpu.memory_space<vmem>>, vector<1x8x4xbf16>
    %39 = vector.shape_cast %38 : vector<1x8x4xbf16> to vector<8x4xbf16>
    %40 = arith.truncf %37 : vector<4x256xf32> to vector<4x256xbf16>
    %cst_14 = arith.constant dense<0.000000e+00> : vector<8x256xf32>
    %41 = tpu.matmul %39, %40, %cst_14 {dimension_numbers = #tpu.dot_dimension_numbers<[1], [0], [0], [1], [0, 0, 1, 1], [], []>} : vector<8x4xbf16>, vector<4x256xbf16>, vector<8x256xf32> -> vector<8x256xf32>
    %42 = arith.addf %23, %41 : vector<8x256xf32>
    %43 = vector.extract_strided_slice %22 {offsets = [0, 1], sizes = [4, 256], strides = [1, 1]} : vector<4x290xf32> to vector<4x256xf32>
    %c1 = arith.constant 1 : index
    %c0_15 = arith.constant 0 : index
    %c0_16 = arith.constant 0 : index
    %44 = vector.load %arg2[%c1, %c0_15, %c0_16] : memref<9x8x4xbf16, #tpu.memory_space<vmem>>, vector<1x8x4xbf16>
    %45 = vector.shape_cast %44 : vector<1x8x4xbf16> to vector<8x4xbf16>
    %46 = arith.truncf %43 : vector<4x256xf32> to vector<4x256xbf16>
    %cst_17 = arith.constant dense<0.000000e+00> : vector<8x256xf32>
    %47 = tpu.matmul %45, %46, %cst_17 {dimension_numbers = #tpu.dot_dimension_numbers<[1], [0], [0], [1], [0, 0, 1, 1], [], []>} : vector<8x4xbf16>, vector<4x256xbf16>, vector<8x256xf32> -> vector<8x256xf32>
    %48 = arith.addf %42, %47 : vector<8x256xf32>
    %49 = vector.extract_strided_slice %22 {offsets = [0, 2], sizes = [4, 256], strides = [1, 1]} : vector<4x290xf32> to vector<4x256xf32>
    %c1_i32_18 = arith.constant 1 : i32
    %50 = vector.broadcast %c1_i32_18 : i32 to vector<1x256xi32>
    %51 = arith.addi %18, %50 : vector<1x256xi32>
    %c0_i32_19 = arith.constant 0 : i32
    %52 = vector.broadcast %c0_i32_19 : i32 to vector<1x256xi32>
    %53 = arith.cmpi sge, %51, %52 : vector<1x256xi32>
    %c1_i32_20 = arith.constant 1 : i32
    %54 = vector.broadcast %c1_i32_20 : i32 to vector<1x256xi32>
    %55 = arith.addi %18, %54 : vector<1x256xi32>
    %c16_i32_21 = arith.constant 16 : i32
    %56 = vector.broadcast %c16_i32_21 : i32 to vector<1x256xi32>
    %57 = arith.cmpi slt, %55, %56 : vector<1x256xi32>
    %58 = arith.andi %53, %57 : vector<1x256xi1>
    %cst_22 = arith.constant 0.000000e+00 : f32
    %59 = vector.broadcast %cst_22 : f32 to vector<4x256xf32>
    %60 = vector.shape_cast %58 : vector<1x256xi1> to vector<1x256xi1>
    %61 = vector.broadcast %60 : vector<1x256xi1> to vector<4x256xi1>
    %62 = arith.select %61, %49, %59 : vector<4x256xi1>, vector<4x256xf32>
    %c2 = arith.constant 2 : index
    %c0_23 = arith.constant 0 : index
    %c0_24 = arith.constant 0 : index
    %63 = vector.load %arg2[%c2, %c0_23, %c0_24] : memref<9x8x4xbf16, #tpu.memory_space<vmem>>, vector<1x8x4xbf16>
    %64 = vector.shape_cast %63 : vector<1x8x4xbf16> to vector<8x4xbf16>
    %65 = arith.truncf %62 : vector<4x256xf32> to vector<4x256xbf16>
    %cst_25 = arith.constant dense<0.000000e+00> : vector<8x256xf32>
    %66 = tpu.matmul %64, %65, %cst_25 {dimension_numbers = #tpu.dot_dimension_numbers<[1], [0], [0], [1], [0, 0, 1, 1], [], []>} : vector<8x4xbf16>, vector<4x256xbf16>, vector<8x256xf32> -> vector<8x256xf32>
    %67 = arith.addf %48, %66 : vector<8x256xf32>
    %68 = vector.extract_strided_slice %22 {offsets = [0, 16], sizes = [4, 256], strides = [1, 1]} : vector<4x290xf32> to vector<4x256xf32>
    %c-1_i32_26 = arith.constant -1 : i32
    %69 = vector.broadcast %c-1_i32_26 : i32 to vector<1x256xi32>
    %70 = arith.addi %18, %69 : vector<1x256xi32>
    %c0_i32_27 = arith.constant 0 : i32
    %71 = vector.broadcast %c0_i32_27 : i32 to vector<1x256xi32>
    %72 = arith.cmpi sge, %70, %71 : vector<1x256xi32>
    %c-1_i32_28 = arith.constant -1 : i32
    %73 = vector.broadcast %c-1_i32_28 : i32 to vector<1x256xi32>
    %74 = arith.addi %18, %73 : vector<1x256xi32>
    %c16_i32_29 = arith.constant 16 : i32
    %75 = vector.broadcast %c16_i32_29 : i32 to vector<1x256xi32>
    %76 = arith.cmpi slt, %74, %75 : vector<1x256xi32>
    %77 = arith.andi %72, %76 : vector<1x256xi1>
    %cst_30 = arith.constant 0.000000e+00 : f32
    %78 = vector.broadcast %cst_30 : f32 to vector<4x256xf32>
    %79 = vector.shape_cast %77 : vector<1x256xi1> to vector<1x256xi1>
    %80 = vector.broadcast %79 : vector<1x256xi1> to vector<4x256xi1>
    %81 = arith.select %80, %68, %78 : vector<4x256xi1>, vector<4x256xf32>
    %c3 = arith.constant 3 : index
    %c0_31 = arith.constant 0 : index
    %c0_32 = arith.constant 0 : index
    %82 = vector.load %arg2[%c3, %c0_31, %c0_32] : memref<9x8x4xbf16, #tpu.memory_space<vmem>>, vector<1x8x4xbf16>
    %83 = vector.shape_cast %82 : vector<1x8x4xbf16> to vector<8x4xbf16>
    %84 = arith.truncf %81 : vector<4x256xf32> to vector<4x256xbf16>
    %cst_33 = arith.constant dense<0.000000e+00> : vector<8x256xf32>
    %85 = tpu.matmul %83, %84, %cst_33 {dimension_numbers = #tpu.dot_dimension_numbers<[1], [0], [0], [1], [0, 0, 1, 1], [], []>} : vector<8x4xbf16>, vector<4x256xbf16>, vector<8x256xf32> -> vector<8x256xf32>
    %86 = arith.addf %67, %85 : vector<8x256xf32>
    %87 = vector.extract_strided_slice %22 {offsets = [0, 17], sizes = [4, 256], strides = [1, 1]} : vector<4x290xf32> to vector<4x256xf32>
    %c4 = arith.constant 4 : index
    %c0_34 = arith.constant 0 : index
    %c0_35 = arith.constant 0 : index
    %88 = vector.load %arg2[%c4, %c0_34, %c0_35] : memref<9x8x4xbf16, #tpu.memory_space<vmem>>, vector<1x8x4xbf16>
    %89 = vector.shape_cast %88 : vector<1x8x4xbf16> to vector<8x4xbf16>
    %90 = arith.truncf %87 : vector<4x256xf32> to vector<4x256xbf16>
    %cst_36 = arith.constant dense<0.000000e+00> : vector<8x256xf32>
    %91 = tpu.matmul %89, %90, %cst_36 {dimension_numbers = #tpu.dot_dimension_numbers<[1], [0], [0], [1], [0, 0, 1, 1], [], []>} : vector<8x4xbf16>, vector<4x256xbf16>, vector<8x256xf32> -> vector<8x256xf32>
    %92 = arith.addf %86, %91 : vector<8x256xf32>
    %93 = vector.extract_strided_slice %22 {offsets = [0, 18], sizes = [4, 256], strides = [1, 1]} : vector<4x290xf32> to vector<4x256xf32>
    %c1_i32_37 = arith.constant 1 : i32
    %94 = vector.broadcast %c1_i32_37 : i32 to vector<1x256xi32>
    %95 = arith.addi %18, %94 : vector<1x256xi32>
    %c0_i32_38 = arith.constant 0 : i32
    %96 = vector.broadcast %c0_i32_38 : i32 to vector<1x256xi32>
    %97 = arith.cmpi sge, %95, %96 : vector<1x256xi32>
    %c1_i32_39 = arith.constant 1 : i32
    %98 = vector.broadcast %c1_i32_39 : i32 to vector<1x256xi32>
    %99 = arith.addi %18, %98 : vector<1x256xi32>
    %c16_i32_40 = arith.constant 16 : i32
    %100 = vector.broadcast %c16_i32_40 : i32 to vector<1x256xi32>
    %101 = arith.cmpi slt, %99, %100 : vector<1x256xi32>
    %102 = arith.andi %97, %101 : vector<1x256xi1>
    %cst_41 = arith.constant 0.000000e+00 : f32
    %103 = vector.broadcast %cst_41 : f32 to vector<4x256xf32>
    %104 = vector.shape_cast %102 : vector<1x256xi1> to vector<1x256xi1>
    %105 = vector.broadcast %104 : vector<1x256xi1> to vector<4x256xi1>
    %106 = arith.select %105, %93, %103 : vector<4x256xi1>, vector<4x256xf32>
    %c5 = arith.constant 5 : index
    %c0_42 = arith.constant 0 : index
    %c0_43 = arith.constant 0 : index
    %107 = vector.load %arg2[%c5, %c0_42, %c0_43] : memref<9x8x4xbf16, #tpu.memory_space<vmem>>, vector<1x8x4xbf16>
    %108 = vector.shape_cast %107 : vector<1x8x4xbf16> to vector<8x4xbf16>
    %109 = arith.truncf %106 : vector<4x256xf32> to vector<4x256xbf16>
    %cst_44 = arith.constant dense<0.000000e+00> : vector<8x256xf32>
    %110 = tpu.matmul %108, %109, %cst_44 {dimension_numbers = #tpu.dot_dimension_numbers<[1], [0], [0], [1], [0, 0, 1, 1], [], []>} : vector<8x4xbf16>, vector<4x256xbf16>, vector<8x256xf32> -> vector<8x256xf32>
    %111 = arith.addf %92, %110 : vector<8x256xf32>
    %112 = vector.extract_strided_slice %22 {offsets = [0, 32], sizes = [4, 256], strides = [1, 1]} : vector<4x290xf32> to vector<4x256xf32>
    %c-1_i32_45 = arith.constant -1 : i32
    %113 = vector.broadcast %c-1_i32_45 : i32 to vector<1x256xi32>
    %114 = arith.addi %18, %113 : vector<1x256xi32>
    %c0_i32_46 = arith.constant 0 : i32
    %115 = vector.broadcast %c0_i32_46 : i32 to vector<1x256xi32>
    %116 = arith.cmpi sge, %114, %115 : vector<1x256xi32>
    %c-1_i32_47 = arith.constant -1 : i32
    %117 = vector.broadcast %c-1_i32_47 : i32 to vector<1x256xi32>
    %118 = arith.addi %18, %117 : vector<1x256xi32>
    %c16_i32_48 = arith.constant 16 : i32
    %119 = vector.broadcast %c16_i32_48 : i32 to vector<1x256xi32>
    %120 = arith.cmpi slt, %118, %119 : vector<1x256xi32>
    %121 = arith.andi %116, %120 : vector<1x256xi1>
    %cst_49 = arith.constant 0.000000e+00 : f32
    %122 = vector.broadcast %cst_49 : f32 to vector<4x256xf32>
    %123 = vector.shape_cast %121 : vector<1x256xi1> to vector<1x256xi1>
    %124 = vector.broadcast %123 : vector<1x256xi1> to vector<4x256xi1>
    %125 = arith.select %124, %112, %122 : vector<4x256xi1>, vector<4x256xf32>
    %c6 = arith.constant 6 : index
    %c0_50 = arith.constant 0 : index
    %c0_51 = arith.constant 0 : index
    %126 = vector.load %arg2[%c6, %c0_50, %c0_51] : memref<9x8x4xbf16, #tpu.memory_space<vmem>>, vector<1x8x4xbf16>
    %127 = vector.shape_cast %126 : vector<1x8x4xbf16> to vector<8x4xbf16>
    %128 = arith.truncf %125 : vector<4x256xf32> to vector<4x256xbf16>
    %cst_52 = arith.constant dense<0.000000e+00> : vector<8x256xf32>
    %129 = tpu.matmul %127, %128, %cst_52 {dimension_numbers = #tpu.dot_dimension_numbers<[1], [0], [0], [1], [0, 0, 1, 1], [], []>} : vector<8x4xbf16>, vector<4x256xbf16>, vector<8x256xf32> -> vector<8x256xf32>
    %130 = arith.addf %111, %129 : vector<8x256xf32>
    %131 = vector.extract_strided_slice %22 {offsets = [0, 33], sizes = [4, 256], strides = [1, 1]} : vector<4x290xf32> to vector<4x256xf32>
    %c7 = arith.constant 7 : index
    %c0_53 = arith.constant 0 : index
    %c0_54 = arith.constant 0 : index
    %132 = vector.load %arg2[%c7, %c0_53, %c0_54] : memref<9x8x4xbf16, #tpu.memory_space<vmem>>, vector<1x8x4xbf16>
    %133 = vector.shape_cast %132 : vector<1x8x4xbf16> to vector<8x4xbf16>
    %134 = arith.truncf %131 : vector<4x256xf32> to vector<4x256xbf16>
    %cst_55 = arith.constant dense<0.000000e+00> : vector<8x256xf32>
    %135 = tpu.matmul %133, %134, %cst_55 {dimension_numbers = #tpu.dot_dimension_numbers<[1], [0], [0], [1], [0, 0, 1, 1], [], []>} : vector<8x4xbf16>, vector<4x256xbf16>, vector<8x256xf32> -> vector<8x256xf32>
    %136 = arith.addf %130, %135 : vector<8x256xf32>
    %137 = vector.extract_strided_slice %22 {offsets = [0, 34], sizes = [4, 256], strides = [1, 1]} : vector<4x290xf32> to vector<4x256xf32>
    %c1_i32_56 = arith.constant 1 : i32
    %138 = vector.broadcast %c1_i32_56 : i32 to vector<1x256xi32>
    %139 = arith.addi %18, %138 : vector<1x256xi32>
    %c0_i32_57 = arith.constant 0 : i32
    %140 = vector.broadcast %c0_i32_57 : i32 to vector<1x256xi32>
    %141 = arith.cmpi sge, %139, %140 : vector<1x256xi32>
    %c1_i32_58 = arith.constant 1 : i32
    %142 = vector.broadcast %c1_i32_58 : i32 to vector<1x256xi32>
    %143 = arith.addi %18, %142 : vector<1x256xi32>
    %c16_i32_59 = arith.constant 16 : i32
    %144 = vector.broadcast %c16_i32_59 : i32 to vector<1x256xi32>
    %145 = arith.cmpi slt, %143, %144 : vector<1x256xi32>
    %146 = arith.andi %141, %145 : vector<1x256xi1>
    %cst_60 = arith.constant 0.000000e+00 : f32
    %147 = vector.broadcast %cst_60 : f32 to vector<4x256xf32>
    %148 = vector.shape_cast %146 : vector<1x256xi1> to vector<1x256xi1>
    %149 = vector.broadcast %148 : vector<1x256xi1> to vector<4x256xi1>
    %150 = arith.select %149, %137, %147 : vector<4x256xi1>, vector<4x256xf32>
    %c8 = arith.constant 8 : index
    %c0_61 = arith.constant 0 : index
    %c0_62 = arith.constant 0 : index
    %151 = vector.load %arg2[%c8, %c0_61, %c0_62] : memref<9x8x4xbf16, #tpu.memory_space<vmem>>, vector<1x8x4xbf16>
    %152 = vector.shape_cast %151 : vector<1x8x4xbf16> to vector<8x4xbf16>
    %153 = arith.truncf %150 : vector<4x256xf32> to vector<4x256xbf16>
    %cst_63 = arith.constant dense<0.000000e+00> : vector<8x256xf32>
    %154 = tpu.matmul %152, %153, %cst_63 {dimension_numbers = #tpu.dot_dimension_numbers<[1], [0], [0], [1], [0, 0, 1, 1], [], []>} : vector<8x4xbf16>, vector<4x256xbf16>, vector<8x256xf32> -> vector<8x256xf32>
    %155 = arith.addf %136, %154 : vector<8x256xf32>
    %c0_64 = arith.constant 0 : index
    %c0_65 = arith.constant 0 : index
    %156 = vector.load %arg3[%c0_64, %c0_65] : memref<8x1xf32, #tpu.memory_space<vmem>>, vector<8x1xf32>
    %157 = vector.broadcast %156 : vector<8x1xf32> to vector<8x256xf32>
    %158 = arith.addf %155, %157 : vector<8x256xf32>
    %cst_66 = arith.constant 0.000000e+00 : f32
    %159 = vector.broadcast %cst_66 : f32 to vector<8x256xf32>
    %160 = arith.maximumf %158, %159 : vector<8x256xf32>
    %c0_67 = arith.constant 0 : index
    %c0_68 = arith.constant 0 : index
    %161 = vector.load %arg6[%c0_67, %c0_68] : memref<8x4xbf16, #tpu.memory_space<vmem>>, vector<8x4xbf16>
    %162 = arith.truncf %1 : vector<4x256xf32> to vector<4x256xbf16>
    %cst_69 = arith.constant dense<0.000000e+00> : vector<8x256xf32>
    %163 = tpu.matmul %161, %162, %cst_69 {dimension_numbers = #tpu.dot_dimension_numbers<[1], [0], [0], [1], [0, 0, 1, 1], [], []>} : vector<8x4xbf16>, vector<4x256xbf16>, vector<8x256xf32> -> vector<8x256xf32>
    %c0_70 = arith.constant 0 : index
    %c0_71 = arith.constant 0 : index
    %164 = vector.load %arg7[%c0_70, %c0_71] : memref<8x1xf32, #tpu.memory_space<vmem>>, vector<8x1xf32>
    %165 = vector.broadcast %164 : vector<8x1xf32> to vector<8x256xf32>
    %166 = arith.addf %163, %165 : vector<8x256xf32>
    %cst_72 = arith.constant 0.000000e+00 : f32
    %167 = vector.broadcast %cst_72 : f32 to vector<8x17xf32>
    %168 = tpu.concatenate %167, %160, %167 in 1 : vector<8x17xf32>, vector<8x256xf32>, vector<8x17xf32> -> vector<8x290xf32>
    %cst_73 = arith.constant 0.000000e+00 : f32
    %169 = vector.broadcast %cst_73 : f32 to vector<8x256xf32>
    %170 = vector.extract_strided_slice %168 {offsets = [0, 0], sizes = [8, 256], strides = [1, 1]} : vector<8x290xf32> to vector<8x256xf32>
    %c-1_i32_74 = arith.constant -1 : i32
    %171 = vector.broadcast %c-1_i32_74 : i32 to vector<1x256xi32>
    %172 = arith.addi %18, %171 : vector<1x256xi32>
    %c0_i32_75 = arith.constant 0 : i32
    %173 = vector.broadcast %c0_i32_75 : i32 to vector<1x256xi32>
    %174 = arith.cmpi sge, %172, %173 : vector<1x256xi32>
    %c-1_i32_76 = arith.constant -1 : i32
    %175 = vector.broadcast %c-1_i32_76 : i32 to vector<1x256xi32>
    %176 = arith.addi %18, %175 : vector<1x256xi32>
    %c16_i32_77 = arith.constant 16 : i32
    %177 = vector.broadcast %c16_i32_77 : i32 to vector<1x256xi32>
    %178 = arith.cmpi slt, %176, %177 : vector<1x256xi32>
    %179 = arith.andi %174, %178 : vector<1x256xi1>
    %cst_78 = arith.constant 0.000000e+00 : f32
    %180 = vector.broadcast %cst_78 : f32 to vector<8x256xf32>
    %181 = vector.shape_cast %179 : vector<1x256xi1> to vector<1x256xi1>
    %182 = vector.broadcast %181 : vector<1x256xi1> to vector<8x256xi1>
    %183 = arith.select %182, %170, %180 : vector<8x256xi1>, vector<8x256xf32>
    %c0_79 = arith.constant 0 : index
    %c0_80 = arith.constant 0 : index
    %c0_81 = arith.constant 0 : index
    %184 = vector.load %arg4[%c0_79, %c0_80, %c0_81] : memref<9x8x8xbf16, #tpu.memory_space<vmem>>, vector<1x8x8xbf16>
    %185 = vector.shape_cast %184 : vector<1x8x8xbf16> to vector<8x8xbf16>
    %186 = arith.truncf %183 : vector<8x256xf32> to vector<8x256xbf16>
    %cst_82 = arith.constant dense<0.000000e+00> : vector<8x256xf32>
    %187 = tpu.matmul %185, %186, %cst_82 {dimension_numbers = #tpu.dot_dimension_numbers<[1], [0], [0], [1], [0, 0, 1, 1], [], []>} : vector<8x8xbf16>, vector<8x256xbf16>, vector<8x256xf32> -> vector<8x256xf32>
    %188 = arith.addf %169, %187 : vector<8x256xf32>
    %189 = vector.extract_strided_slice %168 {offsets = [0, 1], sizes = [8, 256], strides = [1, 1]} : vector<8x290xf32> to vector<8x256xf32>
    %c1_83 = arith.constant 1 : index
    %c0_84 = arith.constant 0 : index
    %c0_85 = arith.constant 0 : index
    %190 = vector.load %arg4[%c1_83, %c0_84, %c0_85] : memref<9x8x8xbf16, #tpu.memory_space<vmem>>, vector<1x8x8xbf16>
    %191 = vector.shape_cast %190 : vector<1x8x8xbf16> to vector<8x8xbf16>
    %192 = arith.truncf %189 : vector<8x256xf32> to vector<8x256xbf16>
    %cst_86 = arith.constant dense<0.000000e+00> : vector<8x256xf32>
    %193 = tpu.matmul %191, %192, %cst_86 {dimension_numbers = #tpu.dot_dimension_numbers<[1], [0], [0], [1], [0, 0, 1, 1], [], []>} : vector<8x8xbf16>, vector<8x256xbf16>, vector<8x256xf32> -> vector<8x256xf32>
    %194 = arith.addf %188, %193 : vector<8x256xf32>
    %195 = vector.extract_strided_slice %168 {offsets = [0, 2], sizes = [8, 256], strides = [1, 1]} : vector<8x290xf32> to vector<8x256xf32>
    %c1_i32_87 = arith.constant 1 : i32
    %196 = vector.broadcast %c1_i32_87 : i32 to vector<1x256xi32>
    %197 = arith.addi %18, %196 : vector<1x256xi32>
    %c0_i32_88 = arith.constant 0 : i32
    %198 = vector.broadcast %c0_i32_88 : i32 to vector<1x256xi32>
    %199 = arith.cmpi sge, %197, %198 : vector<1x256xi32>
    %c1_i32_89 = arith.constant 1 : i32
    %200 = vector.broadcast %c1_i32_89 : i32 to vector<1x256xi32>
    %201 = arith.addi %18, %200 : vector<1x256xi32>
    %c16_i32_90 = arith.constant 16 : i32
    %202 = vector.broadcast %c16_i32_90 : i32 to vector<1x256xi32>
    %203 = arith.cmpi slt, %201, %202 : vector<1x256xi32>
    %204 = arith.andi %199, %203 : vector<1x256xi1>
    %cst_91 = arith.constant 0.000000e+00 : f32
    %205 = vector.broadcast %cst_91 : f32 to vector<8x256xf32>
    %206 = vector.shape_cast %204 : vector<1x256xi1> to vector<1x256xi1>
    %207 = vector.broadcast %206 : vector<1x256xi1> to vector<8x256xi1>
    %208 = arith.select %207, %195, %205 : vector<8x256xi1>, vector<8x256xf32>
    %c2_92 = arith.constant 2 : index
    %c0_93 = arith.constant 0 : index
    %c0_94 = arith.constant 0 : index
    %209 = vector.load %arg4[%c2_92, %c0_93, %c0_94] : memref<9x8x8xbf16, #tpu.memory_space<vmem>>, vector<1x8x8xbf16>
    %210 = vector.shape_cast %209 : vector<1x8x8xbf16> to vector<8x8xbf16>
    %211 = arith.truncf %208 : vector<8x256xf32> to vector<8x256xbf16>
    %cst_95 = arith.constant dense<0.000000e+00> : vector<8x256xf32>
    %212 = tpu.matmul %210, %211, %cst_95 {dimension_numbers = #tpu.dot_dimension_numbers<[1], [0], [0], [1], [0, 0, 1, 1], [], []>} : vector<8x8xbf16>, vector<8x256xbf16>, vector<8x256xf32> -> vector<8x256xf32>
    %213 = arith.addf %194, %212 : vector<8x256xf32>
    %214 = vector.extract_strided_slice %168 {offsets = [0, 16], sizes = [8, 256], strides = [1, 1]} : vector<8x290xf32> to vector<8x256xf32>
    %c-1_i32_96 = arith.constant -1 : i32
    %215 = vector.broadcast %c-1_i32_96 : i32 to vector<1x256xi32>
    %216 = arith.addi %18, %215 : vector<1x256xi32>
    %c0_i32_97 = arith.constant 0 : i32
    %217 = vector.broadcast %c0_i32_97 : i32 to vector<1x256xi32>
    %218 = arith.cmpi sge, %216, %217 : vector<1x256xi32>
    %c-1_i32_98 = arith.constant -1 : i32
    %219 = vector.broadcast %c-1_i32_98 : i32 to vector<1x256xi32>
    %220 = arith.addi %18, %219 : vector<1x256xi32>
    %c16_i32_99 = arith.constant 16 : i32
    %221 = vector.broadcast %c16_i32_99 : i32 to vector<1x256xi32>
    %222 = arith.cmpi slt, %220, %221 : vector<1x256xi32>
    %223 = arith.andi %218, %222 : vector<1x256xi1>
    %cst_100 = arith.constant 0.000000e+00 : f32
    %224 = vector.broadcast %cst_100 : f32 to vector<8x256xf32>
    %225 = vector.shape_cast %223 : vector<1x256xi1> to vector<1x256xi1>
    %226 = vector.broadcast %225 : vector<1x256xi1> to vector<8x256xi1>
    %227 = arith.select %226, %214, %224 : vector<8x256xi1>, vector<8x256xf32>
    %c3_101 = arith.constant 3 : index
    %c0_102 = arith.constant 0 : index
    %c0_103 = arith.constant 0 : index
    %228 = vector.load %arg4[%c3_101, %c0_102, %c0_103] : memref<9x8x8xbf16, #tpu.memory_space<vmem>>, vector<1x8x8xbf16>
    %229 = vector.shape_cast %228 : vector<1x8x8xbf16> to vector<8x8xbf16>
    %230 = arith.truncf %227 : vector<8x256xf32> to vector<8x256xbf16>
    %cst_104 = arith.constant dense<0.000000e+00> : vector<8x256xf32>
    %231 = tpu.matmul %229, %230, %cst_104 {dimension_numbers = #tpu.dot_dimension_numbers<[1], [0], [0], [1], [0, 0, 1, 1], [], []>} : vector<8x8xbf16>, vector<8x256xbf16>, vector<8x256xf32> -> vector<8x256xf32>
    %232 = arith.addf %213, %231 : vector<8x256xf32>
    %233 = vector.extract_strided_slice %168 {offsets = [0, 17], sizes = [8, 256], strides = [1, 1]} : vector<8x290xf32> to vector<8x256xf32>
    %c4_105 = arith.constant 4 : index
    %c0_106 = arith.constant 0 : index
    %c0_107 = arith.constant 0 : index
    %234 = vector.load %arg4[%c4_105, %c0_106, %c0_107] : memref<9x8x8xbf16, #tpu.memory_space<vmem>>, vector<1x8x8xbf16>
    %235 = vector.shape_cast %234 : vector<1x8x8xbf16> to vector<8x8xbf16>
    %236 = arith.truncf %233 : vector<8x256xf32> to vector<8x256xbf16>
    %cst_108 = arith.constant dense<0.000000e+00> : vector<8x256xf32>
    %237 = tpu.matmul %235, %236, %cst_108 {dimension_numbers = #tpu.dot_dimension_numbers<[1], [0], [0], [1], [0, 0, 1, 1], [], []>} : vector<8x8xbf16>, vector<8x256xbf16>, vector<8x256xf32> -> vector<8x256xf32>
    %238 = arith.addf %232, %237 : vector<8x256xf32>
    %239 = vector.extract_strided_slice %168 {offsets = [0, 18], sizes = [8, 256], strides = [1, 1]} : vector<8x290xf32> to vector<8x256xf32>
    %c1_i32_109 = arith.constant 1 : i32
    %240 = vector.broadcast %c1_i32_109 : i32 to vector<1x256xi32>
    %241 = arith.addi %18, %240 : vector<1x256xi32>
    %c0_i32_110 = arith.constant 0 : i32
    %242 = vector.broadcast %c0_i32_110 : i32 to vector<1x256xi32>
    %243 = arith.cmpi sge, %241, %242 : vector<1x256xi32>
    %c1_i32_111 = arith.constant 1 : i32
    %244 = vector.broadcast %c1_i32_111 : i32 to vector<1x256xi32>
    %245 = arith.addi %18, %244 : vector<1x256xi32>
    %c16_i32_112 = arith.constant 16 : i32
    %246 = vector.broadcast %c16_i32_112 : i32 to vector<1x256xi32>
    %247 = arith.cmpi slt, %245, %246 : vector<1x256xi32>
    %248 = arith.andi %243, %247 : vector<1x256xi1>
    %cst_113 = arith.constant 0.000000e+00 : f32
    %249 = vector.broadcast %cst_113 : f32 to vector<8x256xf32>
    %250 = vector.shape_cast %248 : vector<1x256xi1> to vector<1x256xi1>
    %251 = vector.broadcast %250 : vector<1x256xi1> to vector<8x256xi1>
    %252 = arith.select %251, %239, %249 : vector<8x256xi1>, vector<8x256xf32>
    %c5_114 = arith.constant 5 : index
    %c0_115 = arith.constant 0 : index
    %c0_116 = arith.constant 0 : index
    %253 = vector.load %arg4[%c5_114, %c0_115, %c0_116] : memref<9x8x8xbf16, #tpu.memory_space<vmem>>, vector<1x8x8xbf16>
    %254 = vector.shape_cast %253 : vector<1x8x8xbf16> to vector<8x8xbf16>
    %255 = arith.truncf %252 : vector<8x256xf32> to vector<8x256xbf16>
    %cst_117 = arith.constant dense<0.000000e+00> : vector<8x256xf32>
    %256 = tpu.matmul %254, %255, %cst_117 {dimension_numbers = #tpu.dot_dimension_numbers<[1], [0], [0], [1], [0, 0, 1, 1], [], []>} : vector<8x8xbf16>, vector<8x256xbf16>, vector<8x256xf32> -> vector<8x256xf32>
    %257 = arith.addf %238, %256 : vector<8x256xf32>
    %258 = vector.extract_strided_slice %168 {offsets = [0, 32], sizes = [8, 256], strides = [1, 1]} : vector<8x290xf32> to vector<8x256xf32>
    %c-1_i32_118 = arith.constant -1 : i32
    %259 = vector.broadcast %c-1_i32_118 : i32 to vector<1x256xi32>
    %260 = arith.addi %18, %259 : vector<1x256xi32>
    %c0_i32_119 = arith.constant 0 : i32
    %261 = vector.broadcast %c0_i32_119 : i32 to vector<1x256xi32>
    %262 = arith.cmpi sge, %260, %261 : vector<1x256xi32>
    %c-1_i32_120 = arith.constant -1 : i32
    %263 = vector.broadcast %c-1_i32_120 : i32 to vector<1x256xi32>
    %264 = arith.addi %18, %263 : vector<1x256xi32>
    %c16_i32_121 = arith.constant 16 : i32
    %265 = vector.broadcast %c16_i32_121 : i32 to vector<1x256xi32>
    %266 = arith.cmpi slt, %264, %265 : vector<1x256xi32>
    %267 = arith.andi %262, %266 : vector<1x256xi1>
    %cst_122 = arith.constant 0.000000e+00 : f32
    %268 = vector.broadcast %cst_122 : f32 to vector<8x256xf32>
    %269 = vector.shape_cast %267 : vector<1x256xi1> to vector<1x256xi1>
    %270 = vector.broadcast %269 : vector<1x256xi1> to vector<8x256xi1>
    %271 = arith.select %270, %258, %268 : vector<8x256xi1>, vector<8x256xf32>
    %c6_123 = arith.constant 6 : index
    %c0_124 = arith.constant 0 : index
    %c0_125 = arith.constant 0 : index
    %272 = vector.load %arg4[%c6_123, %c0_124, %c0_125] : memref<9x8x8xbf16, #tpu.memory_space<vmem>>, vector<1x8x8xbf16>
    %273 = vector.shape_cast %272 : vector<1x8x8xbf16> to vector<8x8xbf16>
    %274 = arith.truncf %271 : vector<8x256xf32> to vector<8x256xbf16>
    %cst_126 = arith.constant dense<0.000000e+00> : vector<8x256xf32>
    %275 = tpu.matmul %273, %274, %cst_126 {dimension_numbers = #tpu.dot_dimension_numbers<[1], [0], [0], [1], [0, 0, 1, 1], [], []>} : vector<8x8xbf16>, vector<8x256xbf16>, vector<8x256xf32> -> vector<8x256xf32>
    %276 = arith.addf %257, %275 : vector<8x256xf32>
    %277 = vector.extract_strided_slice %168 {offsets = [0, 33], sizes = [8, 256], strides = [1, 1]} : vector<8x290xf32> to vector<8x256xf32>
    %c7_127 = arith.constant 7 : index
    %c0_128 = arith.constant 0 : index
    %c0_129 = arith.constant 0 : index
    %278 = vector.load %arg4[%c7_127, %c0_128, %c0_129] : memref<9x8x8xbf16, #tpu.memory_space<vmem>>, vector<1x8x8xbf16>
    %279 = vector.shape_cast %278 : vector<1x8x8xbf16> to vector<8x8xbf16>
    %280 = arith.truncf %277 : vector<8x256xf32> to vector<8x256xbf16>
    %cst_130 = arith.constant dense<0.000000e+00> : vector<8x256xf32>
    %281 = tpu.matmul %279, %280, %cst_130 {dimension_numbers = #tpu.dot_dimension_numbers<[1], [0], [0], [1], [0, 0, 1, 1], [], []>} : vector<8x8xbf16>, vector<8x256xbf16>, vector<8x256xf32> -> vector<8x256xf32>
    %282 = arith.addf %276, %281 : vector<8x256xf32>
    %283 = vector.extract_strided_slice %168 {offsets = [0, 34], sizes = [8, 256], strides = [1, 1]} : vector<8x290xf32> to vector<8x256xf32>
    %c1_i32_131 = arith.constant 1 : i32
    %284 = vector.broadcast %c1_i32_131 : i32 to vector<1x256xi32>
    %285 = arith.addi %18, %284 : vector<1x256xi32>
    %c0_i32_132 = arith.constant 0 : i32
    %286 = vector.broadcast %c0_i32_132 : i32 to vector<1x256xi32>
    %287 = arith.cmpi sge, %285, %286 : vector<1x256xi32>
    %c1_i32_133 = arith.constant 1 : i32
    %288 = vector.broadcast %c1_i32_133 : i32 to vector<1x256xi32>
    %289 = arith.addi %18, %288 : vector<1x256xi32>
    %c16_i32_134 = arith.constant 16 : i32
    %290 = vector.broadcast %c16_i32_134 : i32 to vector<1x256xi32>
    %291 = arith.cmpi slt, %289, %290 : vector<1x256xi32>
    %292 = arith.andi %287, %291 : vector<1x256xi1>
    %cst_135 = arith.constant 0.000000e+00 : f32
    %293 = vector.broadcast %cst_135 : f32 to vector<8x256xf32>
    %294 = vector.shape_cast %292 : vector<1x256xi1> to vector<1x256xi1>
    %295 = vector.broadcast %294 : vector<1x256xi1> to vector<8x256xi1>
    %296 = arith.select %295, %283, %293 : vector<8x256xi1>, vector<8x256xf32>
    %c8_136 = arith.constant 8 : index
    %c0_137 = arith.constant 0 : index
    %c0_138 = arith.constant 0 : index
    %297 = vector.load %arg4[%c8_136, %c0_137, %c0_138] : memref<9x8x8xbf16, #tpu.memory_space<vmem>>, vector<1x8x8xbf16>
    %298 = vector.shape_cast %297 : vector<1x8x8xbf16> to vector<8x8xbf16>
    %299 = arith.truncf %296 : vector<8x256xf32> to vector<8x256xbf16>
    %cst_139 = arith.constant dense<0.000000e+00> : vector<8x256xf32>
    %300 = tpu.matmul %298, %299, %cst_139 {dimension_numbers = #tpu.dot_dimension_numbers<[1], [0], [0], [1], [0, 0, 1, 1], [], []>} : vector<8x8xbf16>, vector<8x256xbf16>, vector<8x256xf32> -> vector<8x256xf32>
    %301 = arith.addf %282, %300 : vector<8x256xf32>
    %302 = arith.addf %166, %301 : vector<8x256xf32>
    %c0_140 = arith.constant 0 : index
    %c0_141 = arith.constant 0 : index
    %303 = vector.load %arg5[%c0_140, %c0_141] : memref<8x1xf32, #tpu.memory_space<vmem>>, vector<8x1xf32>
    %304 = vector.broadcast %303 : vector<8x1xf32> to vector<8x256xf32>
    %305 = arith.addf %302, %304 : vector<8x256xf32>
    %c0_142 = arith.constant 0 : index
    %c0_143 = arith.constant 0 : index
    %c0_144 = arith.constant 0 : index
    %306 = vector.load %arg8[%c0_142, %c0_143, %c0_144] : memref<1x8x256xf32, #tpu.memory_space<vmem>>, vector<1x8x256xf32>
    %307 = vector.shape_cast %306 : vector<1x8x256xf32> to vector<8x256xf32>
    %308 = vector.shape_cast %305 : vector<8x256xf32> to vector<1x8x256xf32>
    tpu.vector_store %arg8[%c0_142, %c0_143, %c0_144], %308 {strides = array<i32>} : memref<1x8x256xf32, #tpu.memory_space<vmem>>, vector<1x8x256xf32>,
    return
  }
  func.func @transform_0(%arg0: i32) -> (i32, i32, i32) {
    %c0_i32 = arith.constant 0 : i32
    %c0_i32_0 = arith.constant 0 : i32
    %c0_i32_1 = arith.constant 0 : i32
    return %arg0, %c0_i32, %c0_i32_0 : i32, i32, i32
  }
  func.func @transform_1(%arg0: i32) -> (i32, i32, i32) {
    %c0_i32 = arith.constant 0 : i32
    %c0_i32_0 = arith.constant 0 : i32
    %c0_i32_1 = arith.constant 0 : i32
    %c0_i32_2 = arith.constant 0 : i32
    return %c0_i32, %c0_i32_0, %c0_i32_1 : i32, i32, i32
  }
  func.func @transform_2(%arg0: i32) -> (i32, i32) {
    %c0_i32 = arith.constant 0 : i32
    %c0_i32_0 = arith.constant 0 : i32
    %c0_i32_1 = arith.constant 0 : i32
    return %c0_i32, %c0_i32_0 : i32, i32
  }
  func.func @transform_3(%arg0: i32) -> (i32, i32, i32) {
    %c0_i32 = arith.constant 0 : i32
    %c0_i32_0 = arith.constant 0 : i32
    %c0_i32_1 = arith.constant 0 : i32
    %c0_i32_2 = arith.constant 0 : i32
    return %c0_i32, %c0_i32_0, %c0_i32_1 : i32, i32, i32
  }
  func.func @transform_4(%arg0: i32) -> (i32, i32) {
    %c0_i32 = arith.constant 0 : i32
    %c0_i32_0 = arith.constant 0 : i32
    %c0_i32_1 = arith.constant 0 : i32
    return %c0_i32, %c0_i32_0 : i32, i32
  }
  func.func @transform_5(%arg0: i32) -> (i32, i32) {
    %c0_i32 = arith.constant 0 : i32
    %c0_i32_0 = arith.constant 0 : i32
    %c0_i32_1 = arith.constant 0 : i32
    return %c0_i32, %c0_i32_0 : i32, i32
  }
  func.func @transform_6(%arg0: i32) -> (i32, i32) {
    %c0_i32 = arith.constant 0 : i32
    %c0_i32_0 = arith.constant 0 : i32
    %c0_i32_1 = arith.constant 0 : i32
    return %c0_i32, %c0_i32_0 : i32, i32
  }
  func.func @transform_7(%arg0: i32) -> (i32, i32, i32) {
    %c0_i32 = arith.constant 0 : i32
    %c0_i32_0 = arith.constant 0 : i32
    %c0_i32_1 = arith.constant 0 : i32
    return %arg0, %c0_i32, %c0_i32_0 : i32, i32, i32
  }
}

</mosaic_0001>

<bundles_post_ra>
// kernel: decoder_block_forward.2
= control target key start
LH: loop header
LB: loop body
LE: loop exit
PB: predicated region body
PF: predicated region fallthrough
CT: control target
= control target key end

     0   :  { %s2012_s27 = smov 0   ;;  %s2327_s0 = inlined_call_operand.vmem [shape: f32[2,4,256], index: 0, kind: input, shape index: {}]   ;;  %s2328_s1 = inlined_call_operand.vmem [shape: f32[2,4,256], index: 1, kind: input, shape index: {}]   ;;  %s2329_s2 = inlined_call_operand.vmem [shape: bf16[4,4], index: 2, kind: input, shape index: {}]   ;;  %s2330_s3 = inlined_call_operand.vmem [shape: f32[4,1], index: 3, kind: input, shape index: {}]   ;;  %s2331_s4 = inlined_call_operand.vmem [shape: bf16[9,8,4], index: 4, kind: input, shape index: {}]   ;;  %s2332_s5 = inlined_call_operand.vmem [shape: f32[8,1], index: 5, kind: input, shape index: {}]   ;;  %s2333_s6 = inlined_call_operand.vmem [shape: bf16[9,4,8], index: 6, kind: input, shape index: {}]   ;;  %s2334_s7 = inlined_call_operand.vmem [shape: f32[4,1], index: 7, kind: input, shape index: {}]   ;;  %s2335_s8 = inlined_call_operand.vmem [shape: f32[2,4,256], index: 8, kind: output, shape index: {}]  }
   0x1 LB: > { %s1764_s28 = sadd.s32 4294967295, %s1954_s27   ;;  %p1768_p0 = scmp.ge.s32.totalorder %s1954_s27, 1  ;;  %s1954_s27 = sphi %s2012_s27, %s18_s27  }
   0x2   : > { %p272_p1 = scmp.lt.s32.totalorder %s1954_s27, 3 }
   0x4   : > { %p273_p2 = pnand %p1768_p0, %p272_p1 }
   0x5   : > { %p311_p3 = scmp.lt.s32.totalorder (!%p273_p2), %s1764_s28, 1  ;;  %v1956_v0 = vmov (!%p273_p2), 0   ;;  %v392_v1 = vld [vmem:[%s2330_s3] sm:$0xf] (!%p273_p2)  ;;  %vm339_vm0 = vcmask (!%p273_p2), 1041408   ;;  %vm335_vm1 = vcmask (!%p273_p2), 31744   ;;  %v400_v10 = vlaneseq (!%p273_p2) }
   0x6   : > { %276 = sbr.rel (%p273_p2) target bundleno = 1331 (0x533), region = 52  ;;  %378 = vmatprep.mubr.bf16.mxu1 (!%p273_p2), %v1956_v0  ;;  %1885 = vset.pattern.permute.xlu0 (!%p273_p2), %v1956_v0  ;;  %v334_v7 = vld [vmem:[%s2329_s2] sm:$0x3] (!%p273_p2)  ;;  %v1957_v8 = vmov (!%p273_p2), 839922192   ;;  %s1958_s18 = smov (!%p273_p2), 17  }
   0x7   : > { %395 = vperm.xlu0 (!%p273_p2), %1885, %v392_v1   ;;  %986 = vmatprep.mubr.bf16.mxu0 (!%p273_p2), %v1956_v0  ;;  %v398_v9 = vunpack.c.l.s4 (!%p273_p2), %v1957_v8  ;;  %v401_v12 = vshrl.u32 (!%p273_p2), %v400_v10, 7  ;;  %vm440_vm2 = vcmask (!%p273_p2), 138240   ;;  %s1959_s19 = smov (!%p273_p2), 127   ;;  %s1960_s20 = smov (!%p273_p2), 126   ;;  %v1066_v37 = vld [vmem:[%s2332_s5] sm:$0xff] (!%p273_p2)  ;;  %v407_v38 = vand.u32 (!%p273_p2), 127, %v400_v10 }
   0x8   : > { %1916 = vset.pattern.permute.xlu1 (!%p273_p2), %v1956_v0  ;;  %s1961_s21 = smov (!%p273_p2), 112   ;;  %s1962_s22 = smov (!%p273_p2), 111   ;;  %vm478_vm5 = vcmask (!%p273_p2), 1039360   ;;  %v1777_v57 = vld [vmem:[%s2331_s4 + $0x4] sm:$0xf] (!%p273_p2)  ;;  %vm601_vm6 = vcmask (!%p273_p2), 1031168  }
   0x9   : > { %v399_v11 = vunpack.c.0.s8 (!%p273_p2), %v398_v9  ;;  %s1963_s23 = smov (!%p273_p2), 110   ;;  %s1964_s24 = smov (!%p273_p2), 96   ;;  %v408_v39 = vadd.s32 (!%p273_p2), 128, %v407_v38  ;;  %v413_v40 = vand.u32 (!%p273_p2), 15, %v407_v38  ;;  %vm670_vm9 = vcmask (!%p273_p2), 916480  }
   0xa   : > { %s1965_s25 = smov (!%p273_p2), 94   ;;  %s1966_s26 = smov (!%p273_p2), 95   ;;  %vm741_vm10 = vcmask (!%p273_p2), 908288   ;;  %vm802_vm11 = vcmask (!%p273_p2), 900096   ;;  %vm942_vm12 = vcmask (!%p273_p2), 777216   ;;  %vm871_vm13 = vcmask (!%p273_p2), 785408  }
   0xb   : > { %v2044_v13 = vsub.s32 (!%p273_p2), %v399_v11, %v401_v12  ;;  %v420_v41 = vand.u32 (!%p273_p2), 15, %v408_v39  ;;  %v2076_v42 = vadd.s32 (!%p273_p2), 4294967295, %v413_v40  ;;  %v2086_v50 = vadd.s32 (!%p273_p2), 1, %v413_v40  ;;  %v461_v11 = vld [vmem:[%s2331_s4] sm:$0xf] (!%p273_p2) }
   0xc   : > { %vm1003_vm14 = vcmask (!%p273_p2), 769024   ;;  %vm1113_vm15 = vcmask (!%p273_p2), 1043456  }
   0xd   : > { %s2337_s28 = smov (!%p311_p3, %s1764_s28), 1  ;;  %v2078_v43 = vadd.s32 4294967295, %v420_v41  ;;  %vm449_vm3 = vcmp.ge.s32.totalorder %v2076_v42, 0  ;;  %v2088_v51 = vadd.s32 1, %v420_v41  ;;  %vm585_vm7 = vcmp.lt.s32.totalorder %v2086_v50, 16 }
   0xe   : > { %s2027_s9 = sshll.u32 %s2337_s28, 3 }
   0xf   : > { %s320_s12 = scalar_lea.vmem %s2328_s1, %s2027_s9  ;;  %s315_s17 = scalar_lea.vmem %s2327_s0, %s2027_s9  ;;  %vm450_vm4 = vcmp.ge.s32.totalorder %v2078_v43, 0  ;;  %vm586_vm8 = vcmp.lt.s32.totalorder %v2088_v51, 16 }
  0x10   : > { %v328_v2 = vld [vmem:[%s320_s12] sm:$0xff] }
  0x11   : > { %v330_v3 = vcombine.high %v328_v2, %v328_v2  ;;  %v332_v4 = vpack.c.bf16 %v328_v2, %v328_v2  ;;  %v327_v16 = vld [vmem:[%s315_s17] sm:$0xff] }
  0x13   : > { %v333_v5 = vpack.c.bf16 %v330_v3, %v330_v3  ;;  %v341_v6 = vsel %vm339_vm0, %v332_v4, 0 }
  0x15   : > { %1775 = vmatprep.subr.msk.bf16.mxu1 %vm339_vm0, %v333_v5 }
  0x16   : > { %347 = vmatpush1.bf16.msra.mxu1 %v341_v6 }
  0x19   : > { %1776 = vmatmul.mubr.msk.bf16.vlgmr.msra.gmra.mrb[0].mxu1 %vm335_vm1, %v334_v7 }
  0x1a   : > { %522 = vmatprep.mubr.bf16.mxu1 %v1956_v0 }
  0x86   : > { %v396_v14 = vpop.permute.xlu0 %395 }
  0x87   : > { %v403_v20 = vrot.slane %v396_v14, %v2044_v13 }
  0xec   : > { %v380_v15 = vpop.f32.mrb[0].mxu1 }
  0xed   : > { %v382_v17 = vpop.f32.mrb[1].mxu1 }
  0xee   : > { %v389_v18 = vcombine.low %v380_v15, %v382_v17  ;;  %v384_v19 = vpop.f32.mrb[2].mxu1 }
  0xef   : > { %v385_v21 = vpop.f32.mrb[3].mxu1 }
  0xf0   : > { %v391_v22 = vadd.f32 %v389_v18, %v327_v16 }
  0xf2   : > { %v2047_v23 = vadd.f32 %v403_v20, %v391_v22 }
  0xf4   : > { %v433_v24 = vmax.f32 %v2047_v23, 0.0 }
  0xf6   : > { %v435_v25 = vcombine.high %v433_v24, %v433_v24 }
  0xf8   : > { %v1886_v26 = vpack.i.bf16 %v435_v25, %v433_v24  ;;  %v1782_v24 = vld [vmem:[%s2331_s4 + $0x8] sm:$0xf] }
  0xfa   : > { %1887 = vrot.lane.b32.xlu0 %v1886_v26, %s1958_s18 }
 0x16c   : > { %v1888_v27 = vpop.permute.xlu0 %1887 }
 0x16d   : > { %v1890_v28 = vunpack.i.h.bf16 %v1888_v27  ;;  %v1889_v29 = vunpack.i.l.bf16 %v1888_v27 }
 0x16f   : > { %v446_v30 = vsel %vm440_vm2, %v1890_v28, 0.0  ;;  %v445_v31 = vsel %vm440_vm2, 0.0, %v1889_v29  ;;  %v441_v34 = vsel %vm440_vm2, %v1889_v29, %v1890_v28 }
 0x170   : > { %v468_v32 = vpack.c.bf16 %v446_v30, %v446_v30  ;;  %v466_v33 = vpack.c.bf16 %v445_v31, %v445_v31  ;;  %v467_v35 = vpack.c.bf16 %v441_v34, %v441_v34  ;;  %v1891_v36 = vpack.i.bf16 %v441_v34, %v445_v31 }
 0x171   : > { %v460_v46 = vsel %vm450_vm4, %v441_v34, 0.0  ;;  %v459_v47 = vsel %vm449_vm3, %v445_v31, 0.0 }
 0x172   : > { %476 = vrot.lane.b32.xlu0 %v468_v32, %s1959_s19  ;;  %472 = vrot.lane.b32.xlu1 %v466_v33, %s1959_s19  ;;  %v463_v55 = vpack.c.bf16 %v460_v46, %v460_v46  ;;  %v462_v56 = vpack.c.bf16 %v459_v47, %v459_v47 }
 0x174   : > { %v535_v62 = vsel %vm339_vm0, %v462_v56, 0  ;;  %v1788_v56 = vld [vmem:[%s2331_s4 + $0x10] sm:$0xf] }
 0x176   : > { %599 = vrot.lane.b32.xlu0 %v446_v30, %s1960_s20  ;;  %474 = vrot.lane.b32.xlu1 %v467_v35, %s1959_s19 }
 0x17a   : > { %668 = vrot.lane.b32.xlu0 %v446_v30, %s1961_s21  ;;  %1892 = vrot.lane.b32.xlu1 %v1891_v36, %s1960_s20 }
 0x17e   : > { %737 = vrot.lane.b32.xlu0 %v467_v35, %s1962_s22  ;;  %1897 = vrot.lane.b32.xlu1 %v1891_v36, %s1961_s21 }
 0x182   : > { %1902 = vrot.lane.b32.xlu0 %v1891_v36, %s1963_s23  ;;  %735 = vrot.lane.b32.xlu1 %v466_v33, %s1962_s22 }
 0x186   : > { %1907 = vrot.lane.b32.xlu0 %v1891_v36, %s1964_s24  ;;  %739 = vrot.lane.b32.xlu1 %v468_v32, %s1962_s22 }
 0x18a   : > { %1912 = vrot.lane.b32.xlu0 %v1891_v36, %s1965_s25  ;;  %800 = vrot.lane.b32.xlu1 %v446_v30, %s1963_s23  ;;  %v1785_v36 = vld [vmem:[%s2331_s4 + $0xc] sm:$0xf] }
 0x18e   : > { %936 = vrot.lane.b32.xlu0 %v466_v33, %s1966_s26  ;;  %869 = vrot.lane.b32.xlu1 %v446_v30, %s1964_s24 }
 0x192   : > { %940 = vrot.lane.b32.xlu0 %v468_v32, %s1966_s26  ;;  %1001 = vrot.lane.b32.xlu1 %v446_v30, %s1965_s25 }
 0x196   : > { %938 = vrot.lane.b32.xlu1 %v467_v35, %s1966_s26 }
 0x19a   : > { %1069 = vperm.xlu1 %1916, %v1066_v37  }
 0x1e4   : > { %v477_v44 = vpop.permute.xlu0 %476  ;;  %v473_v45 = vpop.permute.xlu1 %472 }
 0x1e8   : > { %v600_v48 = vpop.permute.xlu0 %599  ;;  %v475_v49 = vpop.permute.xlu1 %474 }
 0x1e9   : > { %v479_v52 = vsel %vm478_vm5, %v473_v45, %v475_v49  ;;  %v480_v53 = vsel %vm478_vm5, %v475_v49, %v477_v44 }
 0x1ea   : > { %v485_v54 = vsel %vm339_vm0, %v479_v52, 0  ;;  %1778 = vmatprep.subr.msk.bf16.mxu1 %vm339_vm0, %v480_v53 }
 0x1eb   : > { %491 = vmatpush1.bf16.msra.mxu1 %v485_v54 }
 0x1ec   : > { %v669_v58 = vpop.permute.xlu0 %668  ;;  %v1893_v59 = vpop.permute.xlu1 %1892  ;;  %1780 = vmatprep.subr.msk.bf16.mxu1 %vm339_vm0, %v463_v55 }
 0x1ed   : > { %v1895_v60 = vunpack.i.h.bf16 %v1893_v59  ;;  %v1894_v61 = vunpack.i.l.bf16 %v1893_v59 }
 0x1ee   : > { %1779 = vmatmul.mubr.msk.bf16.vlgmr.msra.gmra.mrb[4].mxu1 %vm335_vm1, %v1777_v57  ;;  %v1797_v57 = vld [vmem:[%s2331_s4 + $0x1c] sm:$0xf] }
 0x1ef   : > { %v603_v63 = vsel %vm601_vm6, %v1895_v60, %v600_v48  ;;  %v602_v1 = vsel %vm601_vm6, %v1894_v61, %v1895_v60  ;;  %541 = vmatpush1.bf16.msra.mxu1 %v535_v62  ;;  %572 = vmatprep.mubr.bf16.mxu1 %v1956_v0 }
 0x1f0   : > { %v607_v2 = vsel %vm586_vm8, %v603_v63, 0.0  ;;  %v738_v3 = vpop.permute.xlu0 %737  ;;  %v1898_v4 = vpop.permute.xlu1 %1897  ;;  %v606_v5 = vsel %vm585_vm7, %v602_v1, 0.0 }
 0x1f1   : > { %v1900_v6 = vunpack.i.h.bf16 %v1898_v4  ;;  %v1899_v7 = vunpack.i.l.bf16 %v1898_v4  ;;  %v611_v8 = vpack.c.bf16 %v607_v2, %v607_v2  ;;  %v610_v9 = vpack.c.bf16 %v606_v5, %v606_v5  ;;  %v1791_v4 = vld [vmem:[%s2331_s4 + $0x14] sm:$0xf] }
 0x1f3   : > { %v672_v10 = vsel %vm670_vm9, %v1900_v6, %v669_v58  ;;  %1783 = vmatprep.subr.msk.bf16.mxu1 %vm339_vm0, %v611_v8  ;;  %v671_v14 = vsel %vm670_vm9, %v1899_v7, %v1900_v6  ;;  %v616_v18 = vsel %vm339_vm0, %v610_v9, 0 }
 0x1f4   : > { %v676_v12 = vsel %vm450_vm4, %v672_v10, 0.0  ;;  %v1903_v15 = vpop.permute.xlu0 %1902  ;;  %v736_v16 = vpop.permute.xlu1 %735  ;;  %v675_v19 = vsel %vm449_vm3, %v671_v14, 0.0  ;;  %v1794_v10 = vld [vmem:[%s2331_s4 + $0x18] sm:$0xf] }
 0x1f5   : > { %v680_v17 = vpack.c.bf16 %v676_v12, %v676_v12  ;;  %v679_v22 = vpack.c.bf16 %v675_v19, %v675_v19  ;;  %v1905_v27 = vunpack.i.h.bf16 %v1903_v15  ;;  %v1904_v30 = vunpack.i.l.bf16 %v1903_v15  ;;  %v1800_v12 = vld [vmem:[%s2331_s4 + $0x20] sm:$0xf] }
 0x1f6   : > { %1781 = vmatmul.mubr.msk.bf16.vlgmr.msra.gmra.mrb[8].mxu1 %vm335_vm1, %v461_v11  ;;  %v742_v34 = vsel %vm741_vm10, %v736_v16, %v738_v3 }
 0x1f7   : > { %622 = vmatpush1.bf16.msra.mxu1 %v616_v18  ;;  %653 = vmatprep.mubr.bf16.mxu1 %v1956_v0  ;;  %v685_v28 = vsel %vm339_vm0, %v679_v22, 0  ;;  %v803_v38 = vsel %vm802_vm11, %v1904_v30, %v1905_v27  ;;  %v748_v39 = vsel %vm339_vm0, %v742_v34, 0 }
 0x1f8   : > { %1786 = vmatprep.subr.msk.bf16.mxu1 %vm339_vm0, %v680_v17  ;;  %v1908_v20 = vpop.permute.xlu0 %1907  ;;  %v740_v21 = vpop.permute.xlu1 %739  ;;  %v807_v44 = vsel %vm585_vm7, %v803_v38, 0.0 }
 0x1f9   : > { %v743_v29 = vsel %vm741_vm10, %v738_v3, %v740_v21  ;;  %v1910_v40 = vunpack.i.h.bf16 %v1908_v20  ;;  %v1909_v45 = vunpack.i.l.bf16 %v1908_v20  ;;  %v811_v54 = vpack.c.bf16 %v807_v44, %v807_v44 }
 0x1fb   : > { %v872_v58 = vsel %vm871_vm13, %v1909_v45, %v1910_v40  ;;  %v817_v61 = vsel %vm339_vm0, %v811_v54, 0 }
 0x1fc   : > { %v1913_v25 = vpop.permute.xlu0 %1912  ;;  %v801_v26 = vpop.permute.xlu1 %800  ;;  %v876_v62 = vsel %vm449_vm3, %v872_v58, 0.0 }
 0x1fd   : > { %v804_v31 = vsel %vm802_vm11, %v1905_v27, %v801_v26  ;;  %v1915_v59 = vunpack.i.h.bf16 %v1913_v25  ;;  %v1914_v63 = vunpack.i.l.bf16 %v1913_v25  ;;  %v880_v2 = vpack.c.bf16 %v876_v62, %v876_v62 }
 0x1fe   : > { %1784 = vmatmul.mubr.msk.bf16.vlgmr.msra.gmra.mrb[12].mxu1 %vm335_vm1, %v1782_v24  ;;  %v808_v35 = vsel %vm586_vm8, %v804_v31, 0.0 }
 0x1ff   : > { %691 = vmatpush1.bf16.msra.mxu1 %v685_v28  ;;  %722 = vmatprep.mubr.bf16.mxu1 %v1956_v0  ;;  %v812_v41 = vpack.c.bf16 %v808_v35, %v808_v35  ;;  %v1004_v5 = vsel %vm1003_vm14, %v1914_v63, %v1915_v59  ;;  %v886_v7 = vsel %vm339_vm0, %v880_v2, 0 }
 0x200   : > { %1789 = vmatprep.subr.msk.bf16.mxu1 %vm339_vm0, %v743_v29  ;;  %v870_v32 = vpop.permute.xlu1 %869  ;;  %v937_v33 = vpop.permute.xlu0 %936  ;;  %v1008_v8 = vsel %vm585_vm7, %v1004_v5, 0.0 }
 0x201   : > { %v873_v46 = vsel %vm871_vm13, %v1910_v40, %v870_v32  ;;  %v1012_v9 = vpack.c.bf16 %v1008_v8, %v1008_v8 }
 0x202   : > { %v877_v55 = vsel %vm450_vm4, %v873_v46, 0.0 }
 0x203   : > { %v881_v60 = vpack.c.bf16 %v877_v55, %v877_v55  ;;  %v1018_v11 = vsel %vm339_vm0, %v1012_v9, 0 }
 0x204   : > { %v1002_v37 = vpop.permute.xlu1 %1001  ;;  %v941_v47 = vpop.permute.xlu0 %940 }
 0x205   : > { %v1005_v1 = vsel %vm1003_vm14, %v1915_v59, %v1002_v37 }
 0x206   : > { %1787 = vmatmul.mubr.msk.bf16.vlgmr.msra.gmra.mrb[16].mxu1 %vm335_vm1, %v1785_v36  ;;  %v1009_v3 = vsel %vm586_vm8, %v1005_v1, 0.0 }
 0x207   : > { %754 = vmatpush1.bf16.msra.mxu1 %v748_v39  ;;  %785 = vmatprep.mubr.bf16.mxu1 %v1956_v0  ;;  %v1013_v6 = vpack.c.bf16 %v1009_v3, %v1009_v3 }
 0x208   : > { %1792 = vmatprep.subr.msk.bf16.mxu1 %vm339_vm0, %v812_v41  ;;  %v939_v48 = vpop.permute.xlu1 %938 }
 0x209   : > { %v944_v49 = vsel %vm942_vm12, %v939_v48, %v941_v47  ;;  %v943_v52 = vsel %vm942_vm12, %v937_v33, %v939_v48 }
 0x20a   : > { %1798 = vmatprep.subr.msk.bf16.mxu0 %vm339_vm0, %v944_v49  ;;  %v949_v53 = vsel %vm339_vm0, %v943_v52, 0 }
 0x20b   : > { %955 = vmatpush1.bf16.msra.mxu0 %v949_v53 }
 0x20e   : > { %1790 = vmatmul.mubr.msk.bf16.vlgmr.msra.gmra.mrb[20].mxu1 %vm335_vm1, %v1788_v56  ;;  %1799 = vmatmul.mubr.msk.bf16.vlgmr.msra.gmra.mrb[0].mxu0 %vm335_vm1, %v1797_v57 }
 0x20f   : > { %823 = vmatpush1.bf16.msra.mxu1 %v817_v61  ;;  %854 = vmatprep.mubr.bf16.mxu1 %v1956_v0 }
 0x210   : > { %1795 = vmatprep.subr.msk.bf16.mxu1 %vm339_vm0, %v881_v60  ;;  %1152 = vmatprep.mubr.bf16.mxu0 %v1956_v0 }
 0x216   : > { %1793 = vmatmul.mubr.msk.bf16.vlgmr.msra.gmra.mrb[24].mxu1 %vm335_vm1, %v1791_v4 }
 0x217   : > { %892 = vmatpush1.bf16.msra.mxu1 %v886_v7  ;;  %923 = vmatprep.mubr.bf16.mxu1 %v1956_v0 }
 0x218   : > { %1801 = vmatprep.subr.msk.bf16.mxu1 %vm339_vm0, %v1013_v6  ;;  %vm1109_vm0 = vcmask 64512  }
 0x219   : > { %v1070_v3 = vpop.permute.xlu1 %1069 }
 0x21e   : > { %1796 = vmatmul.mubr.msk.bf16.vlgmr.msra.gmra.mrb[28].mxu1 %vm335_vm1, %v1794_v10 }
 0x21f   : > { %1024 = vmatpush1.bf16.msra.mxu1 %v1018_v11  ;;  %1055 = vmatprep.mubr.bf16.mxu1 %v1956_v0 }
 0x226   : > { %1802 = vmatmul.mubr.msk.bf16.vlgmr.msra.gmra.mrb[32].mxu1 %vm335_vm1, %v1800_v12 }
 0x2c1   : > { %v524_v14 = vpop.f32.mrb[4].mxu1 }
 0x2c2   : > { %v526_v15 = vpop.f32.mrb[5].mxu1 }
 0x2c3   : > { %v528_v16 = vpop.f32.mrb[6].mxu1 }
 0x2c4   : > { %v529_v17 = vpop.f32.mrb[7].mxu1 }
 0x2c9   : > { %v574_v18 = vpop.f32.mrb[8].mxu1 }
 0x2ca   : > { %v575_v19 = vadd.f32 %v574_v18, %v524_v14  ;;  %v576_v20 = vpop.f32.mrb[9].mxu1 }
 0x2cb   : > { %v577_v21 = vadd.f32 %v576_v20, %v526_v15  ;;  %v578_v22 = vpop.f32.mrb[10].mxu1 }
 0x2cc   : > { %v579_v24 = vpop.f32.mrb[11].mxu1 }
 0x2d1   : > { %v655_v25 = vpop.f32.mrb[12].mxu1 }
 0x2d2   : > { %v662_v26 = vadd.f32 %v655_v25, %v575_v19  ;;  %v657_v27 = vpop.f32.mrb[13].mxu1 }
 0x2d3   : > { %v663_v28 = vadd.f32 %v657_v27, %v577_v21  ;;  %v659_v29 = vpop.f32.mrb[14].mxu1 }
 0x2d4   : > { %v660_v30 = vpop.f32.mrb[15].mxu1 }
 0x2d9   : > { %v724_v31 = vpop.f32.mrb[16].mxu1 }
 0x2da   : > { %v731_v32 = vadd.f32 %v724_v31, %v662_v26  ;;  %v726_v33 = vpop.f32.mrb[17].mxu1  ;;  %v1682_v26 = vld [vmem:[%s2334_s7] sm:$0xf] }
 0x2db   : > { %v732_v34 = vadd.f32 %v726_v33, %v663_v28  ;;  %v728_v35 = vpop.f32.mrb[18].mxu1 }
 0x2dc   : > { %v729_v36 = vpop.f32.mrb[19].mxu1 }
 0x2e1   : > { %v787_v37 = vpop.f32.mrb[20].mxu1  ;;  %v988_v38 = vpop.f32.mrb[0].mxu0 }
 0x2e2   : > { %v794_v39 = vadd.f32 %v787_v37, %v731_v32  ;;  %v789_v40 = vpop.f32.mrb[21].mxu1  ;;  %v990_v41 = vpop.f32.mrb[1].mxu0 }
 0x2e3   : > { %v795_v44 = vadd.f32 %v789_v40, %v732_v34  ;;  %v791_v45 = vpop.f32.mrb[22].mxu1  ;;  %v992_v46 = vpop.f32.mrb[2].mxu0 }
 0x2e4   : > { %v792_v47 = vpop.f32.mrb[23].mxu1  ;;  %v993_v48 = vpop.f32.mrb[3].mxu0 }
 0x2e9   : > { %v856_v49 = vpop.f32.mrb[24].mxu1 }
 0x2ea   : > { %v863_v52 = vadd.f32 %v856_v49, %v794_v39  ;;  %v858_v53 = vpop.f32.mrb[25].mxu1  ;;  %v1803_v39 = vld [vmem:[%s2333_s6 + $0x2] sm:$0x3] }
 0x2eb   : > { %v864_v54 = vadd.f32 %v858_v53, %v795_v44  ;;  %v860_v55 = vpop.f32.mrb[26].mxu1 }
 0x2ec   : > { %v861_v56 = vpop.f32.mrb[27].mxu1 }
 0x2f1   : > { %v925_v57 = vpop.f32.mrb[28].mxu1 }
 0x2f2   : > { %v932_v58 = vadd.f32 %v925_v57, %v863_v52  ;;  %v927_v59 = vpop.f32.mrb[29].mxu1 }
 0x2f3   : > { %v933_v60 = vadd.f32 %v927_v59, %v864_v54  ;;  %v929_v61 = vpop.f32.mrb[30].mxu1 }
 0x2f4   : > { %v995_v62 = vadd.f32 %v988_v38, %v932_v58  ;;  %v930_v63 = vpop.f32.mrb[31].mxu1  ;;  %v1090_v58 = vld [vmem:[%s2333_s6] sm:$0x3] }
 0x2f5   : > { %v996_v1 = vadd.f32 %v990_v41, %v933_v60 }
 0x2f9   : > { %v1057_v2 = vpop.f32.mrb[32].mxu1 }
 0x2fa   : > { %v1064_v4 = vadd.f32 %v1057_v2, %v995_v62  ;;  %v1059_v5 = vpop.f32.mrb[33].mxu1 }
 0x2fb   : > { %v1065_v6 = vadd.f32 %v1059_v5, %v996_v1  ;;  %v1061_v7 = vpop.f32.mrb[34].mxu1 }
 0x2fc   : > { %v1072_v8 = vadd.f32 %v1070_v3, %v1064_v4  ;;  %v1062_v9 = vpop.f32.mrb[35].mxu1  ;;  %v1808_v4 = vld [vmem:[%s2333_s6 + $0x4] sm:$0x3] }
 0x2fd   : > { %v1073_v10 = vadd.f32 %v1070_v3, %v1065_v6 }
 0x2fe   : > { %v1074_v11 = vmax.f32 %v1072_v8, 0.0 }
 0x2ff   : > { %v1075_v12 = vmax.f32 %v1073_v10, 0.0 }
 0x301   : > { %v1917_v14 = vpack.i.bf16 %v1075_v12, %v1074_v11 }
 0x303   : > { %1918 = vrot.lane.b32.xlu0 %v1917_v14, %s1958_s18 }
 0x375   : > { %v1919_v15 = vpop.permute.xlu0 %1918 }
 0x376   : > { %v1921_v16 = vunpack.i.h.bf16 %v1919_v15  ;;  %v1920_v17 = vunpack.i.l.bf16 %v1919_v15  ;;  %v1811_v15 = vld [vmem:[%s2333_s6 + $0x6] sm:$0x3] }
 0x378   : > { %v1082_v18 = vsel %vm440_vm2, %v1920_v17, %v1921_v16  ;;  %v1086_v19 = vsel %vm440_vm2, 0.0, %v1920_v17  ;;  %v1087_v22 = vsel %vm440_vm2, %v1921_v16, 0.0 }
 0x379   : > { %v1095_v20 = vpack.c.bf16 %v1086_v19, %v1086_v19  ;;  %v1096_v21 = vpack.c.bf16 %v1082_v18, %v1082_v18  ;;  %v1097_v24 = vpack.c.bf16 %v1087_v22, %v1087_v22  ;;  %v1922_v25 = vpack.i.bf16 %v1082_v18, %v1086_v19 }
 0x37a   : > { %v1089_v30 = vsel %vm450_vm4, %v1082_v18, 0.0  ;;  %v1088_v31 = vsel %vm449_vm3, %v1086_v19, 0.0 }
 0x37b   : > { %1101 = vrot.lane.b32.xlu1 %v1095_v20, %s1959_s19  ;;  %1103 = vrot.lane.b32.xlu0 %v1096_v21, %s1959_s19  ;;  %v1092_v36 = vpack.c.bf16 %v1089_v30, %v1089_v30  ;;  %v1091_v37 = vpack.c.bf16 %v1088_v31, %v1088_v31 }
 0x37d   : > { %v1165_v46 = vsel %vm1113_vm15, %v1091_v37, 0  ;;  %v1817_v37 = vld [vmem:[%s2333_s6 + $0xa] sm:$0x3] }
 0x37f   : > { %1105 = vrot.lane.b32.xlu1 %v1097_v24, %s1959_s19  ;;  %1923 = vrot.lane.b32.xlu0 %v1922_v25, %s1960_s20 }
 0x383   : > { %1217 = vrot.lane.b32.xlu1 %v1087_v22, %s1960_s20  ;;  %1928 = vrot.lane.b32.xlu0 %v1922_v25, %s1961_s21  ;;  %s325_s20 = scalar_lea.vmem %s2335_s8, %s2027_s9 }
 0x387   : > { %1285 = vrot.lane.b32.xlu1 %v1087_v22, %s1961_s21  ;;  %1351 = vrot.lane.b32.xlu0 %v1095_v20, %s1962_s22 }
 0x38b   : > { %1353 = vrot.lane.b32.xlu1 %v1096_v21, %s1962_s22  ;;  %1355 = vrot.lane.b32.xlu0 %v1097_v24, %s1962_s22 }
 0x38f   : > { %1933 = vrot.lane.b32.xlu1 %v1922_v25, %s1963_s23  ;;  %1415 = vrot.lane.b32.xlu0 %v1087_v22, %s1963_s23 }
 0x393   : > { %1938 = vrot.lane.b32.xlu1 %v1922_v25, %s1964_s24  ;;  %1483 = vrot.lane.b32.xlu0 %v1087_v22, %s1964_s24 }
 0x397   : > { %1549 = vrot.lane.b32.xlu1 %v1095_v20, %s1966_s26  ;;  %1551 = vrot.lane.b32.xlu0 %v1096_v21, %s1966_s26 }
 0x39b   : > { %1553 = vrot.lane.b32.xlu1 %v1097_v24, %s1966_s26  ;;  %1943 = vrot.lane.b32.xlu0 %v1922_v25, %s1965_s25 }
 0x39f   : > { %1613 = vrot.lane.b32.xlu1 %v1087_v22, %s1965_s25  ;;  %1685 = vperm.xlu0 %1885, %v1682_v26  }
 0x3ed   : > { %v1102_v27 = vpop.permute.xlu1 %1101  ;;  %v1104_v28 = vpop.permute.xlu0 %1103 }
 0x3ee   : > { %v1107_v29 = vsel %vm478_vm5, %v1102_v27, %v1104_v28 }
 0x3ef   : > { %v1115_v35 = vsel %vm1113_vm15, %v1107_v29, 0 }
 0x3f1   : > { %v1106_v32 = vpop.permute.xlu1 %1105  ;;  %v1924_v33 = vpop.permute.xlu0 %1923 }
 0x3f2   : > { %v1108_v34 = vsel %vm478_vm5, %v1104_v28, %v1106_v32  ;;  %v1926_v38 = vunpack.i.h.bf16 %v1924_v33  ;;  %v1925_v40 = vunpack.i.l.bf16 %v1924_v33  ;;  %v1814_v28 = vld [vmem:[%s2333_s6 + $0x8] sm:$0x3] }
 0x3f3   : > { %1804 = vmatprep.subr.msk.bf16.mxu0 %vm1113_vm15, %v1108_v34 }
 0x3f4   : > { %1121 = vmatpush1.bf16.msra.mxu0 %v1115_v35  ;;  %v1219_v49 = vsel %vm601_vm6, %v1925_v40, %v1926_v38 }
 0x3f5   : > { %v1218_v41 = vpop.permute.xlu1 %1217  ;;  %1806 = vmatprep.subr.msk.bf16.mxu0 %vm1113_vm15, %v1092_v36  ;;  %v1929_v48 = vpop.permute.xlu0 %1928  ;;  %v1223_v54 = vsel %vm585_vm7, %v1219_v49, 0.0 }
 0x3f6   : > { %v1220_v44 = vsel %vm601_vm6, %v1926_v38, %v1218_v41  ;;  %v1931_v53 = vunpack.i.h.bf16 %v1929_v48  ;;  %v1227_v56 = vpack.c.bf16 %v1223_v54, %v1223_v54  ;;  %v1930_v59 = vunpack.i.l.bf16 %v1929_v48 }
 0x3f7   : > { %v1224_v45 = vsel %vm586_vm8, %v1220_v44, 0.0  ;;  %1805 = vmatmul.mubr.msk.bf16.vlgmr.msra.gmra.mrb[4].mxu0 %vm1109_vm0, %v1803_v39 }
 0x3f8   : > { %v1228_v47 = vpack.c.bf16 %v1224_v45, %v1224_v45  ;;  %1171 = vmatpush1.bf16.msra.mxu0 %v1165_v46  ;;  %1202 = vmatprep.mubr.bf16.mxu0 %v1956_v0  ;;  %v1233_v61 = vsel %vm1113_vm15, %v1227_v56, 0  ;;  %v1287_v62 = vsel %vm670_vm9, %v1930_v59, %v1931_v53 }
 0x3f9   : > { %v1286_v52 = vpop.permute.xlu1 %1285  ;;  %v1352_v63 = vpop.permute.xlu0 %1351  ;;  %v1291_v2 = vsel %vm449_vm3, %v1287_v62, 0.0 }
 0x3fa   : > { %1809 = vmatprep.subr.msk.bf16.mxu0 %vm1113_vm15, %v1228_v47  ;;  %v1288_v55 = vsel %vm670_vm9, %v1931_v53, %v1286_v52  ;;  %v1295_v3 = vpack.c.bf16 %v1291_v2, %v1291_v2  ;;  %v1820_v47 = vld [vmem:[%s2333_s6 + $0xc] sm:$0x3] }
 0x3fb   : > { %v1292_v57 = vsel %vm450_vm4, %v1288_v55, 0.0  ;;  %v1823_v55 = vld [vmem:[%s2333_s6 + $0xe] sm:$0x3] }
 0x3fc   : > { %v1296_v60 = vpack.c.bf16 %v1292_v57, %v1292_v57  ;;  %v1301_v7 = vsel %vm1113_vm15, %v1295_v3, 0  ;;  %v1826_v57 = vld [vmem:[%s2333_s6 + $0x10] sm:$0x3] }
 0x3fd   : > { %v1354_v1 = vpop.permute.xlu1 %1353  ;;  %v1356_v5 = vpop.permute.xlu0 %1355 }
 0x3fe   : > { %v1358_v8 = vsel %vm741_vm10, %v1354_v1, %v1356_v5  ;;  %v1357_v12 = vsel %vm741_vm10, %v1352_v63, %v1354_v1 }
 0x3ff   : > { %v1363_v18 = vsel %vm1113_vm15, %v1357_v12, 0 }
 0x401   : > { %v1934_v6 = vpop.permute.xlu1 %1933  ;;  %v1416_v10 = vpop.permute.xlu0 %1415 }
 0x402   : > { %v1936_v9 = vunpack.i.h.bf16 %v1934_v6  ;;  %v1935_v16 = vunpack.i.l.bf16 %v1934_v6 }
 0x403   : > { %1807 = vmatmul.mubr.msk.bf16.vlgmr.msra.gmra.mrb[4].mxu0 %vm1109_vm0, %v1090_v58 }
 0x404   : > { %1239 = vmatpush1.bf16.msra.mxu0 %v1233_v61  ;;  %1270 = vmatprep.mubr.bf16.mxu0 %v1956_v0  ;;  %v1418_v11 = vsel %vm802_vm11, %v1936_v9, %v1416_v10  ;;  %v1417_v20 = vsel %vm802_vm11, %v1935_v16, %v1936_v9 }
 0x405   : > { %1812 = vmatprep.subr.msk.bf16.mxu0 %vm1113_vm15, %v1296_v60  ;;  %v1422_v14 = vsel %vm586_vm8, %v1418_v11, 0.0  ;;  %v1939_v17 = vpop.permute.xlu1 %1938  ;;  %v1484_v22 = vpop.permute.xlu0 %1483  ;;  %v1421_v24 = vsel %vm585_vm7, %v1417_v20, 0.0 }
 0x406   : > { %v1426_v19 = vpack.c.bf16 %v1422_v14, %v1422_v14  ;;  %v1941_v21 = vunpack.i.h.bf16 %v1939_v17  ;;  %v1425_v26 = vpack.c.bf16 %v1421_v24, %v1421_v24  ;;  %v1940_v29 = vunpack.i.l.bf16 %v1939_v17 }
 0x408   : > { %v1486_v25 = vsel %vm871_vm13, %v1941_v21, %v1484_v22  ;;  %v1431_v31 = vsel %vm1113_vm15, %v1425_v26, 0  ;;  %v1485_v32 = vsel %vm871_vm13, %v1940_v29, %v1941_v21 }
 0x409   : > { %v1490_v27 = vsel %vm450_vm4, %v1486_v25, 0.0  ;;  %v1550_v33 = vpop.permute.xlu1 %1549  ;;  %v1489_v43 = vsel %vm449_vm3, %v1485_v32, 0.0  ;;  %v1552_v34 = vpop.permute.xlu0 %1551 }
 0x40a   : > { %v1494_v30 = vpack.c.bf16 %v1490_v27, %v1490_v27  ;;  %v1493_v35 = vpack.c.bf16 %v1489_v43, %v1489_v43  ;;  %v1555_v45 = vsel %vm942_vm12, %v1550_v33, %v1552_v34 }
 0x40b   : > { %v1561_v49 = vsel %vm1113_vm15, %v1555_v45, 0 }
 0x40c   : > { %v1499_v38 = vsel %vm1113_vm15, %v1493_v35, 0 }
 0x40d   : > { %v1554_v36 = vpop.permute.xlu1 %1553  ;;  %v1944_v40 = vpop.permute.xlu0 %1943 }
 0x40e   : > { %v1556_v39 = vsel %vm942_vm12, %v1552_v34, %v1554_v36  ;;  %v1946_v41 = vunpack.i.h.bf16 %v1944_v40  ;;  %v1945_v48 = vunpack.i.l.bf16 %v1944_v40 }
 0x40f   : > { %1810 = vmatmul.mubr.msk.bf16.vlgmr.msra.gmra.mrb[4].mxu0 %vm1109_vm0, %v1808_v4 }
 0x410   : > { %1307 = vmatpush1.bf16.msra.mxu0 %v1301_v7  ;;  %1338 = vmatprep.mubr.bf16.mxu0 %v1956_v0  ;;  %v1615_v53 = vsel %vm1003_vm14, %v1945_v48, %v1946_v41 }
 0x411   : > { %1815 = vmatprep.subr.msk.bf16.mxu0 %vm1113_vm15, %v1358_v8  ;;  %v1614_v42 = vpop.permute.xlu1 %1613  ;;  %v1619_v51 = vsel %vm585_vm7, %v1615_v53, 0.0 }
 0x412   : > { %v1616_v44 = vsel %vm1003_vm14, %v1946_v41, %v1614_v42  ;;  %v1623_v54 = vpack.c.bf16 %v1619_v51, %v1619_v51 }
 0x413   : > { %v1620_v46 = vsel %vm586_vm8, %v1616_v44, 0.0 }
 0x414   : > { %v1624_v52 = vpack.c.bf16 %v1620_v46, %v1620_v46  ;;  %v1629_v56 = vsel %vm1113_vm15, %v1623_v54, 0 }
 0x41b   : > { %1813 = vmatmul.mubr.msk.bf16.vlgmr.msra.gmra.mrb[4].mxu0 %vm1109_vm0, %v1811_v15 }
 0x41c   : > { %1369 = vmatpush1.bf16.msra.mxu0 %v1363_v18  ;;  %1400 = vmatprep.mubr.bf16.mxu0 %v1956_v0 }
 0x41d   : > { %1818 = vmatprep.subr.msk.bf16.mxu0 %vm1113_vm15, %v1426_v19 }
 0x41e   : > { %v1686_v58 = vpop.permute.xlu0 %1685 }
 0x41f   : > { %v1693_v63 = vrot.slane %v1686_v58, %v2044_v13 }
 0x427   : > { %1816 = vmatmul.mubr.msk.bf16.vlgmr.msra.gmra.mrb[4].mxu0 %vm1109_vm0, %v1814_v28 }
 0x428   : > { %1437 = vmatpush1.bf16.msra.mxu0 %v1431_v31  ;;  %1468 = vmatprep.mubr.bf16.mxu0 %v1956_v0 }
 0x429   : > { %1821 = vmatprep.subr.msk.bf16.mxu0 %vm1113_vm15, %v1494_v30 }
 0x433   : > { %1819 = vmatmul.mubr.msk.bf16.vlgmr.msra.gmra.mrb[4].mxu0 %vm1109_vm0, %v1817_v37 }
 0x434   : > { %1505 = vmatpush1.bf16.msra.mxu0 %v1499_v38  ;;  %1536 = vmatprep.mubr.bf16.mxu0 %v1956_v0 }
 0x435   : > { %1824 = vmatprep.subr.msk.bf16.mxu0 %vm1113_vm15, %v1556_v39 }
 0x43f   : > { %1822 = vmatmul.mubr.msk.bf16.vlgmr.msra.gmra.mrb[4].mxu0 %vm1109_vm0, %v1820_v47 }
 0x440   : > { %1567 = vmatpush1.bf16.msra.mxu0 %v1561_v49  ;;  %1598 = vmatprep.mubr.bf16.mxu0 %v1956_v0 }
 0x441   : > { %1827 = vmatprep.subr.msk.bf16.mxu0 %vm1113_vm15, %v1624_v52 }
 0x44b   : > { %1825 = vmatmul.mubr.msk.bf16.vlgmr.msra.gmra.mrb[4].mxu0 %vm1109_vm0, %v1823_v55 }
 0x44c   : > { %1635 = vmatpush1.bf16.msra.mxu0 %v1629_v56  ;;  %1666 = vmatprep.mubr.bf16.mxu0 %v1956_v0 }
 0x457   : > { %1828 = vmatmul.mubr.msk.bf16.vlgmr.msra.gmra.mrb[4].mxu0 %vm1109_vm0, %v1826_v57 }
 0x52a   : > { %v1668_v50 = vpop.f32.mrb[4].mxu0 }
 0x52b   : > { %v1670_v59 = vpop.f32.mrb[5].mxu0 }
 0x52c   : > { %v1679_v60 = vcombine.low %v1668_v50, %v1670_v59  ;;  %v1672_v61 = vpop.f32.mrb[6].mxu0 }
 0x52d   : > { %v1673_v62 = vpop.f32.mrb[7].mxu0 }
 0x52e   : > { %v1681_v1 = vadd.f32 %v1679_v60, %v2047_v23 }
 0x530   : > { %v1695_v0 = vadd.f32 %v1693_v63, %v1681_v1 }
 0x532   : > { %1696 = vst [vmem:[%s325_s20] sm:$0xff] %v1695_v0 }
 0x533 PF: > { %s18_s27 = sadd.s32 1, %s1954_s27  }
 0x534   : > { %p15_p4 = scmp.ge.s32.totalorder %s18_s27, 4  }
 0x536   :  { %17 = sbr.rel (!%p15_p4) target bundleno = 1 (0x1), region = 101 }

// kernel: decoder_block_forward.3
= control target key start
LH: loop header
LB: loop body
LE: loop exit
PB: predicated region body
PF: predicated region fallthrough
CT: control target
= control target key end

     0   :  { %s1889_s24 = smov 0   ;;  %s2220_s0 = inlined_call_operand.vmem [shape: f32[2,4,256], index: 0, kind: input, shape index: {}]   ;;  %s2221_s1 = inlined_call_operand.vmem [shape: bf16[9,8,4], index: 1, kind: input, shape index: {}]   ;;  %s2222_s2 = inlined_call_operand.vmem [shape: f32[8,1], index: 2, kind: input, shape index: {}]   ;;  %s2223_s3 = inlined_call_operand.vmem [shape: bf16[9,8,8], index: 3, kind: input, shape index: {}]   ;;  %s2224_s4 = inlined_call_operand.vmem [shape: f32[8,1], index: 4, kind: input, shape index: {}]   ;;  %s2225_s5 = inlined_call_operand.vmem [shape: bf16[8,4], index: 5, kind: input, shape index: {}]   ;;  %s2226_s6 = inlined_call_operand.vmem [shape: f32[8,1], index: 6, kind: input, shape index: {}]   ;;  %s2227_s7 = inlined_call_operand.vmem [shape: f32[2,8,256], index: 7, kind: output, shape index: {}]  }
   0x1 LB: > { %s1683_s25 = sadd.s32 4294967295, %s1837_s24   ;;  %p1687_p0 = scmp.ge.s32.totalorder %s1837_s24, 1  ;;  %s1837_s24 = sphi %s1889_s24, %s17_s24  }
   0x2   : > { %p237_p1 = scmp.lt.s32.totalorder %s1837_s24, 3 }
   0x4   : > { %p238_p2 = pnand %p1687_p0, %p237_p1 }
   0x5   : > { %p269_p3 = scmp.lt.s32.totalorder (!%p238_p2), %s1683_s25, 1  ;;  %s1839_s30 = smov (!%p238_p2), 17   ;;  %v281_v4 = vlaneseq (!%p238_p2)  ;;  %vm315_vm0 = vcmask (!%p238_p2), 138240   ;;  %vm360_vm3 = vcmask (!%p238_p2), 1041408   ;;  %v1841_v24 = vmov (!%p238_p2), 0   ;;  %v943_v28 = vld [vmem:[%s2222_s2] sm:$0xff] (!%p238_p2) }
   0x6   : > { %241 = sbr.rel (%p238_p2) target bundleno = 1020 (0x3fc), region = 48  ;;  %s1840_s8 = smov (!%p238_p2), 127   ;;  %399 = vmatprep.mubr.bf16.mxu0 (!%p238_p2), %v1841_v24  ;;  %vm356_vm4 = vcmask (!%p238_p2), 31744   ;;  %449 = vmatprep.mubr.bf16.mxu1 (!%p238_p2), %v1841_v24  ;;  %v336_v27 = vld [vmem:[%s2221_s1] sm:$0xf] (!%p238_p2)  ;;  %vm353_vm5 = vcmask (!%p238_p2), 1039360  }
   0x7   : > { %v1907_v5 = vand.u32 (!%p238_p2), 127, %v281_v4  ;;  %1798 = vset.pattern.permute.xlu0 (!%p238_p2), %v1841_v24  ;;  %1829 = vset.pattern.permute.xlu1 (!%p238_p2), %v1841_v24  ;;  %s1842_s11 = smov (!%p238_p2), 126   ;;  %s1843_s12 = smov (!%p238_p2), 112   ;;  %vm478_vm6 = vcmask (!%p238_p2), 1031168   ;;  %v1692_v40 = vld [vmem:[%s2221_s1 + $0x4] sm:$0xf] (!%p238_p2) }
   0x8   : > { %s1844_s13 = smov (!%p238_p2), 111   ;;  %s1845_s14 = smov (!%p238_p2), 110   ;;  %vm547_vm9 = vcmask (!%p238_p2), 916480   ;;  %v1697_v60 = vld [vmem:[%s2221_s1 + $0x8] sm:$0xf] (!%p238_p2)  ;;  %vm679_vm10 = vcmask (!%p238_p2), 900096  }
   0x9   : > { %v1910_v6 = vadd.s32 (!%p238_p2), 128, %v1907_v5  ;;  %v288_v8 = vand.u32 (!%p238_p2), 15, %v1907_v5  ;;  %s1846_s15 = smov (!%p238_p2), 96   ;;  %s1847_s16 = smov (!%p238_p2), 94   ;;  %vm618_vm11 = vcmask (!%p238_p2), 908288   ;;  %vm748_vm12 = vcmask (!%p238_p2), 785408  }
   0xa   : > { %s1848_s17 = smov (!%p238_p2), 95   ;;  %vm880_vm13 = vcmask (!%p238_p2), 769024   ;;  %vm819_vm14 = vcmask (!%p238_p2), 777216   ;;  %vm1052_vm15 = vcmask (!%p238_p2), 1043456  }
   0xb   : > { %v295_v7 = vand.u32 (!%p238_p2), 15, %v1910_v6  ;;  %v1920_v10 = vadd.s32 (!%p238_p2), 4294967295, %v288_v8  ;;  %v1966_v31 = vadd.s32 (!%p238_p2), 1, %v288_v8 }
   0xd   : > { %s2229_s25 = smov (!%p269_p3, %s1683_s25), 1  ;;  %v1916_v9 = vadd.s32 4294967295, %v295_v7  ;;  %vm324_vm2 = vcmp.ge.s32.totalorder %v1920_v10, 0  ;;  %v1971_v33 = vadd.s32 1, %v295_v7  ;;  %vm462_vm7 = vcmp.lt.s32.totalorder %v1966_v31, 16 }
   0xe   : > { %s1748_s26 = sshll.u32 %s2229_s25, 3  ;;  %v1740_v31 = vld [vmem:[%s2223_s3 + $0x1c] sm:$0xf]  ;;  %s1749_s28 = sshll.u32 %s2229_s25, 4 }
   0xf   : > { %s273_s29 = scalar_lea.vmem %s2220_s0, %s1748_s26  ;;  %vm325_vm1 = vcmp.ge.s32.totalorder %v1916_v9, 0  ;;  %vm463_vm8 = vcmp.lt.s32.totalorder %v1971_v33, 16 }
  0x10   : > { %v1903_v0 = vld [vmem:[%s273_s29] sm:$0xff] }
  0x11   : > { %v308_v1 = vmax.f32 %v1903_v0, 0.0 }
  0x13   : > { %v310_v2 = vcombine.high %v308_v1, %v308_v1 }
  0x15   : > { %v1768_v3 = vpack.i.bf16 %v310_v2, %v308_v1 }
  0x17   : > { %1769 = vrot.lane.b32.xlu0 %v1768_v3, %s1839_s30  ;;  %v1700_v3 = vld [vmem:[%s2221_s1 + $0xc] sm:$0xf] }
  0x89   : > { %v1770_v11 = vpop.permute.xlu0 %1769 }
  0x8a   : > { %v1772_v12 = vunpack.i.h.bf16 %v1770_v11  ;;  %v1771_v13 = vunpack.i.l.bf16 %v1770_v11 }
  0x8c   : > { %v316_v14 = vsel %vm315_vm0, %v1771_v13, %v1772_v12  ;;  %v320_v15 = vsel %vm315_vm0, 0.0, %v1771_v13  ;;  %v321_v20 = vsel %vm315_vm0, %v1772_v12, 0.0 }
  0x8d   : > { %v341_v16 = vpack.c.bf16 %v320_v15, %v320_v15  ;;  %v342_v17 = vpack.c.bf16 %v316_v14, %v316_v14  ;;  %v335_v18 = vsel %vm325_vm1, %v316_v14, 0.0  ;;  %v334_v19 = vsel %vm324_vm2, %v320_v15, 0.0 }
  0x8e   : > { %v338_v21 = vpack.c.bf16 %v335_v18, %v335_v18  ;;  %v337_v22 = vpack.c.bf16 %v334_v19, %v334_v19  ;;  %v1773_v25 = vpack.i.bf16 %v316_v14, %v320_v15  ;;  %v343_v26 = vpack.c.bf16 %v321_v20, %v321_v20 }
  0x8f   : > { %347 = vrot.lane.b32.xlu0 %v341_v16, %s1840_s8  ;;  %349 = vrot.lane.b32.xlu1 %v342_v17, %s1840_s8 }
  0x90   : > { %1695 = vmatprep.subr.msk.bf16.mxu1 %vm360_vm3, %v338_v21  ;;  %v412_v23 = vsel %vm360_vm3, %v337_v22, 0 }
  0x91   : > { %418 = vmatpush1.bf16.msra.mxu1 %v412_v23  ;;  %v1706_v23 = vld [vmem:[%s2221_s1 + $0x14] sm:$0xf] }
  0x93   : > { %1774 = vrot.lane.b32.xlu0 %v1773_v25, %s1842_s11  ;;  %351 = vrot.lane.b32.xlu1 %v343_v26, %s1840_s8 }
  0x94   : > { %1696 = vmatmul.mubr.msk.bf16.vlgmr.msra.gmra.mrb[0].mxu1 %vm356_vm4, %v336_v27 }
  0x95   : > { %599 = vmatprep.mubr.bf16.mxu1 %v1841_v24 }
  0x97   : > { %1779 = vrot.lane.b32.xlu0 %v1773_v25, %s1843_s12  ;;  %476 = vrot.lane.b32.xlu1 %v321_v20, %s1842_s11 }
  0x9b   : > { %612 = vrot.lane.b32.xlu0 %v341_v16, %s1844_s13  ;;  %545 = vrot.lane.b32.xlu1 %v321_v20, %s1843_s12 }
  0x9f   : > { %616 = vrot.lane.b32.xlu0 %v343_v26, %s1844_s13  ;;  %1784 = vrot.lane.b32.xlu1 %v1773_v25, %s1845_s14 }
  0xa3   : > { %677 = vrot.lane.b32.xlu0 %v321_v20, %s1845_s14  ;;  %614 = vrot.lane.b32.xlu1 %v342_v17, %s1844_s13 }
  0xa7   : > { %746 = vrot.lane.b32.xlu0 %v321_v20, %s1846_s15  ;;  %1789 = vrot.lane.b32.xlu1 %v1773_v25, %s1846_s15 }
  0xab   : > { %878 = vrot.lane.b32.xlu0 %v321_v20, %s1847_s16  ;;  %1794 = vrot.lane.b32.xlu1 %v1773_v25, %s1847_s16 }
  0xaf   : > { %815 = vrot.lane.b32.xlu0 %v342_v17, %s1848_s17  ;;  %813 = vrot.lane.b32.xlu1 %v341_v16, %s1848_s17  ;;  %v1703_v17 = vld [vmem:[%s2221_s1 + $0x10] sm:$0xf] }
  0xb3   : > { %817 = vrot.lane.b32.xlu1 %v343_v26, %s1848_s17  ;;  %946 = vperm.xlu0 %1798, %v943_v28  }
 0x101   : > { %v348_v29 = vpop.permute.xlu0 %347  ;;  %v350_v30 = vpop.permute.xlu1 %349 }
 0x102   : > { %v354_v32 = vsel %vm353_vm5, %v348_v29, %v350_v30 }
 0x103   : > { %v362_v39 = vsel %vm360_vm3, %v354_v32, 0 }
 0x105   : > { %v1775_v34 = vpop.permute.xlu0 %1774  ;;  %v352_v35 = vpop.permute.xlu1 %351 }
 0x106   : > { %v1777_v36 = vunpack.i.h.bf16 %v1775_v34  ;;  %v1776_v37 = vunpack.i.l.bf16 %v1775_v34  ;;  %v355_v38 = vsel %vm353_vm5, %v350_v30, %v352_v35 }
 0x107   : > { %1693 = vmatprep.subr.msk.bf16.mxu0 %vm360_vm3, %v355_v38 }
 0x108   : > { %368 = vmatpush1.bf16.msra.mxu0 %v362_v39  ;;  %v479_v41 = vsel %vm478_vm6, %v1776_v37, %v1777_v36 }
 0x109   : > { %v1780_v42 = vpop.permute.xlu0 %1779  ;;  %v477_v43 = vpop.permute.xlu1 %476  ;;  %v483_v44 = vsel %vm462_vm7, %v479_v41, 0.0 }
 0x10a   : > { %v1782_v45 = vunpack.i.h.bf16 %v1780_v42  ;;  %v1781_v46 = vunpack.i.l.bf16 %v1780_v42  ;;  %v480_v47 = vsel %vm478_vm6, %v1777_v36, %v477_v43  ;;  %v487_v48 = vpack.c.bf16 %v483_v44, %v483_v44  ;;  %v1709_v43 = vld [vmem:[%s2221_s1 + $0x18] sm:$0xf] }
 0x10b   : > { %v484_v49 = vsel %vm463_vm8, %v480_v47, 0.0  ;;  %1694 = vmatmul.mubr.msk.bf16.vlgmr.msra.gmra.mrb[0].mxu0 %vm356_vm4, %v1692_v40 }
 0x10c   : > { %v488_v50 = vpack.c.bf16 %v484_v49, %v484_v49  ;;  %530 = vmatprep.mubr.bf16.mxu0 %v1841_v24  ;;  %v548_v51 = vsel %vm547_vm9, %v1781_v46, %v1782_v45  ;;  %v493_v56 = vsel %vm360_vm3, %v487_v48, 0 }
 0x10d   : > { %v613_v52 = vpop.permute.xlu0 %612  ;;  %v546_v53 = vpop.permute.xlu1 %545  ;;  %v552_v54 = vsel %vm324_vm2, %v548_v51, 0.0 }
 0x10e   : > { %v549_v55 = vsel %vm547_vm9, %v1782_v45, %v546_v53  ;;  %1698 = vmatprep.subr.msk.bf16.mxu0 %vm360_vm3, %v488_v50  ;;  %v556_v57 = vpack.c.bf16 %v552_v54, %v552_v54  ;;  %v1715_v53 = vld [vmem:[%s2221_s1 + $0x20] sm:$0xf] }
 0x10f   : > { %v553_v58 = vsel %vm325_vm1, %v549_v55, 0.0  ;;  %499 = vmatpush1.bf16.msra.mxu0 %v493_v56 }
 0x110   : > { %v557_v59 = vpack.c.bf16 %v553_v58, %v553_v58  ;;  %v562_v2 = vsel %vm360_vm3, %v556_v57, 0  ;;  %v955_v58 = vcombine.high %v1903_v0, %v1903_v0 }
 0x111   : > { %v617_v61 = vpop.permute.xlu0 %616  ;;  %v1785_v62 = vpop.permute.xlu1 %1784 }
 0x112   : > { %v1787_v63 = vunpack.i.h.bf16 %v1785_v62  ;;  %v1786_v1 = vunpack.i.l.bf16 %v1785_v62  ;;  %1701 = vmatprep.subr.msk.bf16.mxu1 %vm360_vm3, %v557_v59  ;;  %v957_v59 = vpack.c.bf16 %v1903_v0, %v1903_v0  ;;  %v953_v62 = vld [vmem:[%s2225_s5] sm:$0xf] }
 0x113   : > { %1699 = vmatmul.mubr.msk.bf16.vlgmr.msra.gmra.mrb[4].mxu0 %vm356_vm4, %v1697_v60  ;;  %568 = vmatpush1.bf16.msra.mxu1 %v562_v2  ;;  %v958_v60 = vpack.c.bf16 %v955_v58, %v955_v58 }
 0x114   : > { %662 = vmatprep.mubr.bf16.mxu0 %v1841_v24  ;;  %v680_v4 = vsel %vm679_vm10, %v1786_v1, %v1787_v63 }
 0x115   : > { %v678_v5 = vpop.permute.xlu0 %677  ;;  %v615_v6 = vpop.permute.xlu1 %614  ;;  %v684_v7 = vsel %vm462_vm7, %v680_v4, 0.0 }
 0x116   : > { %v681_v8 = vsel %vm679_vm10, %v1787_v63, %v678_v5  ;;  %v619_v11 = vsel %vm618_vm11, %v613_v52, %v615_v6  ;;  %v620_v12 = vsel %vm618_vm11, %v615_v6, %v617_v61  ;;  %1702 = vmatmul.mubr.msk.bf16.vlgmr.msra.gmra.mrb[4].mxu1 %vm356_vm4, %v1700_v3  ;;  %v688_v13 = vpack.c.bf16 %v684_v7, %v684_v7  ;;  %v1712_v52 = vld [vmem:[%s2221_s1 + $0x1c] sm:$0xf] }
 0x117   : > { %v685_v14 = vsel %vm463_vm8, %v681_v8, 0.0  ;;  %v625_v15 = vsel %vm360_vm3, %v619_v11, 0  ;;  %1704 = vmatprep.subr.msk.bf16.mxu0 %vm360_vm3, %v620_v12  ;;  %731 = vmatprep.mubr.bf16.mxu1 %v1841_v24  ;;  %v969_v61 = vsel %vm360_vm3, %v957_v59, 0 }
 0x118   : > { %v689_v16 = vpack.c.bf16 %v685_v14, %v685_v14  ;;  %631 = vmatpush1.bf16.msra.mxu0 %v625_v15  ;;  %v694_v22 = vsel %vm360_vm3, %v688_v13, 0 }
 0x119   : > { %v747_v18 = vpop.permute.xlu0 %746  ;;  %v1790_v19 = vpop.permute.xlu1 %1789 }
 0x11a   : > { %v1792_v20 = vunpack.i.h.bf16 %v1790_v19  ;;  %v1791_v21 = vunpack.i.l.bf16 %v1790_v19  ;;  %1707 = vmatprep.subr.msk.bf16.mxu1 %vm360_vm3, %v689_v16 }
 0x11b   : > { %1705 = vmatmul.mubr.msk.bf16.vlgmr.msra.gmra.mrb[8].mxu0 %vm356_vm4, %v1703_v17  ;;  %700 = vmatpush1.bf16.msra.mxu1 %v694_v22 }
 0x11c   : > { %v750_v25 = vsel %vm748_vm12, %v1792_v20, %v747_v18  ;;  %v749_v26 = vsel %vm748_vm12, %v1791_v21, %v1792_v20  ;;  %800 = vmatprep.mubr.bf16.mxu0 %v1841_v24 }
 0x11d   : > { %v754_v27 = vsel %vm325_vm1, %v750_v25, 0.0  ;;  %v879_v28 = vpop.permute.xlu0 %878  ;;  %v1795_v29 = vpop.permute.xlu1 %1794  ;;  %v753_v30 = vsel %vm324_vm2, %v749_v26, 0.0 }
 0x11e   : > { %v1797_v32 = vunpack.i.h.bf16 %v1795_v29  ;;  %v1796_v34 = vunpack.i.l.bf16 %v1795_v29  ;;  %1708 = vmatmul.mubr.msk.bf16.vlgmr.msra.gmra.mrb[8].mxu1 %vm356_vm4, %v1706_v23  ;;  %v758_v35 = vpack.c.bf16 %v754_v27, %v754_v27  ;;  %v757_v36 = vpack.c.bf16 %v753_v30, %v753_v30 }
 0x11f   : > { %863 = vmatprep.mubr.bf16.mxu1 %v1841_v24 }
 0x120   : > { %v882_v37 = vsel %vm880_vm13, %v1797_v32, %v879_v28  ;;  %v881_v38 = vsel %vm880_vm13, %v1796_v34, %v1797_v32  ;;  %1710 = vmatprep.subr.msk.bf16.mxu0 %vm360_vm3, %v758_v35  ;;  %v763_v39 = vsel %vm360_vm3, %v757_v36, 0 }
 0x121   : > { %v886_v40 = vsel %vm463_vm8, %v882_v37, 0.0  ;;  %v816_v41 = vpop.permute.xlu0 %815  ;;  %v814_v42 = vpop.permute.xlu1 %813  ;;  %769 = vmatpush1.bf16.msra.mxu0 %v763_v39  ;;  %v885_v44 = vsel %vm462_vm7, %v881_v38, 0.0 }
 0x122   : > { %v890_v45 = vpack.c.bf16 %v886_v40, %v886_v40  ;;  %v889_v46 = vpack.c.bf16 %v885_v44, %v885_v44  ;;  %v820_v47 = vsel %vm819_vm14, %v814_v42, %v816_v41 }
 0x123   : > { %v826_v51 = vsel %vm360_vm3, %v820_v47, 0 }
 0x124   : > { %1711 = vmatmul.mubr.msk.bf16.vlgmr.msra.gmra.mrb[12].mxu0 %vm356_vm4, %v1709_v43  ;;  %1716 = vmatprep.subr.msk.bf16.mxu0 %vm360_vm3, %v890_v45  ;;  %v895_v48 = vsel %vm360_vm3, %v889_v46, 0 }
 0x125   : > { %v818_v49 = vpop.permute.xlu1 %817  ;;  %901 = vmatpush1.bf16.msra.mxu0 %v895_v48  ;;  %932 = vmatprep.mubr.bf16.mxu0 %v1841_v24 }
 0x126   : > { %v821_v50 = vsel %vm819_vm14, %v816_v41, %v818_v49 }
 0x127   : > { %1713 = vmatprep.subr.msk.bf16.mxu1 %vm360_vm3, %v821_v50 }
 0x128   : > { %832 = vmatpush1.bf16.msra.mxu1 %v826_v51 }
 0x129   : > { %1718 = vmatprep.subr.msk.bf16.mxu1 %vm360_vm3, %v958_v60  ;;  %vm1048_vm3 = vcmask 64512  }
 0x12b   : > { %1714 = vmatmul.mubr.msk.bf16.vlgmr.msra.gmra.mrb[12].mxu1 %vm356_vm4, %v1712_v52 }
 0x12c   : > { %1717 = vmatmul.mubr.msk.bf16.vlgmr.msra.gmra.mrb[16].mxu0 %vm356_vm4, %v1715_v53  ;;  %1006 = vmatprep.mubr.bf16.mxu1 %v1841_v24 }
 0x12d   : > { %1091 = vmatprep.mubr.bf16.mxu0 %v1841_v24  ;;  %975 = vmatpush1.bf16.msra.mxu1 %v969_v61 }
 0x132   : > { %v947_v41 = vpop.permute.xlu0 %946 }
 0x133   : > { %1719 = vmatmul.mubr.msk.bf16.vlgmr.msra.gmra.mrb[16].mxu1 %vm356_vm4, %v953_v62 }
 0x134   : > { %1141 = vmatprep.mubr.bf16.mxu1 %v1841_v24 }
 0x167   : > { %v451_v54 = vpop.f32.mrb[0].mxu1 }
 0x168   : > { %v453_v55 = vpop.f32.mrb[1].mxu1 }
 0x169   : > { %v455_v56 = vpop.f32.mrb[2].mxu1 }
 0x16a   : > { %v456_v57 = vpop.f32.mrb[3].mxu1 }
 0x1de   : > { %v401_v63 = vpop.f32.mrb[0].mxu0 }
 0x1df   : > { %v403_v1 = vpop.f32.mrb[1].mxu0  ;;  %v452_v2 = vadd.f32 %v451_v54, %v401_v63 }
 0x1e0   : > { %v405_v3 = vpop.f32.mrb[2].mxu0  ;;  %v454_v4 = vadd.f32 %v453_v55, %v403_v1 }
 0x1e1   : > { %v406_v0 = vpop.f32.mrb[3].mxu0 }
 0x1e6   : > { %v532_v5 = vpop.f32.mrb[4].mxu0 }
 0x1e7   : > { %v539_v6 = vadd.f32 %v532_v5, %v452_v2  ;;  %v534_v7 = vpop.f32.mrb[5].mxu0 }
 0x1e8   : > { %v540_v8 = vadd.f32 %v534_v7, %v454_v4  ;;  %v536_v11 = vpop.f32.mrb[6].mxu0 }
 0x1e9   : > { %v537_v12 = vpop.f32.mrb[7].mxu0  ;;  %v601_v13 = vpop.f32.mrb[4].mxu1  ;;  %v1029_v11 = vld [vmem:[%s2223_s3] sm:$0xf] }
 0x1ea   : > { %v608_v14 = vadd.f32 %v601_v13, %v539_v6  ;;  %v603_v15 = vpop.f32.mrb[5].mxu1 }
 0x1eb   : > { %v609_v16 = vadd.f32 %v603_v15, %v540_v8  ;;  %v605_v17 = vpop.f32.mrb[6].mxu1 }
 0x1ec   : > { %v606_v18 = vpop.f32.mrb[7].mxu1  ;;  %v1618_v17 = vld [vmem:[%s2224_s4] sm:$0xff] }
 0x1ee   : > { %v664_v19 = vpop.f32.mrb[8].mxu0 }
 0x1ef   : > { %v671_v20 = vadd.f32 %v664_v19, %v608_v14  ;;  %v666_v21 = vpop.f32.mrb[9].mxu0 }
 0x1f0   : > { %v672_v22 = vadd.f32 %v666_v21, %v609_v16  ;;  %v668_v23 = vpop.f32.mrb[10].mxu0  ;;  %v959_v16 = vld [vmem:[%s2226_s6] sm:$0xff] }
 0x1f1   : > { %v669_v25 = vpop.f32.mrb[11].mxu0  ;;  %v733_v26 = vpop.f32.mrb[8].mxu1 }
 0x1f2   : > { %v740_v27 = vadd.f32 %v733_v26, %v671_v20  ;;  %v735_v28 = vpop.f32.mrb[9].mxu1 }
 0x1f3   : > { %v741_v29 = vadd.f32 %v735_v28, %v672_v22  ;;  %v737_v30 = vpop.f32.mrb[10].mxu1 }
 0x1f4   : > { %v738_v32 = vpop.f32.mrb[11].mxu1 }
 0x1f7   : > { %v802_v34 = vpop.f32.mrb[12].mxu0 }
 0x1f8   : > { %v809_v35 = vadd.f32 %v802_v34, %v740_v27  ;;  %v804_v36 = vpop.f32.mrb[13].mxu0 }
 0x1f9   : > { %v810_v37 = vadd.f32 %v804_v36, %v741_v29  ;;  %v806_v38 = vpop.f32.mrb[14].mxu0  ;;  %v1720_v29 = vld [vmem:[%s2223_s3 + $0x4] sm:$0xf] }
 0x1fa   : > { %v807_v39 = vpop.f32.mrb[15].mxu0 }
 0x1fe   : > { %v865_v40 = vpop.f32.mrb[12].mxu1 }
 0x1ff   : > { %v872_v42 = vadd.f32 %v865_v40, %v809_v35  ;;  %v867_v43 = vpop.f32.mrb[13].mxu1  ;;  %v934_v44 = vpop.f32.mrb[16].mxu0 }
 0x200   : > { %v873_v45 = vadd.f32 %v867_v43, %v810_v37  ;;  %v869_v46 = vpop.f32.mrb[14].mxu1  ;;  %v936_v47 = vpop.f32.mrb[17].mxu0 }
 0x201   : > { %v941_v48 = vadd.f32 %v934_v44, %v872_v42  ;;  %v870_v49 = vpop.f32.mrb[15].mxu1  ;;  %v938_v50 = vpop.f32.mrb[18].mxu0 }
 0x202   : > { %v942_v51 = vadd.f32 %v936_v47, %v873_v45  ;;  %v939_v52 = vpop.f32.mrb[19].mxu0  ;;  %v1725_v50 = vld [vmem:[%s2223_s3 + $0x8] sm:$0xf] }
 0x203   : > { %v949_v53 = vadd.f32 %v947_v41, %v941_v48 }
 0x204   : > { %v950_v54 = vadd.f32 %v947_v41, %v942_v51 }
 0x205   : > { %v951_v55 = vmax.f32 %v949_v53, 0.0 }
 0x206   : > { %v952_v56 = vmax.f32 %v950_v54, 0.0  ;;  %v2108_v12 = vpop.f32.mrb[16].mxu1 }
 0x207   : > { %v2110_v13 = vpop.f32.mrb[17].mxu1 }
 0x208   : > { %v1799_v57 = vpack.i.bf16 %v952_v56, %v951_v55  ;;  %v1012_v14 = vpop.f32.mrb[18].mxu1  ;;  %v1728_v56 = vld [vmem:[%s2223_s3 + $0xc] sm:$0xf] }
 0x209   : > { %v1013_v15 = vpop.f32.mrb[19].mxu1  ;;  %v1734_v14 = vld [vmem:[%s2223_s3 + $0x14] sm:$0xf] }
 0x20a   : > { %1800 = vrot.lane.b32.xlu1 %v1799_v57, %s1839_s30 }
 0x27c   : > { %v1801_v58 = vpop.permute.xlu1 %1800 }
 0x27d   : > { %v1803_v59 = vunpack.i.h.bf16 %v1801_v58  ;;  %v1802_v60 = vunpack.i.l.bf16 %v1801_v58 }
 0x27f   : > { %v1021_v61 = vsel %vm315_vm0, %v1802_v60, %v1803_v59  ;;  %v1025_v62 = vsel %vm315_vm0, 0.0, %v1802_v60  ;;  %v1026_v4 = vsel %vm315_vm0, %v1803_v59, 0.0 }
 0x280   : > { %v1034_v63 = vpack.c.bf16 %v1025_v62, %v1025_v62  ;;  %v1035_v1 = vpack.c.bf16 %v1021_v61, %v1021_v61  ;;  %v1028_v2 = vsel %vm325_vm1, %v1021_v61, 0.0  ;;  %v1027_v3 = vsel %vm324_vm2, %v1025_v62, 0.0 }
 0x281   : > { %v1031_v0 = vpack.c.bf16 %v1028_v2, %v1028_v2  ;;  %v1030_v5 = vpack.c.bf16 %v1027_v3, %v1027_v3  ;;  %v1036_v7 = vpack.c.bf16 %v1026_v4, %v1026_v4  ;;  %v1804_v8 = vpack.i.bf16 %v1021_v61, %v1025_v62 }
 0x282   : > { %1040 = vrot.lane.b32.xlu1 %v1034_v63, %s1840_s8  ;;  %1042 = vrot.lane.b32.xlu0 %v1035_v1, %s1840_s8 }
 0x283   : > { %1723 = vmatprep.subr.msk.bf16.mxu1 %vm1052_vm15, %v1031_v0  ;;  %v1104_v6 = vsel %vm1052_vm15, %v1030_v5, 0  ;;  %v1731_v0 = vld [vmem:[%s2223_s3 + $0x10] sm:$0xf] }
 0x284   : > { %1110 = vmatpush1.bf16.msra.mxu1 %v1104_v6 }
 0x286   : > { %1044 = vrot.lane.b32.xlu1 %v1036_v7, %s1840_s8  ;;  %1805 = vrot.lane.b32.xlu0 %v1804_v8, %s1842_s11 }
 0x287   : > { %1724 = vmatmul.mubr.msk.bf16.vlgmr.msra.gmra.mrb[20].mxu1 %vm1048_vm3, %v1029_v11 }
 0x288   : > { %1277 = vmatprep.mubr.bf16.mxu1 %v1841_v24 }
 0x28a   : > { %1156 = vrot.lane.b32.xlu1 %v1026_v4, %s1842_s11  ;;  %1810 = vrot.lane.b32.xlu0 %v1804_v8, %s1843_s12 }
 0x28e   : > { %1224 = vrot.lane.b32.xlu1 %v1026_v4, %s1843_s12  ;;  %1290 = vrot.lane.b32.xlu0 %v1034_v63, %s1844_s13  ;;  %s278_s12 = scalar_lea.vmem %s2227_s7, %s1749_s28 }
 0x292   : > { %1815 = vrot.lane.b32.xlu1 %v1804_v8, %s1845_s14  ;;  %1294 = vrot.lane.b32.xlu0 %v1036_v7, %s1844_s13 }
 0x296   : > { %1292 = vrot.lane.b32.xlu1 %v1035_v1, %s1844_s13  ;;  %1354 = vrot.lane.b32.xlu0 %v1026_v4, %s1845_s14 }
 0x29a   : > { %1820 = vrot.lane.b32.xlu1 %v1804_v8, %s1846_s15  ;;  %1422 = vrot.lane.b32.xlu0 %v1026_v4, %s1846_s15 }
 0x29e   : > { %1825 = vrot.lane.b32.xlu1 %v1804_v8, %s1847_s16  ;;  %1552 = vrot.lane.b32.xlu0 %v1026_v4, %s1847_s16 }
 0x2a2   : > { %1488 = vrot.lane.b32.xlu1 %v1034_v63, %s1848_s17  ;;  %1490 = vrot.lane.b32.xlu0 %v1035_v1, %s1848_s17 }
 0x2a6   : > { %1492 = vrot.lane.b32.xlu1 %v1036_v7, %s1848_s17  ;;  %962 = vperm.xlu0 %1798, %v959_v16  }
 0x2aa   : > { %1621 = vperm.xlu1 %1829, %v1618_v17  }
 0x2f4   : > { %v1041_v18 = vpop.permute.xlu1 %1040  ;;  %v1043_v19 = vpop.permute.xlu0 %1042 }
 0x2f5   : > { %v1046_v20 = vsel %vm353_vm5, %v1041_v18, %v1043_v19 }
 0x2f6   : > { %v1054_v27 = vsel %vm1052_vm15, %v1046_v20, 0 }
 0x2f8   : > { %v1045_v21 = vpop.permute.xlu1 %1044  ;;  %v1806_v22 = vpop.permute.xlu0 %1805 }
 0x2f9   : > { %v1047_v23 = vsel %vm353_vm5, %v1043_v19, %v1045_v21  ;;  %v1808_v25 = vunpack.i.h.bf16 %v1806_v22  ;;  %v1807_v26 = vunpack.i.l.bf16 %v1806_v22 }
 0x2fa   : > { %1721 = vmatprep.subr.msk.bf16.mxu0 %vm1052_vm15, %v1047_v23 }
 0x2fb   : > { %v1158_v28 = vsel %vm478_vm6, %v1807_v26, %v1808_v25  ;;  %1060 = vmatpush1.bf16.msra.mxu0 %v1054_v27 }
 0x2fc   : > { %v1157_v30 = vpop.permute.xlu1 %1156  ;;  %v1811_v32 = vpop.permute.xlu0 %1810  ;;  %v1162_v34 = vsel %vm462_vm7, %v1158_v28, 0.0 }
 0x2fd   : > { %v1159_v35 = vsel %vm478_vm6, %v1808_v25, %v1157_v30  ;;  %v1813_v36 = vunpack.i.h.bf16 %v1811_v32  ;;  %v1812_v37 = vunpack.i.l.bf16 %v1811_v32  ;;  %v1166_v38 = vpack.c.bf16 %v1162_v34, %v1162_v34  ;;  %v1737_v30 = vld [vmem:[%s2223_s3 + $0x18] sm:$0xf] }
 0x2fe   : > { %v1163_v39 = vsel %vm463_vm8, %v1159_v35, 0.0  ;;  %1722 = vmatmul.mubr.msk.bf16.vlgmr.msra.gmra.mrb[20].mxu0 %vm1048_vm3, %v1720_v29 }
 0x2ff   : > { %v1167_v40 = vpack.c.bf16 %v1163_v39, %v1163_v39  ;;  %v1226_v41 = vsel %vm547_vm9, %v1812_v37, %v1813_v36  ;;  %1209 = vmatprep.mubr.bf16.mxu0 %v1841_v24  ;;  %v1172_v46 = vsel %vm1052_vm15, %v1166_v38, 0 }
 0x300   : > { %v1225_v42 = vpop.permute.xlu1 %1224  ;;  %v1291_v43 = vpop.permute.xlu0 %1290  ;;  %v1230_v44 = vsel %vm324_vm2, %v1226_v41, 0.0 }
 0x301   : > { %v1227_v45 = vsel %vm547_vm9, %v1813_v36, %v1225_v42  ;;  %1726 = vmatprep.subr.msk.bf16.mxu0 %vm1052_vm15, %v1167_v40  ;;  %v1234_v47 = vpack.c.bf16 %v1230_v44, %v1230_v44  ;;  %v1743_v40 = vld [vmem:[%s2223_s3 + $0x20] sm:$0xf] }
 0x302   : > { %v1231_v48 = vsel %vm325_vm1, %v1227_v45, 0.0  ;;  %1178 = vmatpush1.bf16.msra.mxu0 %v1172_v46 }
 0x303   : > { %v1235_v49 = vpack.c.bf16 %v1231_v48, %v1231_v48  ;;  %v1240_v55 = vsel %vm1052_vm15, %v1234_v47, 0 }
 0x304   : > { %v1816_v51 = vpop.permute.xlu1 %1815  ;;  %v1295_v52 = vpop.permute.xlu0 %1294 }
 0x305   : > { %v1818_v53 = vunpack.i.h.bf16 %v1816_v51  ;;  %v1817_v54 = vunpack.i.l.bf16 %v1816_v51  ;;  %1729 = vmatprep.subr.msk.bf16.mxu1 %vm1052_vm15, %v1235_v49 }
 0x306   : > { %1727 = vmatmul.mubr.msk.bf16.vlgmr.msra.gmra.mrb[24].mxu0 %vm1048_vm3, %v1725_v50  ;;  %1246 = vmatpush1.bf16.msra.mxu1 %v1240_v55 }
 0x307   : > { %v1356_v57 = vsel %vm679_vm10, %v1817_v54, %v1818_v53  ;;  %1339 = vmatprep.mubr.bf16.mxu0 %v1841_v24 }
 0x308   : > { %v1293_v58 = vpop.permute.xlu1 %1292  ;;  %v1355_v59 = vpop.permute.xlu0 %1354  ;;  %v1360_v60 = vsel %vm462_vm7, %v1356_v57, 0.0 }
 0x309   : > { %v1296_v61 = vsel %vm618_vm11, %v1291_v43, %v1293_v58  ;;  %v1297_v62 = vsel %vm618_vm11, %v1293_v58, %v1295_v52  ;;  %v1357_v63 = vsel %vm679_vm10, %v1818_v53, %v1355_v59  ;;  %1730 = vmatmul.mubr.msk.bf16.vlgmr.msra.gmra.mrb[24].mxu1 %vm1048_vm3, %v1728_v56  ;;  %v1364_v1 = vpack.c.bf16 %v1360_v60, %v1360_v60 }
 0x30a   : > { %v1302_v2 = vsel %vm1052_vm15, %v1296_v61, 0  ;;  %v1361_v3 = vsel %vm463_vm8, %v1357_v63, 0.0  ;;  %1732 = vmatprep.subr.msk.bf16.mxu0 %vm1052_vm15, %v1297_v62  ;;  %1407 = vmatprep.mubr.bf16.mxu1 %v1841_v24 }
 0x30b   : > { %v1365_v4 = vpack.c.bf16 %v1361_v3, %v1361_v3  ;;  %1308 = vmatpush1.bf16.msra.mxu0 %v1302_v2  ;;  %v1370_v11 = vsel %vm1052_vm15, %v1364_v1, 0 }
 0x30c   : > { %v1821_v5 = vpop.permute.xlu1 %1820  ;;  %v1423_v6 = vpop.permute.xlu0 %1422 }
 0x30d   : > { %v1823_v7 = vunpack.i.h.bf16 %v1821_v5  ;;  %v1822_v8 = vunpack.i.l.bf16 %v1821_v5  ;;  %1735 = vmatprep.subr.msk.bf16.mxu1 %vm1052_vm15, %v1365_v4 }
 0x30e   : > { %1733 = vmatmul.mubr.msk.bf16.vlgmr.msra.gmra.mrb[28].mxu0 %vm1048_vm3, %v1731_v0  ;;  %1376 = vmatpush1.bf16.msra.mxu1 %v1370_v11 }
 0x30f   : > { %v1424_v15 = vsel %vm748_vm12, %v1822_v8, %v1823_v7  ;;  %v1425_v16 = vsel %vm748_vm12, %v1823_v7, %v1423_v6  ;;  %1475 = vmatprep.mubr.bf16.mxu0 %v1841_v24 }
 0x310   : > { %v1429_v17 = vsel %vm325_vm1, %v1425_v16, 0.0  ;;  %v1826_v18 = vpop.permute.xlu1 %1825  ;;  %v1553_v19 = vpop.permute.xlu0 %1552  ;;  %v1428_v20 = vsel %vm324_vm2, %v1424_v15, 0.0 }
 0x311   : > { %v1433_v21 = vpack.c.bf16 %v1429_v17, %v1429_v17  ;;  %v1828_v22 = vunpack.i.h.bf16 %v1826_v18  ;;  %v1827_v23 = vunpack.i.l.bf16 %v1826_v18  ;;  %1736 = vmatmul.mubr.msk.bf16.vlgmr.msra.gmra.mrb[28].mxu1 %vm1048_vm3, %v1734_v14  ;;  %v1432_v25 = vpack.c.bf16 %v1428_v20, %v1428_v20 }
 0x312   : > { %1537 = vmatprep.mubr.bf16.mxu1 %v1841_v24 }
 0x313   : > { %v1554_v26 = vsel %vm880_vm13, %v1827_v23, %v1828_v22  ;;  %v1555_v27 = vsel %vm880_vm13, %v1828_v22, %v1553_v19  ;;  %1738 = vmatprep.subr.msk.bf16.mxu0 %vm1052_vm15, %v1433_v21  ;;  %v1438_v9 = vsel %vm1052_vm15, %v1432_v25, 0 }
 0x314   : > { %v1559_v10 = vsel %vm463_vm8, %v1555_v27, 0.0  ;;  %v1489_v28 = vpop.permute.xlu1 %1488  ;;  %v1491_v29 = vpop.permute.xlu0 %1490  ;;  %1444 = vmatpush1.bf16.msra.mxu0 %v1438_v9  ;;  %v1558_v32 = vsel %vm462_vm7, %v1554_v26, 0.0 }
 0x315   : > { %v1563_v34 = vpack.c.bf16 %v1559_v10, %v1559_v10  ;;  %v1562_v35 = vpack.c.bf16 %v1558_v32, %v1558_v32  ;;  %v1494_v36 = vsel %vm819_vm14, %v1489_v28, %v1491_v29 }
 0x316   : > { %v1500_v39 = vsel %vm1052_vm15, %v1494_v36, 0 }
 0x317   : > { %1739 = vmatmul.mubr.msk.bf16.vlgmr.msra.gmra.mrb[32].mxu0 %vm1048_vm3, %v1737_v30  ;;  %1744 = vmatprep.subr.msk.bf16.mxu0 %vm1052_vm15, %v1563_v34  ;;  %v1568_v33 = vsel %vm1052_vm15, %v1562_v35, 0 }
 0x318   : > { %v1493_v37 = vpop.permute.xlu1 %1492  ;;  %1574 = vmatpush1.bf16.msra.mxu0 %v1568_v33  ;;  %1605 = vmatprep.mubr.bf16.mxu0 %v1841_v24 }
 0x319   : > { %v1495_v38 = vsel %vm819_vm14, %v1491_v29, %v1493_v37 }
 0x31a   : > { %1741 = vmatprep.subr.msk.bf16.mxu1 %vm1052_vm15, %v1495_v38 }
 0x31b   : > { %1506 = vmatpush1.bf16.msra.mxu1 %v1500_v39 }
 0x31e   : > { %1742 = vmatmul.mubr.msk.bf16.vlgmr.msra.gmra.mrb[32].mxu1 %vm1048_vm3, %v1740_v31 }
 0x31f   : > { %1745 = vmatmul.mubr.msk.bf16.vlgmr.msra.gmra.mrb[36].mxu0 %vm1048_vm3, %v1743_v40 }
 0x325   : > { %v963_v20 = vpop.permute.xlu0 %962 }
 0x326   : > { %v1009_v10 = vadd.f32 %v2108_v12, %v963_v20  ;;  %v1011_v32 = vadd.f32 %v2110_v13, %v963_v20 }
 0x329   : > { %v1622_v35 = vpop.permute.xlu1 %1621 }
 0x35a   : > { %v1143_v24 = vpop.f32.mrb[20].mxu1 }
 0x35b   : > { %v1145_v41 = vpop.f32.mrb[21].mxu1 }
 0x35c   : > { %v1147_v42 = vpop.f32.mrb[22].mxu1 }
 0x35d   : > { %v1148_v43 = vpop.f32.mrb[23].mxu1 }
 0x3d1   : > { %v1093_v44 = vpop.f32.mrb[20].mxu0 }
 0x3d2   : > { %v1095_v45 = vpop.f32.mrb[21].mxu0  ;;  %v1144_v46 = vadd.f32 %v1143_v24, %v1093_v44 }
 0x3d3   : > { %v1097_v47 = vpop.f32.mrb[22].mxu0  ;;  %v1146_v48 = vadd.f32 %v1145_v41, %v1095_v45 }
 0x3d4   : > { %v1098_v49 = vpop.f32.mrb[23].mxu0 }
 0x3d9   : > { %v1211_v50 = vpop.f32.mrb[24].mxu0 }
 0x3da   : > { %v1218_v51 = vadd.f32 %v1211_v50, %v1144_v46  ;;  %v1213_v52 = vpop.f32.mrb[25].mxu0 }
 0x3db   : > { %v1219_v53 = vadd.f32 %v1213_v52, %v1146_v48  ;;  %v1215_v54 = vpop.f32.mrb[26].mxu0 }
 0x3dc   : > { %v1279_v55 = vpop.f32.mrb[24].mxu1  ;;  %v1216_v56 = vpop.f32.mrb[27].mxu0 }
 0x3dd   : > { %v1286_v57 = vadd.f32 %v1279_v55, %v1218_v51  ;;  %v1281_v58 = vpop.f32.mrb[25].mxu1 }
 0x3de   : > { %v1287_v59 = vadd.f32 %v1281_v58, %v1219_v53  ;;  %v1283_v60 = vpop.f32.mrb[26].mxu1 }
 0x3df   : > { %v1284_v61 = vpop.f32.mrb[27].mxu1 }
 0x3e1   : > { %v1341_v62 = vpop.f32.mrb[28].mxu0 }
 0x3e2   : > { %v1348_v63 = vadd.f32 %v1341_v62, %v1286_v57  ;;  %v1343_v1 = vpop.f32.mrb[29].mxu0 }
 0x3e3   : > { %v1349_v2 = vadd.f32 %v1343_v1, %v1287_v59  ;;  %v1345_v3 = vpop.f32.mrb[30].mxu0 }
 0x3e4   : > { %v1409_v4 = vpop.f32.mrb[28].mxu1  ;;  %v1346_v0 = vpop.f32.mrb[31].mxu0 }
 0x3e5   : > { %v1416_v5 = vadd.f32 %v1409_v4, %v1348_v63  ;;  %v1411_v6 = vpop.f32.mrb[29].mxu1 }
 0x3e6   : > { %v1417_v7 = vadd.f32 %v1411_v6, %v1349_v2  ;;  %v1413_v8 = vpop.f32.mrb[30].mxu1 }
 0x3e7   : > { %v1414_v11 = vpop.f32.mrb[31].mxu1 }
 0x3ea   : > { %v1477_v14 = vpop.f32.mrb[32].mxu0 }
 0x3eb   : > { %v1484_v15 = vadd.f32 %v1477_v14, %v1416_v5  ;;  %v1479_v16 = vpop.f32.mrb[33].mxu0 }
 0x3ec   : > { %v1485_v17 = vadd.f32 %v1479_v16, %v1417_v7  ;;  %v1481_v18 = vpop.f32.mrb[34].mxu0 }
 0x3ed   : > { %v1482_v19 = vpop.f32.mrb[35].mxu0 }
 0x3f1   : > { %v1539_v21 = vpop.f32.mrb[32].mxu1 }
 0x3f2   : > { %v1546_v22 = vadd.f32 %v1539_v21, %v1484_v15  ;;  %v1541_v23 = vpop.f32.mrb[33].mxu1  ;;  %v1607_v25 = vpop.f32.mrb[36].mxu0 }
 0x3f3   : > { %v1547_v26 = vadd.f32 %v1541_v23, %v1485_v17  ;;  %v1609_v27 = vpop.f32.mrb[37].mxu0  ;;  %v1543_v9 = vpop.f32.mrb[34].mxu1 }
 0x3f4   : > { %v1614_v28 = vadd.f32 %v1607_v25, %v1546_v22  ;;  %v1544_v29 = vpop.f32.mrb[35].mxu1  ;;  %v1611_v30 = vpop.f32.mrb[38].mxu0 }
 0x3f5   : > { %v1615_v34 = vadd.f32 %v1609_v27, %v1547_v26  ;;  %v1612_v36 = vpop.f32.mrb[39].mxu0 }
 0x3f6   : > { %v1616_v33 = vadd.f32 %v1614_v28, %v1009_v10 }
 0x3f7   : > { %v1617_v37 = vadd.f32 %v1615_v34, %v1011_v32 }
 0x3f8   : > { %v1624_v38 = vadd.f32 %v1622_v35, %v1616_v33 }
 0x3f9   : > { %v1625_v39 = vadd.f32 %v1622_v35, %v1617_v37 }
 0x3fa   : > { %1626 = vst [vmem:[%s278_s12] sm:$0xff] %v1624_v38 }
 0x3fb   : > { %1627 = vst [vmem:[%s278_s12 + $0x8] sm:$0xff] %v1625_v39 }
 0x3fc PF: > { %s17_s24 = sadd.s32 1, %s1837_s24  }
 0x3fd   : > { %p14_p4 = scmp.ge.s32.totalorder %s17_s24, 4  }
 0x3ff   :  { %16 = sbr.rel (!%p14_p4) target bundleno = 1 (0x1), region = 94 }

</bundles_post_ra>
